<compile_context>
chip_gen: v6e
topology: v6e:2x2x1
jax: 0.10.0
libtpu: 0.0.40
codegen_flags: <defaults>
</compile_context>

<pallas_src>
import functools
import math

import jax
import jax.numpy as jnp
from jax.experimental import pallas as pl
from jax.experimental.pallas import tpu as pltpu

_LN_EPS = 1e-5     # nn.LayerNorm default
_BN_EPS = 1e-5     # nn.BatchNorm1d default
_NORM_EPS = 1e-12  # F.normalize default


# ----------------------------------------------------------------------------- helpers
def _zero_index_map(i, *, n):
    return (0,) * n


def _layer_norm(x, g, b):
    mu = jnp.mean(x, axis=-1, keepdims=True)
    var = jnp.mean(jnp.square(x - mu), axis=-1, keepdims=True)
    return (x - mu) * jax.lax.rsqrt(var + _LN_EPS) * g + b


def _l2_normalize(x):
    # F.normalize(x, p=2, dim=-1) == x / max(||x||, eps); rsqrt goes to the EUP.
    n2 = jnp.sum(x * x, axis=-1, keepdims=True)
    return x * jax.lax.rsqrt(jnp.maximum(n2, _NORM_EPS * _NORM_EPS))


# ----------------------------------------------------------------------------- fused kernel
def _fused_forward_kernel(
    # activations
    mo_h_ref, car_h_ref, crop_ref, motion_ref,
    # lang_mo_fc : LayerNorm(D) -> ReLU -> Linear(D, D)
    mo_ln_g_ref, mo_ln_b_ref, mo_w_ref, mo_b_ref,
    # lang_car_fc
    car_ln_g_ref, car_ln_b_ref, car_w_ref, car_b_ref,
    # domian_vis_fc / domian_vis_fc_bk : Conv2d(C, D, k=1) == (C, D) matmul (bf16)
    vis_w_ref, vis_b_ref, vis_bk_w_ref, vis_bk_b_ref,
    # vis_fc_merge : Linear(2D,2D) -> BN1d (eval) -> ReLU -> Linear(2D,M)
    vm_w1_ref, vm_b1_ref, vm_bn_g_ref, vm_bn_b_ref, vm_bn_m_ref, vm_bn_v_ref,
    vm_w2_ref, vm_b2_ref,
    # lang_fc_merge : LayerNorm(2D) -> Linear(2D,2D) -> ReLU -> Linear(2D,M)
    lm_ln_g_ref, lm_ln_b_ref, lm_w1_ref, lm_b1_ref, lm_w2_ref, lm_b2_ref,
    # outputs (L2-normalized)
    vis_car_o, lang_car_o, vis_mo_o, lang_mo_o, vis_merge_o, lang_merge_o,
    # VMEM scratch (concat buffers)
    vis_cat_ref, lang_cat_ref,
):
    D = vis_w_ref.shape[1]
    S = mo_h_ref.shape[1]
    inv_s = jnp.float32(1.0 / S)

    # ---- text side: unmasked mean pool (== torch.mean(last_hidden_state, dim=1))
    lang_mo = jnp.sum(mo_h_ref[...], axis=1) * inv_s                       # (B, D)
    lang_mo = jnp.maximum(_layer_norm(lang_mo, mo_ln_g_ref[...], mo_ln_b_ref[...]), 0.0)
    lang_mo = (jnp.dot(lang_mo, mo_w_ref[...], preferred_element_type=jnp.float32)
               + mo_b_ref[...])

    lang_car = jnp.sum(car_h_ref[...], axis=1) * inv_s
    lang_car = jnp.maximum(_layer_norm(lang_car, car_ln_g_ref[...], car_ln_b_ref[...]), 0.0)
    lang_car = (jnp.dot(lang_car, car_w_ref[...], preferred_element_type=jnp.float32)
                + car_b_ref[...])

    # ---- visual side: 1x1 conv as matmul (bf16 inputs, f32 accumulation)
    vis_car = (jnp.dot(crop_ref[...].astype(vis_w_ref.dtype), vis_w_ref[...],
                       preferred_element_type=jnp.float32) + vis_b_ref[...])
    vis_mo = (jnp.dot(motion_ref[...].astype(vis_bk_w_ref.dtype), vis_bk_w_ref[...],
                      preferred_element_type=jnp.float32) + vis_bk_b_ref[...])

    # ---- HEAD.CAT_TRAIN merges: concat done in VMEM scratch (no HBM traffic)
    vis_cat_ref[:, 0:D] = vis_car
    vis_cat_ref[:, D:2 * D] = vis_mo
    lang_cat_ref[:, 0:D] = lang_car
    lang_cat_ref[:, D:2 * D] = lang_mo

    # vis_fc_merge: Linear -> BatchNorm1d (running stats) -> ReLU -> Linear
    y = (jnp.dot(vis_cat_ref[...], vm_w1_ref[...], preferred_element_type=jnp.float32)
         + vm_b1_ref[...])
    y = ((y - vm_bn_m_ref[...]) * jax.lax.rsqrt(vm_bn_v_ref[...] + _BN_EPS)
         * vm_bn_g_ref[...] + vm_bn_b_ref[...])
    y = jnp.maximum(y, 0.0)
    vis_merge = (jnp.dot(y, vm_w2_ref[...], preferred_element_type=jnp.float32)
                 + vm_b2_ref[...])

    # lang_fc_merge: LayerNorm -> Linear -> ReLU -> Linear
    z = _layer_norm(lang_cat_ref[...], lm_ln_g_ref[...], lm_ln_b_ref[...])
    z = jnp.dot(z, lm_w1_ref[...], preferred_element_type=jnp.float32) + lm_b1_ref[...]
    z = jnp.maximum(z, 0.0)
    lang_merge = (jnp.dot(z, lm_w2_ref[...], preferred_element_type=jnp.float32)
                  + lm_b2_ref[...])

    # ---- fused L2 normalizations
    vis_car_o[...] = _l2_normalize(vis_car)
    lang_car_o[...] = _l2_normalize(lang_car)
    vis_mo_o[...] = _l2_normalize(vis_mo)
    lang_mo_o[...] = _l2_normalize(lang_mo)
    vis_merge_o[...] = _l2_normalize(vis_merge)
    lang_merge_o[...] = _l2_normalize(lang_merge)


# ----------------------------------------------------------------------------- params
def init_params(key, *, embed_dim, merge_dim, img_in_dim):
    D, M, C = embed_dim, merge_dim, img_in_dim
    D2 = 2 * D
    ks = iter(jax.random.split(key, 32))

    def w(shape, scale=0.02):
        return (scale * jax.random.normal(next(ks), shape)).astype(jnp.float32)

    ones = lambda s: jnp.ones(s, jnp.float32)
    zeros = lambda s: jnp.zeros(s, jnp.float32)

    return dict(
        logit_scale=jnp.ones((), jnp.float32),
        # lang_mo_fc
        mo_ln_g=ones((D,)), mo_ln_b=zeros((D,)), mo_w=w((D, D)), mo_b=w((D,)),
        # lang_car_fc
        car_ln_g=ones((D,)), car_ln_b=zeros((D,)), car_w=w((D, D)), car_b=w((D,)),
        # domian_vis_fc / _bk (bf16 weights: only nontrivial HBM traffic, MXU-native)
        vis_w=w((C, D)).astype(jnp.bfloat16), vis_b=w((D,)),
        vis_bk_w=w((C, D)).astype(jnp.bfloat16), vis_bk_b=w((D,)),
        # vis_fc_merge
        vm_w1=w((D2, D2)), vm_b1=w((D2,)),
        vm_bn_g=ones((D2,)), vm_bn_b=zeros((D2,)),
        vm_bn_mean=zeros((D2,)), vm_bn_var=ones((D2,)),
        vm_w2=w((D2, M)), vm_b2=w((M,)),
        # lang_fc_merge
        lm_ln_g=ones((D2,)), lm_ln_b=zeros((D2,)),
        lm_w1=w((D2, D2)), lm_b1=w((D2,)),
        lm_w2=w((D2, M)), lm_b2=w((M,)),
    )


# ----------------------------------------------------------------------------- forward
def forward(params, nl_mo_hidden, nl_mo_mask, nl_car_hidden, nl_car_mask,
            crop_feats, motion_feats):
    # Attention masks are only consumed inside the omitted BERT backbone.
    del nl_mo_mask, nl_car_mask
    p = params
    B, S, D = nl_mo_hidden.shape
    C = crop_feats.shape[1]
    D2 = 2 * D
    M = p["vm_w2"].shape[1]

    # pad the batch (sublane) dim to a full 8-row f32 tile -> unmasked stores
    Bp = max(8, ((B + 7) // 8) * 8)

    def pad_b(x):
        if x.shape[0] == Bp:
            return x
        return jnp.pad(x, [(0, Bp - x.shape[0])] + [(0, 0)] * (x.ndim - 1))

    row = lambda v: v.reshape(1, -1)

    inputs = [
        pad_b(nl_mo_hidden), pad_b(nl_car_hidden), pad_b(crop_feats), pad_b(motion_feats),
        row(p["mo_ln_g"]), row(p["mo_ln_b"]), p["mo_w"], row(p["mo_b"]),
        row(p["car_ln_g"]), row(p["car_ln_b"]), p["car_w"], row(p["car_b"]),
        p["vis_w"], row(p["vis_b"]), p["vis_bk_w"], row(p["vis_bk_b"]),
        p["vm_w1"], row(p["vm_b1"]), row(p["vm_bn_g"]), row(p["vm_bn_b"]),
        row(p["vm_bn_mean"]), row(p["vm_bn_var"]), p["vm_w2"], row(p["vm_b2"]),
        row(p["lm_ln_g"]), row(p["lm_ln_b"]), p["lm_w1"], row(p["lm_b1"]),
        p["lm_w2"], row(p["lm_b2"]),
    ]

    out_shapes = (
        jax.ShapeDtypeStruct((Bp, D), jnp.float32),   # vis_car  (normalized)
        jax.ShapeDtypeStruct((Bp, D), jnp.float32),   # lang_car
        jax.ShapeDtypeStruct((Bp, D), jnp.float32),   # vis_mo
        jax.ShapeDtypeStruct((Bp, D), jnp.float32),   # lang_mo
        jax.ShapeDtypeStruct((Bp, M), jnp.float32),   # vis_merge
        jax.ShapeDtypeStruct((Bp, M), jnp.float32),   # lang_merge
    )

    in_specs = [
        pl.BlockSpec(x.shape, functools.partial(_zero_index_map, n=x.ndim))
        for x in inputs
    ]
    out_specs = tuple(
        pl.BlockSpec(s.shape, functools.partial(_zero_index_map, n=len(s.shape)))
        for s in out_shapes
    )

    # advisory cost hint for XLA scheduling around the custom call
    flops = 2 * Bp * (2 * D * D + 2 * C * D + 2 * D2 * D2 + 2 * D2 * M)
    bytes_accessed = (
        sum(int(x.size) * x.dtype.itemsize for x in inputs)
        + sum(math.prod(s.shape) * 4 for s in out_shapes)
    )
    cost = pl.CostEstimate(flops=flops, transcendentals=16 * Bp,
                           bytes_accessed=bytes_accessed)

    outs = pl.pallas_call(
        _fused_forward_kernel,
        grid=(1,),
        in_specs=in_specs,
        out_specs=out_specs,
        out_shape=out_shapes,
        scratch_shapes=[
            pltpu.VMEM((Bp, D2), jnp.float32),   # vis concat buffer
            pltpu.VMEM((Bp, D2), jnp.float32),   # lang concat buffer
        ],
        compiler_params=pltpu.CompilerParams(
            dimension_semantics=("arbitrary",),
            vmem_limit_bytes=16 * 1024 * 1024,   # ~4 MiB live; generous headroom
        ),
        cost_estimate=cost,
    )(*inputs)

    vis_car_n, lang_car_n, vis_mo_n, lang_mo_n, vis_merge_n, lang_merge_n = (
        o[:B] for o in outs
    )

    return {
        "pairs": [
            (vis_car_n, lang_car_n),
            (vis_mo_n, lang_mo_n),
            (vis_merge_n, lang_merge_n),
        ],
        "logit_scale": p["logit_scale"],
        "cls_logits": [],  # training-only id_cls heads skipped (eval forward)
    }


# ----------------------------------------------------------------------------- main
if __name__ == "__main__":
    B, S, D, M, C = 2, 8, 128, 128, 2048  # batch, seq, EMBED_DIM, MERGE_DIM, img_in_dim
    key = jax.random.PRNGKey(0)
    k_p, k1, k2, k3, k4 = jax.random.split(key, 5)

    params = init_params(k_p, embed_dim=D, merge_dim=M, img_in_dim=C)

    nl_mo_hidden = jax.random.normal(k1, (B, S, D), jnp.float32)   # BERT last_hidden_state (motion text)
    nl_car_hidden = jax.random.normal(k2, (B, S, D), jnp.float32)  # BERT last_hidden_state (car text)
    nl_mo_mask = jnp.ones((B, S), jnp.int32)
    nl_car_mask = jnp.ones((B, S), jnp.int32)
    crop_feats = jax.random.normal(k3, (B, C), jnp.float32)        # se_resnext50 pooled feats (crops)
    motion_feats = jax.random.normal(k4, (B, C), jnp.float32)      # se_resnext50_bk pooled feats (motion)

    out = forward(params, nl_mo_hidden, nl_mo_mask, nl_car_hidden, nl_car_mask,
                  crop_feats, motion_feats)
    out = jax.block_until_ready(out)

    for v, l in out["pairs"]:
        assert bool(jnp.all(jnp.isfinite(v))) and bool(jnp.all(jnp.isfinite(l)))
        assert bool(jnp.allclose(jnp.linalg.norm(v, axis=-1), 1.0, atol=1e-4))
        assert bool(jnp.allclose(jnp.linalg.norm(l, axis=-1), 1.0, atol=1e-4))

    print("KERNEL_OK")
</pallas_src>

<mosaic_0001>
module attributes {stable_mosaic.version = 11 : i64} {
  func.func @_fused_forward_kernel(%arg0: i32, %arg1: memref<8x8x128xf32, #tpu.memory_space<vmem>>, %arg2: memref<8x8x128xf32, #tpu.memory_space<vmem>>, %arg3: memref<8x2048xf32, #tpu.memory_space<vmem>>, %arg4: memref<8x2048xf32, #tpu.memory_space<vmem>>, %arg5: memref<1x128xf32, #tpu.memory_space<vmem>>, %arg6: memref<1x128xf32, #tpu.memory_space<vmem>>, %arg7: memref<128x128xf32, #tpu.memory_space<vmem>>, %arg8: memref<1x128xf32, #tpu.memory_space<vmem>>, %arg9: memref<1x128xf32, #tpu.memory_space<vmem>>, %arg10: memref<1x128xf32, #tpu.memory_space<vmem>>, %arg11: memref<128x128xf32, #tpu.memory_space<vmem>>, %arg12: memref<1x128xf32, #tpu.memory_space<vmem>>, %arg13: memref<2048x128xbf16, #tpu.memory_space<vmem>>, %arg14: memref<1x128xf32, #tpu.memory_space<vmem>>, %arg15: memref<2048x128xbf16, #tpu.memory_space<vmem>>, %arg16: memref<1x128xf32, #tpu.memory_space<vmem>>, %arg17: memref<256x256xf32, #tpu.memory_space<vmem>>, %arg18: memref<1x256xf32, #tpu.memory_space<vmem>>, %arg19: memref<1x256xf32, #tpu.memory_space<vmem>>, %arg20: memref<1x256xf32, #tpu.memory_space<vmem>>, %arg21: memref<1x256xf32, #tpu.memory_space<vmem>>, %arg22: memref<1x256xf32, #tpu.memory_space<vmem>>, %arg23: memref<256x128xf32, #tpu.memory_space<vmem>>, %arg24: memref<1x128xf32, #tpu.memory_space<vmem>>, %arg25: memref<1x256xf32, #tpu.memory_space<vmem>>, %arg26: memref<1x256xf32, #tpu.memory_space<vmem>>, %arg27: memref<256x256xf32, #tpu.memory_space<vmem>>, %arg28: memref<1x256xf32, #tpu.memory_space<vmem>>, %arg29: memref<256x128xf32, #tpu.memory_space<vmem>>, %arg30: memref<1x128xf32, #tpu.memory_space<vmem>>, %arg31: memref<8x128xf32, #tpu.memory_space<vmem>>, %arg32: memref<8x128xf32, #tpu.memory_space<vmem>>, %arg33: memref<8x128xf32, #tpu.memory_space<vmem>>, %arg34: memref<8x128xf32, #tpu.memory_space<vmem>>, %arg35: memref<8x128xf32, #tpu.memory_space<vmem>>, %arg36: memref<8x128xf32, #tpu.memory_space<vmem>>, %arg37: memref<8x256xf32, #tpu.memory_space<vmem>>, %arg38: memref<8x256xf32, #tpu.memory_space<vmem>>) attributes {dimension_semantics = [#tpu.dimension_semantics<arbitrary>], iteration_bounds = array<i64: 1>, scalar_prefetch = 0 : i64, scratch_operands = 2 : i64, tpu.core_type = #tpu.core_type<tc>, window_params = [{pipeline_mode = #tpu.pipeline_mode<synchronous>, transform_indices = @transform_0, window_bounds = array<i64: 8, 8, 128>}, {pipeline_mode = #tpu.pipeline_mode<synchronous>, transform_indices = @transform_1, window_bounds = array<i64: 8, 8, 128>}, {pipeline_mode = #tpu.pipeline_mode<synchronous>, transform_indices = @transform_2, window_bounds = array<i64: 8, 2048>}, {pipeline_mode = #tpu.pipeline_mode<synchronous>, transform_indices = @transform_3, window_bounds = array<i64: 8, 2048>}, {pipeline_mode = #tpu.pipeline_mode<synchronous>, transform_indices = @transform_4, window_bounds = array<i64: 1, 128>}, {pipeline_mode = #tpu.pipeline_mode<synchronous>, transform_indices = @transform_5, window_bounds = array<i64: 1, 128>}, {pipeline_mode = #tpu.pipeline_mode<synchronous>, transform_indices = @transform_6, window_bounds = array<i64: 128, 128>}, {pipeline_mode = #tpu.pipeline_mode<synchronous>, transform_indices = @transform_7, window_bounds = array<i64: 1, 128>}, {pipeline_mode = #tpu.pipeline_mode<synchronous>, transform_indices = @transform_8, window_bounds = array<i64: 1, 128>}, {pipeline_mode = #tpu.pipeline_mode<synchronous>, transform_indices = @transform_9, window_bounds = array<i64: 1, 128>}, {pipeline_mode = #tpu.pipeline_mode<synchronous>, transform_indices = @transform_10, window_bounds = array<i64: 128, 128>}, {pipeline_mode = #tpu.pipeline_mode<synchronous>, transform_indices = @transform_11, window_bounds = array<i64: 1, 128>}, {pipeline_mode = #tpu.pipeline_mode<synchronous>, transform_indices = @transform_12, window_bounds = array<i64: 2048, 128>}, {pipeline_mode = #tpu.pipeline_mode<synchronous>, transform_indices = @transform_13, window_bounds = array<i64: 1, 128>}, {pipeline_mode = #tpu.pipeline_mode<synchronous>, transform_indices = @transform_14, window_bounds = array<i64: 2048, 128>}, {pipeline_mode = #tpu.pipeline_mode<synchronous>, transform_indices = @transform_15, window_bounds = array<i64: 1, 128>}, {pipeline_mode = #tpu.pipeline_mode<synchronous>, transform_indices = @transform_16, window_bounds = array<i64: 256, 256>}, {pipeline_mode = #tpu.pipeline_mode<synchronous>, transform_indices = @transform_17, window_bounds = array<i64: 1, 256>}, {pipeline_mode = #tpu.pipeline_mode<synchronous>, transform_indices = @transform_18, window_bounds = array<i64: 1, 256>}, {pipeline_mode = #tpu.pipeline_mode<synchronous>, transform_indices = @transform_19, window_bounds = array<i64: 1, 256>}, {pipeline_mode = #tpu.pipeline_mode<synchronous>, transform_indices = @transform_20, window_bounds = array<i64: 1, 256>}, {pipeline_mode = #tpu.pipeline_mode<synchronous>, transform_indices = @transform_21, window_bounds = array<i64: 1, 256>}, {pipeline_mode = #tpu.pipeline_mode<synchronous>, transform_indices = @transform_22, window_bounds = array<i64: 256, 128>}, {pipeline_mode = #tpu.pipeline_mode<synchronous>, transform_indices = @transform_23, window_bounds = array<i64: 1, 128>}, {pipeline_mode = #tpu.pipeline_mode<synchronous>, transform_indices = @transform_24, window_bounds = array<i64: 1, 256>}, {pipeline_mode = #tpu.pipeline_mode<synchronous>, transform_indices = @transform_25, window_bounds = array<i64: 1, 256>}, {pipeline_mode = #tpu.pipeline_mode<synchronous>, transform_indices = @transform_26, window_bounds = array<i64: 256, 256>}, {pipeline_mode = #tpu.pipeline_mode<synchronous>, transform_indices = @transform_27, window_bounds = array<i64: 1, 256>}, {pipeline_mode = #tpu.pipeline_mode<synchronous>, transform_indices = @transform_28, window_bounds = array<i64: 256, 128>}, {pipeline_mode = #tpu.pipeline_mode<synchronous>, transform_indices = @transform_29, window_bounds = array<i64: 1, 128>}, {pipeline_mode = #tpu.pipeline_mode<synchronous>, transform_indices = @transform_30, window_bounds = array<i64: 8, 128>}, {pipeline_mode = #tpu.pipeline_mode<synchronous>, transform_indices = @transform_31, window_bounds = array<i64: 8, 128>}, {pipeline_mode = #tpu.pipeline_mode<synchronous>, transform_indices = @transform_32, window_bounds = array<i64: 8, 128>}, {pipeline_mode = #tpu.pipeline_mode<synchronous>, transform_indices = @transform_33, window_bounds = array<i64: 8, 128>}, {pipeline_mode = #tpu.pipeline_mode<synchronous>, transform_indices = @transform_34, window_bounds = array<i64: 8, 128>}, {pipeline_mode = #tpu.pipeline_mode<synchronous>, transform_indices = @transform_35, window_bounds = array<i64: 8, 128>}]} {
    %c0 = arith.constant 0 : index
    %c0_0 = arith.constant 0 : index
    %c0_1 = arith.constant 0 : index
    %0 = vector.load %arg1[%c0, %c0_0, %c0_1] : memref<8x8x128xf32, #tpu.memory_space<vmem>>, vector<8x8x128xf32>
    %cst = arith.constant dense<0.000000e+00> : vector<8x128xf32>
    %1 = vector.multi_reduction <add>, %0, %cst [1] : vector<8x8x128xf32> to vector<8x128xf32>
    %cst_2 = arith.constant 1.250000e-01 : f32
    %2 = vector.broadcast %cst_2 : f32 to vector<8x128xf32>
    %3 = arith.mulf %1, %2 : vector<8x128xf32>
    %c0_3 = arith.constant 0 : index
    %c0_4 = arith.constant 0 : index
    %4 = vector.load %arg5[%c0_3, %c0_4] : memref<1x128xf32, #tpu.memory_space<vmem>>, vector<1x128xf32>
    %c0_5 = arith.constant 0 : index
    %c0_6 = arith.constant 0 : index
    %5 = vector.load %arg6[%c0_5, %c0_6] : memref<1x128xf32, #tpu.memory_space<vmem>>, vector<1x128xf32>
    %cst_7 = arith.constant dense<0.000000e+00> : vector<8xf32>
    %6 = vector.multi_reduction <add>, %3, %cst_7 [1] : vector<8x128xf32> to vector<8xf32>
    %7 = vector.shape_cast %6 : vector<8xf32> to vector<8x1xf32>
    %cst_8 = arith.constant 1.280000e+02 : f32
    %8 = vector.broadcast %cst_8 : f32 to vector<8x1xf32>
    %9 = arith.divf %7, %8 : vector<8x1xf32>
    %10 = vector.broadcast %9 : vector<8x1xf32> to vector<8x128xf32>
    %11 = arith.subf %3, %10 : vector<8x128xf32>
    %12 = arith.mulf %11, %11 : vector<8x128xf32>
    %cst_9 = arith.constant dense<0.000000e+00> : vector<8xf32>
    %13 = vector.multi_reduction <add>, %12, %cst_9 [1] : vector<8x128xf32> to vector<8xf32>
    %14 = vector.shape_cast %13 : vector<8xf32> to vector<8x1xf32>
    %cst_10 = arith.constant 1.280000e+02 : f32
    %15 = vector.broadcast %cst_10 : f32 to vector<8x1xf32>
    %16 = arith.divf %14, %15 : vector<8x1xf32>
    %17 = vector.broadcast %9 : vector<8x1xf32> to vector<8x128xf32>
    %18 = arith.subf %3, %17 : vector<8x128xf32>
    %cst_11 = arith.constant 9.99999974E-6 : f32
    %19 = vector.broadcast %cst_11 : f32 to vector<8x1xf32>
    %20 = arith.addf %16, %19 : vector<8x1xf32>
    %21 = math.rsqrt %20 : vector<8x1xf32>
    %22 = vector.broadcast %21 : vector<8x1xf32> to vector<8x128xf32>
    %23 = arith.mulf %18, %22 : vector<8x128xf32>
    %24 = vector.broadcast %4 : vector<1x128xf32> to vector<8x128xf32>
    %25 = arith.mulf %23, %24 : vector<8x128xf32>
    %26 = vector.broadcast %5 : vector<1x128xf32> to vector<8x128xf32>
    %27 = arith.addf %25, %26 : vector<8x128xf32>
    %cst_12 = arith.constant 0.000000e+00 : f32
    %28 = vector.broadcast %cst_12 : f32 to vector<8x128xf32>
    %29 = arith.maximumf %27, %28 : vector<8x128xf32>
    %c0_13 = arith.constant 0 : index
    %c0_14 = arith.constant 0 : index
    %30 = vector.load %arg7[%c0_13, %c0_14] : memref<128x128xf32, #tpu.memory_space<vmem>>, vector<128x128xf32>
    %cst_15 = arith.constant dense<0.000000e+00> : vector<8x128xf32>
    %31 = tpu.matmul %29, %30, %cst_15 {dimension_numbers = #tpu.dot_dimension_numbers<[1], [0], [0], [1], [0, 0, 1, 1], [], []>} : vector<8x128xf32>, vector<128x128xf32>, vector<8x128xf32> -> vector<8x128xf32>
    %c0_16 = arith.constant 0 : index
    %c0_17 = arith.constant 0 : index
    %32 = vector.load %arg8[%c0_16, %c0_17] : memref<1x128xf32, #tpu.memory_space<vmem>>, vector<1x128xf32>
    %33 = vector.broadcast %32 : vector<1x128xf32> to vector<8x128xf32>
    %34 = arith.addf %31, %33 : vector<8x128xf32>
    %c0_18 = arith.constant 0 : index
    %c0_19 = arith.constant 0 : index
    %c0_20 = arith.constant 0 : index
    %35 = vector.load %arg2[%c0_18, %c0_19, %c0_20] : memref<8x8x128xf32, #tpu.memory_space<vmem>>, vector<8x8x128xf32>
    %cst_21 = arith.constant dense<0.000000e+00> : vector<8x128xf32>
    %36 = vector.multi_reduction <add>, %35, %cst_21 [1] : vector<8x8x128xf32> to vector<8x128xf32>
    %cst_22 = arith.constant 1.250000e-01 : f32
    %37 = vector.broadcast %cst_22 : f32 to vector<8x128xf32>
    %38 = arith.mulf %36, %37 : vector<8x128xf32>
    %c0_23 = arith.constant 0 : index
    %c0_24 = arith.constant 0 : index
    %39 = vector.load %arg9[%c0_23, %c0_24] : memref<1x128xf32, #tpu.memory_space<vmem>>, vector<1x128xf32>
    %c0_25 = arith.constant 0 : index
    %c0_26 = arith.constant 0 : index
    %40 = vector.load %arg10[%c0_25, %c0_26] : memref<1x128xf32, #tpu.memory_space<vmem>>, vector<1x128xf32>
    %cst_27 = arith.constant dense<0.000000e+00> : vector<8xf32>
    %41 = vector.multi_reduction <add>, %38, %cst_27 [1] : vector<8x128xf32> to vector<8xf32>
    %42 = vector.shape_cast %41 : vector<8xf32> to vector<8x1xf32>
    %cst_28 = arith.constant 1.280000e+02 : f32
    %43 = vector.broadcast %cst_28 : f32 to vector<8x1xf32>
    %44 = arith.divf %42, %43 : vector<8x1xf32>
    %45 = vector.broadcast %44 : vector<8x1xf32> to vector<8x128xf32>
    %46 = arith.subf %38, %45 : vector<8x128xf32>
    %47 = arith.mulf %46, %46 : vector<8x128xf32>
    %cst_29 = arith.constant dense<0.000000e+00> : vector<8xf32>
    %48 = vector.multi_reduction <add>, %47, %cst_29 [1] : vector<8x128xf32> to vector<8xf32>
    %49 = vector.shape_cast %48 : vector<8xf32> to vector<8x1xf32>
    %cst_30 = arith.constant 1.280000e+02 : f32
    %50 = vector.broadcast %cst_30 : f32 to vector<8x1xf32>
    %51 = arith.divf %49, %50 : vector<8x1xf32>
    %52 = vector.broadcast %44 : vector<8x1xf32> to vector<8x128xf32>
    %53 = arith.subf %38, %52 : vector<8x128xf32>
    %cst_31 = arith.constant 9.99999974E-6 : f32
    %54 = vector.broadcast %cst_31 : f32 to vector<8x1xf32>
    %55 = arith.addf %51, %54 : vector<8x1xf32>
    %56 = math.rsqrt %55 : vector<8x1xf32>
    %57 = vector.broadcast %56 : vector<8x1xf32> to vector<8x128xf32>
    %58 = arith.mulf %53, %57 : vector<8x128xf32>
    %59 = vector.broadcast %39 : vector<1x128xf32> to vector<8x128xf32>
    %60 = arith.mulf %58, %59 : vector<8x128xf32>
    %61 = vector.broadcast %40 : vector<1x128xf32> to vector<8x128xf32>
    %62 = arith.addf %60, %61 : vector<8x128xf32>
    %cst_32 = arith.constant 0.000000e+00 : f32
    %63 = vector.broadcast %cst_32 : f32 to vector<8x128xf32>
    %64 = arith.maximumf %62, %63 : vector<8x128xf32>
    %c0_33 = arith.constant 0 : index
    %c0_34 = arith.constant 0 : index
    %65 = vector.load %arg11[%c0_33, %c0_34] : memref<128x128xf32, #tpu.memory_space<vmem>>, vector<128x128xf32>
    %cst_35 = arith.constant dense<0.000000e+00> : vector<8x128xf32>
    %66 = tpu.matmul %64, %65, %cst_35 {dimension_numbers = #tpu.dot_dimension_numbers<[1], [0], [0], [1], [0, 0, 1, 1], [], []>} : vector<8x128xf32>, vector<128x128xf32>, vector<8x128xf32> -> vector<8x128xf32>
    %c0_36 = arith.constant 0 : index
    %c0_37 = arith.constant 0 : index
    %67 = vector.load %arg12[%c0_36, %c0_37] : memref<1x128xf32, #tpu.memory_space<vmem>>, vector<1x128xf32>
    %68 = vector.broadcast %67 : vector<1x128xf32> to vector<8x128xf32>
    %69 = arith.addf %66, %68 : vector<8x128xf32>
    %c0_38 = arith.constant 0 : index
    %c0_39 = arith.constant 0 : index
    %70 = vector.load %arg3[%c0_38, %c0_39] : memref<8x2048xf32, #tpu.memory_space<vmem>>, vector<8x2048xf32>
    %71 = arith.truncf %70 : vector<8x2048xf32> to vector<8x2048xbf16>
    %c0_40 = arith.constant 0 : index
    %c0_41 = arith.constant 0 : index
    %72 = vector.load %arg13[%c0_40, %c0_41] : memref<2048x128xbf16, #tpu.memory_space<vmem>>, vector<2048x128xbf16>
    %cst_42 = arith.constant dense<0.000000e+00> : vector<8x128xf32>
    %73 = tpu.matmul %71, %72, %cst_42 {dimension_numbers = #tpu.dot_dimension_numbers<[1], [0], [0], [1], [0, 0, 1, 1], [], []>} : vector<8x2048xbf16>, vector<2048x128xbf16>, vector<8x128xf32> -> vector<8x128xf32>
    %c0_43 = arith.constant 0 : index
    %c0_44 = arith.constant 0 : index
    %74 = vector.load %arg14[%c0_43, %c0_44] : memref<1x128xf32, #tpu.memory_space<vmem>>, vector<1x128xf32>
    %75 = vector.broadcast %74 : vector<1x128xf32> to vector<8x128xf32>
    %76 = arith.addf %73, %75 : vector<8x128xf32>
    %c0_45 = arith.constant 0 : index
    %c0_46 = arith.constant 0 : index
    %77 = vector.load %arg4[%c0_45, %c0_46] : memref<8x2048xf32, #tpu.memory_space<vmem>>, vector<8x2048xf32>
    %78 = arith.truncf %77 : vector<8x2048xf32> to vector<8x2048xbf16>
    %c0_47 = arith.constant 0 : index
    %c0_48 = arith.constant 0 : index
    %79 = vector.load %arg15[%c0_47, %c0_48] : memref<2048x128xbf16, #tpu.memory_space<vmem>>, vector<2048x128xbf16>
    %cst_49 = arith.constant dense<0.000000e+00> : vector<8x128xf32>
    %80 = tpu.matmul %78, %79, %cst_49 {dimension_numbers = #tpu.dot_dimension_numbers<[1], [0], [0], [1], [0, 0, 1, 1], [], []>} : vector<8x2048xbf16>, vector<2048x128xbf16>, vector<8x128xf32> -> vector<8x128xf32>
    %c0_50 = arith.constant 0 : index
    %c0_51 = arith.constant 0 : index
    %81 = vector.load %arg16[%c0_50, %c0_51] : memref<1x128xf32, #tpu.memory_space<vmem>>, vector<1x128xf32>
    %82 = vector.broadcast %81 : vector<1x128xf32> to vector<8x128xf32>
    %83 = arith.addf %80, %82 : vector<8x128xf32>
    %c0_52 = arith.constant 0 : index
    %c0_53 = arith.constant 0 : index
    %84 = vector.load %arg37[%c0_52, %c0_53] : memref<8x256xf32, #tpu.memory_space<vmem>>, vector<8x128xf32>
    tpu.vector_store %arg37[%c0_52, %c0_53], %76 {strides = array<i32>} : memref<8x256xf32, #tpu.memory_space<vmem>>, vector<8x128xf32>,
    %c0_54 = arith.constant 0 : index
    %c128 = arith.constant 128 : index
    %85 = vector.load %arg37[%c0_54, %c128] : memref<8x256xf32, #tpu.memory_space<vmem>>, vector<8x128xf32>
    tpu.vector_store %arg37[%c0_54, %c128], %83 {strides = array<i32>} : memref<8x256xf32, #tpu.memory_space<vmem>>, vector<8x128xf32>,
    %c0_55 = arith.constant 0 : index
    %c0_56 = arith.constant 0 : index
    %86 = vector.load %arg38[%c0_55, %c0_56] : memref<8x256xf32, #tpu.memory_space<vmem>>, vector<8x128xf32>
    tpu.vector_store %arg38[%c0_55, %c0_56], %69 {strides = array<i32>} : memref<8x256xf32, #tpu.memory_space<vmem>>, vector<8x128xf32>,
    %c0_57 = arith.constant 0 : index
    %c128_58 = arith.constant 128 : index
    %87 = vector.load %arg38[%c0_57, %c128_58] : memref<8x256xf32, #tpu.memory_space<vmem>>, vector<8x128xf32>
    tpu.vector_store %arg38[%c0_57, %c128_58], %34 {strides = array<i32>} : memref<8x256xf32, #tpu.memory_space<vmem>>, vector<8x128xf32>,
    %c0_59 = arith.constant 0 : index
    %c0_60 = arith.constant 0 : index
    %88 = vector.load %arg37[%c0_59, %c0_60] : memref<8x256xf32, #tpu.memory_space<vmem>>, vector<8x256xf32>
    %c0_61 = arith.constant 0 : index
    %c0_62 = arith.constant 0 : index
    %89 = vector.load %arg17[%c0_61, %c0_62] : memref<256x256xf32, #tpu.memory_space<vmem>>, vector<256x256xf32>
    %cst_63 = arith.constant dense<0.000000e+00> : vector<8x256xf32>
    %90 = tpu.matmul %88, %89, %cst_63 {dimension_numbers = #tpu.dot_dimension_numbers<[1], [0], [0], [1], [0, 0, 1, 1], [], []>} : vector<8x256xf32>, vector<256x256xf32>, vector<8x256xf32> -> vector<8x256xf32>
    %c0_64 = arith.constant 0 : index
    %c0_65 = arith.constant 0 : index
    %91 = vector.load %arg18[%c0_64, %c0_65] : memref<1x256xf32, #tpu.memory_space<vmem>>, vector<1x256xf32>
    %92 = vector.broadcast %91 : vector<1x256xf32> to vector<8x256xf32>
    %93 = arith.addf %90, %92 : vector<8x256xf32>
    %c0_66 = arith.constant 0 : index
    %c0_67 = arith.constant 0 : index
    %94 = vector.load %arg21[%c0_66, %c0_67] : memref<1x256xf32, #tpu.memory_space<vmem>>, vector<1x256xf32>
    %95 = vector.broadcast %94 : vector<1x256xf32> to vector<8x256xf32>
    %96 = arith.subf %93, %95 : vector<8x256xf32>
    %c0_68 = arith.constant 0 : index
    %c0_69 = arith.constant 0 : index
    %97 = vector.load %arg22[%c0_68, %c0_69] : memref<1x256xf32, #tpu.memory_space<vmem>>, vector<1x256xf32>
    %cst_70 = arith.constant 9.99999974E-6 : f32
    %98 = vector.broadcast %cst_70 : f32 to vector<1x256xf32>
    %99 = arith.addf %97, %98 : vector<1x256xf32>
    %100 = math.rsqrt %99 : vector<1x256xf32>
    %101 = vector.broadcast %100 : vector<1x256xf32> to vector<8x256xf32>
    %102 = arith.mulf %96, %101 : vector<8x256xf32>
    %c0_71 = arith.constant 0 : index
    %c0_72 = arith.constant 0 : index
    %103 = vector.load %arg19[%c0_71, %c0_72] : memref<1x256xf32, #tpu.memory_space<vmem>>, vector<1x256xf32>
    %104 = vector.broadcast %103 : vector<1x256xf32> to vector<8x256xf32>
    %105 = arith.mulf %102, %104 : vector<8x256xf32>
    %c0_73 = arith.constant 0 : index
    %c0_74 = arith.constant 0 : index
    %106 = vector.load %arg20[%c0_73, %c0_74] : memref<1x256xf32, #tpu.memory_space<vmem>>, vector<1x256xf32>
    %107 = vector.broadcast %106 : vector<1x256xf32> to vector<8x256xf32>
    %108 = arith.addf %105, %107 : vector<8x256xf32>
    %cst_75 = arith.constant 0.000000e+00 : f32
    %109 = vector.broadcast %cst_75 : f32 to vector<8x256xf32>
    %110 = arith.maximumf %108, %109 : vector<8x256xf32>
    %c0_76 = arith.constant 0 : index
    %c0_77 = arith.constant 0 : index
    %111 = vector.load %arg23[%c0_76, %c0_77] : memref<256x128xf32, #tpu.memory_space<vmem>>, vector<256x128xf32>
    %cst_78 = arith.constant dense<0.000000e+00> : vector<8x128xf32>
    %112 = tpu.matmul %110, %111, %cst_78 {dimension_numbers = #tpu.dot_dimension_numbers<[1], [0], [0], [1], [0, 0, 1, 1], [], []>} : vector<8x256xf32>, vector<256x128xf32>, vector<8x128xf32> -> vector<8x128xf32>
    %c0_79 = arith.constant 0 : index
    %c0_80 = arith.constant 0 : index
    %113 = vector.load %arg24[%c0_79, %c0_80] : memref<1x128xf32, #tpu.memory_space<vmem>>, vector<1x128xf32>
    %114 = vector.broadcast %113 : vector<1x128xf32> to vector<8x128xf32>
    %115 = arith.addf %112, %114 : vector<8x128xf32>
    %c0_81 = arith.constant 0 : index
    %c0_82 = arith.constant 0 : index
    %116 = vector.load %arg38[%c0_81, %c0_82] : memref<8x256xf32, #tpu.memory_space<vmem>>, vector<8x256xf32>
    %c0_83 = arith.constant 0 : index
    %c0_84 = arith.constant 0 : index
    %117 = vector.load %arg25[%c0_83, %c0_84] : memref<1x256xf32, #tpu.memory_space<vmem>>, vector<1x256xf32>
    %c0_85 = arith.constant 0 : index
    %c0_86 = arith.constant 0 : index
    %118 = vector.load %arg26[%c0_85, %c0_86] : memref<1x256xf32, #tpu.memory_space<vmem>>, vector<1x256xf32>
    %cst_87 = arith.constant dense<0.000000e+00> : vector<8xf32>
    %119 = vector.multi_reduction <add>, %116, %cst_87 [1] : vector<8x256xf32> to vector<8xf32>
    %120 = vector.shape_cast %119 : vector<8xf32> to vector<8x1xf32>
    %cst_88 = arith.constant 2.560000e+02 : f32
    %121 = vector.broadcast %cst_88 : f32 to vector<8x1xf32>
    %122 = arith.divf %120, %121 : vector<8x1xf32>
    %123 = vector.broadcast %122 : vector<8x1xf32> to vector<8x256xf32>
    %124 = arith.subf %116, %123 : vector<8x256xf32>
    %125 = arith.mulf %124, %124 : vector<8x256xf32>
    %cst_89 = arith.constant dense<0.000000e+00> : vector<8xf32>
    %126 = vector.multi_reduction <add>, %125, %cst_89 [1] : vector<8x256xf32> to vector<8xf32>
    %127 = vector.shape_cast %126 : vector<8xf32> to vector<8x1xf32>
    %cst_90 = arith.constant 2.560000e+02 : f32
    %128 = vector.broadcast %cst_90 : f32 to vector<8x1xf32>
    %129 = arith.divf %127, %128 : vector<8x1xf32>
    %130 = vector.broadcast %122 : vector<8x1xf32> to vector<8x256xf32>
    %131 = arith.subf %116, %130 : vector<8x256xf32>
    %cst_91 = arith.constant 9.99999974E-6 : f32
    %132 = vector.broadcast %cst_91 : f32 to vector<8x1xf32>
    %133 = arith.addf %129, %132 : vector<8x1xf32>
    %134 = math.rsqrt %133 : vector<8x1xf32>
    %135 = vector.broadcast %134 : vector<8x1xf32> to vector<8x256xf32>
    %136 = arith.mulf %131, %135 : vector<8x256xf32>
    %137 = vector.broadcast %117 : vector<1x256xf32> to vector<8x256xf32>
    %138 = arith.mulf %136, %137 : vector<8x256xf32>
    %139 = vector.broadcast %118 : vector<1x256xf32> to vector<8x256xf32>
    %140 = arith.addf %138, %139 : vector<8x256xf32>
    %c0_92 = arith.constant 0 : index
    %c0_93 = arith.constant 0 : index
    %141 = vector.load %arg27[%c0_92, %c0_93] : memref<256x256xf32, #tpu.memory_space<vmem>>, vector<256x256xf32>
    %cst_94 = arith.constant dense<0.000000e+00> : vector<8x256xf32>
    %142 = tpu.matmul %140, %141, %cst_94 {dimension_numbers = #tpu.dot_dimension_numbers<[1], [0], [0], [1], [0, 0, 1, 1], [], []>} : vector<8x256xf32>, vector<256x256xf32>, vector<8x256xf32> -> vector<8x256xf32>
    %c0_95 = arith.constant 0 : index
    %c0_96 = arith.constant 0 : index
    %143 = vector.load %arg28[%c0_95, %c0_96] : memref<1x256xf32, #tpu.memory_space<vmem>>, vector<1x256xf32>
    %144 = vector.broadcast %143 : vector<1x256xf32> to vector<8x256xf32>
    %145 = arith.addf %142, %144 : vector<8x256xf32>
    %cst_97 = arith.constant 0.000000e+00 : f32
    %146 = vector.broadcast %cst_97 : f32 to vector<8x256xf32>
    %147 = arith.maximumf %145, %146 : vector<8x256xf32>
    %c0_98 = arith.constant 0 : index
    %c0_99 = arith.constant 0 : index
    %148 = vector.load %arg29[%c0_98, %c0_99] : memref<256x128xf32, #tpu.memory_space<vmem>>, vector<256x128xf32>
    %cst_100 = arith.constant dense<0.000000e+00> : vector<8x128xf32>
    %149 = tpu.matmul %147, %148, %cst_100 {dimension_numbers = #tpu.dot_dimension_numbers<[1], [0], [0], [1], [0, 0, 1, 1], [], []>} : vector<8x256xf32>, vector<256x128xf32>, vector<8x128xf32> -> vector<8x128xf32>
    %c0_101 = arith.constant 0 : index
    %c0_102 = arith.constant 0 : index
    %150 = vector.load %arg30[%c0_101, %c0_102] : memref<1x128xf32, #tpu.memory_space<vmem>>, vector<1x128xf32>
    %151 = vector.broadcast %150 : vector<1x128xf32> to vector<8x128xf32>
    %152 = arith.addf %149, %151 : vector<8x128xf32>
    %153 = arith.mulf %76, %76 : vector<8x128xf32>
    %cst_103 = arith.constant dense<0.000000e+00> : vector<8xf32>
    %154 = vector.multi_reduction <add>, %153, %cst_103 [1] : vector<8x128xf32> to vector<8xf32>
    %155 = vector.shape_cast %154 : vector<8xf32> to vector<8x1xf32>
    %cst_104 = arith.constant 1.000000e-24 : f32
    %156 = vector.broadcast %cst_104 : f32 to vector<8x1xf32>
    %157 = arith.maximumf %155, %156 : vector<8x1xf32>
    %158 = math.rsqrt %157 : vector<8x1xf32>
    %159 = vector.broadcast %158 : vector<8x1xf32> to vector<8x128xf32>
    %160 = arith.mulf %76, %159 : vector<8x128xf32>
    %c0_105 = arith.constant 0 : index
    %c0_106 = arith.constant 0 : index
    %161 = vector.load %arg31[%c0_105, %c0_106] : memref<8x128xf32, #tpu.memory_space<vmem>>, vector<8x128xf32>
    tpu.vector_store %arg31[%c0_105, %c0_106], %160 {strides = array<i32>} : memref<8x128xf32, #tpu.memory_space<vmem>>, vector<8x128xf32>,
    %162 = arith.mulf %69, %69 : vector<8x128xf32>
    %cst_107 = arith.constant dense<0.000000e+00> : vector<8xf32>
    %163 = vector.multi_reduction <add>, %162, %cst_107 [1] : vector<8x128xf32> to vector<8xf32>
    %164 = vector.shape_cast %163 : vector<8xf32> to vector<8x1xf32>
    %cst_108 = arith.constant 1.000000e-24 : f32
    %165 = vector.broadcast %cst_108 : f32 to vector<8x1xf32>
    %166 = arith.maximumf %164, %165 : vector<8x1xf32>
    %167 = math.rsqrt %166 : vector<8x1xf32>
    %168 = vector.broadcast %167 : vector<8x1xf32> to vector<8x128xf32>
    %169 = arith.mulf %69, %168 : vector<8x128xf32>
    %c0_109 = arith.constant 0 : index
    %c0_110 = arith.constant 0 : index
    %170 = vector.load %arg32[%c0_109, %c0_110] : memref<8x128xf32, #tpu.memory_space<vmem>>, vector<8x128xf32>
    tpu.vector_store %arg32[%c0_109, %c0_110], %169 {strides = array<i32>} : memref<8x128xf32, #tpu.memory_space<vmem>>, vector<8x128xf32>,
    %171 = arith.mulf %83, %83 : vector<8x128xf32>
    %cst_111 = arith.constant dense<0.000000e+00> : vector<8xf32>
    %172 = vector.multi_reduction <add>, %171, %cst_111 [1] : vector<8x128xf32> to vector<8xf32>
    %173 = vector.shape_cast %172 : vector<8xf32> to vector<8x1xf32>
    %cst_112 = arith.constant 1.000000e-24 : f32
    %174 = vector.broadcast %cst_112 : f32 to vector<8x1xf32>
    %175 = arith.maximumf %173, %174 : vector<8x1xf32>
    %176 = math.rsqrt %175 : vector<8x1xf32>
    %177 = vector.broadcast %176 : vector<8x1xf32> to vector<8x128xf32>
    %178 = arith.mulf %83, %177 : vector<8x128xf32>
    %c0_113 = arith.constant 0 : index
    %c0_114 = arith.constant 0 : index
    %179 = vector.load %arg33[%c0_113, %c0_114] : memref<8x128xf32, #tpu.memory_space<vmem>>, vector<8x128xf32>
    tpu.vector_store %arg33[%c0_113, %c0_114], %178 {strides = array<i32>} : memref<8x128xf32, #tpu.memory_space<vmem>>, vector<8x128xf32>,
    %180 = arith.mulf %34, %34 : vector<8x128xf32>
    %cst_115 = arith.constant dense<0.000000e+00> : vector<8xf32>
    %181 = vector.multi_reduction <add>, %180, %cst_115 [1] : vector<8x128xf32> to vector<8xf32>
    %182 = vector.shape_cast %181 : vector<8xf32> to vector<8x1xf32>
    %cst_116 = arith.constant 1.000000e-24 : f32
    %183 = vector.broadcast %cst_116 : f32 to vector<8x1xf32>
    %184 = arith.maximumf %182, %183 : vector<8x1xf32>
    %185 = math.rsqrt %184 : vector<8x1xf32>
    %186 = vector.broadcast %185 : vector<8x1xf32> to vector<8x128xf32>
    %187 = arith.mulf %34, %186 : vector<8x128xf32>
    %c0_117 = arith.constant 0 : index
    %c0_118 = arith.constant 0 : index
    %188 = vector.load %arg34[%c0_117, %c0_118] : memref<8x128xf32, #tpu.memory_space<vmem>>, vector<8x128xf32>
    tpu.vector_store %arg34[%c0_117, %c0_118], %187 {strides = array<i32>} : memref<8x128xf32, #tpu.memory_space<vmem>>, vector<8x128xf32>,
    %189 = arith.mulf %115, %115 : vector<8x128xf32>
    %cst_119 = arith.constant dense<0.000000e+00> : vector<8xf32>
    %190 = vector.multi_reduction <add>, %189, %cst_119 [1] : vector<8x128xf32> to vector<8xf32>
    %191 = vector.shape_cast %190 : vector<8xf32> to vector<8x1xf32>
    %cst_120 = arith.constant 1.000000e-24 : f32
    %192 = vector.broadcast %cst_120 : f32 to vector<8x1xf32>
    %193 = arith.maximumf %191, %192 : vector<8x1xf32>
    %194 = math.rsqrt %193 : vector<8x1xf32>
    %195 = vector.broadcast %194 : vector<8x1xf32> to vector<8x128xf32>
    %196 = arith.mulf %115, %195 : vector<8x128xf32>
    %c0_121 = arith.constant 0 : index
    %c0_122 = arith.constant 0 : index
    %197 = vector.load %arg35[%c0_121, %c0_122] : memref<8x128xf32, #tpu.memory_space<vmem>>, vector<8x128xf32>
    tpu.vector_store %arg35[%c0_121, %c0_122], %196 {strides = array<i32>} : memref<8x128xf32, #tpu.memory_space<vmem>>, vector<8x128xf32>,
    %198 = arith.mulf %152, %152 : vector<8x128xf32>
    %cst_123 = arith.constant dense<0.000000e+00> : vector<8xf32>
    %199 = vector.multi_reduction <add>, %198, %cst_123 [1] : vector<8x128xf32> to vector<8xf32>
    %200 = vector.shape_cast %199 : vector<8xf32> to vector<8x1xf32>
    %cst_124 = arith.constant 1.000000e-24 : f32
    %201 = vector.broadcast %cst_124 : f32 to vector<8x1xf32>
    %202 = arith.maximumf %200, %201 : vector<8x1xf32>
    %203 = math.rsqrt %202 : vector<8x1xf32>
    %204 = vector.broadcast %203 : vector<8x1xf32> to vector<8x128xf32>
    %205 = arith.mulf %152, %204 : vector<8x128xf32>
    %c0_125 = arith.constant 0 : index
    %c0_126 = arith.constant 0 : index
    %206 = vector.load %arg36[%c0_125, %c0_126] : memref<8x128xf32, #tpu.memory_space<vmem>>, vector<8x128xf32>
    tpu.vector_store %arg36[%c0_125, %c0_126], %205 {strides = array<i32>} : memref<8x128xf32, #tpu.memory_space<vmem>>, vector<8x128xf32>,
    return
  }
  func.func @transform_0(%arg0: i32) -> (i32, i32, i32) {
    %c0_i32 = arith.constant 0 : i32
    %c0_i32_0 = arith.constant 0 : i32
    %c0_i32_1 = arith.constant 0 : i32
    %c0_i32_2 = arith.constant 0 : i32
    return %c0_i32, %c0_i32_0, %c0_i32_1 : i32, i32, i32
  }
  func.func @transform_1(%arg0: i32) -> (i32, i32, i32) {
    %c0_i32 = arith.constant 0 : i32
    %c0_i32_0 = arith.constant 0 : i32
    %c0_i32_1 = arith.constant 0 : i32
    %c0_i32_2 = arith.constant 0 : i32
    return %c0_i32, %c0_i32_0, %c0_i32_1 : i32, i32, i32
  }
  func.func @transform_2(%arg0: i32) -> (i32, i32) {
    %c0_i32 = arith.constant 0 : i32
    %c0_i32_0 = arith.constant 0 : i32
    %c0_i32_1 = arith.constant 0 : i32
    return %c0_i32, %c0_i32_0 : i32, i32
  }
  func.func @transform_3(%arg0: i32) -> (i32, i32) {
    %c0_i32 = arith.constant 0 : i32
    %c0_i32_0 = arith.constant 0 : i32
    %c0_i32_1 = arith.constant 0 : i32
    return %c0_i32, %c0_i32_0 : i32, i32
  }
  func.func @transform_4(%arg0: i32) -> (i32, i32) {
    %c0_i32 = arith.constant 0 : i32
    %c0_i32_0 = arith.constant 0 : i32
    %c0_i32_1 = arith.constant 0 : i32
    return %c0_i32, %c0_i32_0 : i32, i32
  }
  func.func @transform_5(%arg0: i32) -> (i32, i32) {
    %c0_i32 = arith.constant 0 : i32
    %c0_i32_0 = arith.constant 0 : i32
    %c0_i32_1 = arith.constant 0 : i32
    return %c0_i32, %c0_i32_0 : i32, i32
  }
  func.func @transform_6(%arg0: i32) -> (i32, i32) {
    %c0_i32 = arith.constant 0 : i32
    %c0_i32_0 = arith.constant 0 : i32
    %c0_i32_1 = arith.constant 0 : i32
    return %c0_i32, %c0_i32_0 : i32, i32
  }
  func.func @transform_7(%arg0: i32) -> (i32, i32) {
    %c0_i32 = arith.constant 0 : i32
    %c0_i32_0 = arith.constant 0 : i32
    %c0_i32_1 = arith.constant 0 : i32
    return %c0_i32, %c0_i32_0 : i32, i32
  }
  func.func @transform_8(%arg0: i32) -> (i32, i32) {
    %c0_i32 = arith.constant 0 : i32
    %c0_i32_0 = arith.constant 0 : i32
    %c0_i32_1 = arith.constant 0 : i32
    return %c0_i32, %c0_i32_0 : i32, i32
  }
  func.func @transform_9(%arg0: i32) -> (i32, i32) {
    %c0_i32 = arith.constant 0 : i32
    %c0_i32_0 = arith.constant 0 : i32
    %c0_i32_1 = arith.constant 0 : i32
    return %c0_i32, %c0_i32_0 : i32, i32
  }
  func.func @transform_10(%arg0: i32) -> (i32, i32) {
    %c0_i32 = arith.constant 0 : i32
    %c0_i32_0 = arith.constant 0 : i32
    %c0_i32_1 = arith.constant 0 : i32
    return %c0_i32, %c0_i32_0 : i32, i32
  }
  func.func @transform_11(%arg0: i32) -> (i32, i32) {
    %c0_i32 = arith.constant 0 : i32
    %c0_i32_0 = arith.constant 0 : i32
    %c0_i32_1 = arith.constant 0 : i32
    return %c0_i32, %c0_i32_0 : i32, i32
  }
  func.func @transform_12(%arg0: i32) -> (i32, i32) {
    %c0_i32 = arith.constant 0 : i32
    %c0_i32_0 = arith.constant 0 : i32
    %c0_i32_1 = arith.constant 0 : i32
    return %c0_i32, %c0_i32_0 : i32, i32
  }
  func.func @transform_13(%arg0: i32) -> (i32, i32) {
    %c0_i32 = arith.constant 0 : i32
    %c0_i32_0 = arith.constant 0 : i32
    %c0_i32_1 = arith.constant 0 : i32
    return %c0_i32, %c0_i32_0 : i32, i32
  }
  func.func @transform_14(%arg0: i32) -> (i32, i32) {
    %c0_i32 = arith.constant 0 : i32
    %c0_i32_0 = arith.constant 0 : i32
    %c0_i32_1 = arith.constant 0 : i32
    return %c0_i32, %c0_i32_0 : i32, i32
  }
  func.func @transform_15(%arg0: i32) -> (i32, i32) {
    %c0_i32 = arith.constant 0 : i32
    %c0_i32_0 = arith.constant 0 : i32
    %c0_i32_1 = arith.constant 0 : i32
    return %c0_i32, %c0_i32_0 : i32, i32
  }
  func.func @transform_16(%arg0: i32) -> (i32, i32) {
    %c0_i32 = arith.constant 0 : i32
    %c0_i32_0 = arith.constant 0 : i32
    %c0_i32_1 = arith.constant 0 : i32
    return %c0_i32, %c0_i32_0 : i32, i32
  }
  func.func @transform_17(%arg0: i32) -> (i32, i32) {
    %c0_i32 = arith.constant 0 : i32
    %c0_i32_0 = arith.constant 0 : i32
    %c0_i32_1 = arith.constant 0 : i32
    return %c0_i32, %c0_i32_0 : i32, i32
  }
  func.func @transform_18(%arg0: i32) -> (i32, i32) {
    %c0_i32 = arith.constant 0 : i32
    %c0_i32_0 = arith.constant 0 : i32
    %c0_i32_1 = arith.constant 0 : i32
    return %c0_i32, %c0_i32_0 : i32, i32
  }
  func.func @transform_19(%arg0: i32) -> (i32, i32) {
    %c0_i32 = arith.constant 0 : i32
    %c0_i32_0 = arith.constant 0 : i32
    %c0_i32_1 = arith.constant 0 : i32
    return %c0_i32, %c0_i32_0 : i32, i32
  }
  func.func @transform_20(%arg0: i32) -> (i32, i32) {
    %c0_i32 = arith.constant 0 : i32
    %c0_i32_0 = arith.constant 0 : i32
    %c0_i32_1 = arith.constant 0 : i32
    return %c0_i32, %c0_i32_0 : i32, i32
  }
  func.func @transform_21(%arg0: i32) -> (i32, i32) {
    %c0_i32 = arith.constant 0 : i32
    %c0_i32_0 = arith.constant 0 : i32
    %c0_i32_1 = arith.constant 0 : i32
    return %c0_i32, %c0_i32_0 : i32, i32
  }
  func.func @transform_22(%arg0: i32) -> (i32, i32) {
    %c0_i32 = arith.constant 0 : i32
    %c0_i32_0 = arith.constant 0 : i32
    %c0_i32_1 = arith.constant 0 : i32
    return %c0_i32, %c0_i32_0 : i32, i32
  }
  func.func @transform_23(%arg0: i32) -> (i32, i32) {
    %c0_i32 = arith.constant 0 : i32
    %c0_i32_0 = arith.constant 0 : i32
    %c0_i32_1 = arith.constant 0 : i32
    return %c0_i32, %c0_i32_0 : i32, i32
  }
  func.func @transform_24(%arg0: i32) -> (i32, i32) {
    %c0_i32 = arith.constant 0 : i32
    %c0_i32_0 = arith.constant 0 : i32
    %c0_i32_1 = arith.constant 0 : i32
    return %c0_i32, %c0_i32_0 : i32, i32
  }
  func.func @transform_25(%arg0: i32) -> (i32, i32) {
    %c0_i32 = arith.constant 0 : i32
    %c0_i32_0 = arith.constant 0 : i32
    %c0_i32_1 = arith.constant 0 : i32
    return %c0_i32, %c0_i32_0 : i32, i32
  }
  func.func @transform_26(%arg0: i32) -> (i32, i32) {
    %c0_i32 = arith.constant 0 : i32
    %c0_i32_0 = arith.constant 0 : i32
    %c0_i32_1 = arith.constant 0 : i32
    return %c0_i32, %c0_i32_0 : i32, i32
  }
  func.func @transform_27(%arg0: i32) -> (i32, i32) {
    %c0_i32 = arith.constant 0 : i32
    %c0_i32_0 = arith.constant 0 : i32
    %c0_i32_1 = arith.constant 0 : i32
    return %c0_i32, %c0_i32_0 : i32, i32
  }
  func.func @transform_28(%arg0: i32) -> (i32, i32) {
    %c0_i32 = arith.constant 0 : i32
    %c0_i32_0 = arith.constant 0 : i32
    %c0_i32_1 = arith.constant 0 : i32
    return %c0_i32, %c0_i32_0 : i32, i32
  }
  func.func @transform_29(%arg0: i32) -> (i32, i32) {
    %c0_i32 = arith.constant 0 : i32
    %c0_i32_0 = arith.constant 0 : i32
    %c0_i32_1 = arith.constant 0 : i32
    return %c0_i32, %c0_i32_0 : i32, i32
  }
  func.func @transform_30(%arg0: i32) -> (i32, i32) {
    %c0_i32 = arith.constant 0 : i32
    %c0_i32_0 = arith.constant 0 : i32
    %c0_i32_1 = arith.constant 0 : i32
    return %c0_i32, %c0_i32_0 : i32, i32
  }
  func.func @transform_31(%arg0: i32) -> (i32, i32) {
    %c0_i32 = arith.constant 0 : i32
    %c0_i32_0 = arith.constant 0 : i32
    %c0_i32_1 = arith.constant 0 : i32
    return %c0_i32, %c0_i32_0 : i32, i32
  }
  func.func @transform_32(%arg0: i32) -> (i32, i32) {
    %c0_i32 = arith.constant 0 : i32
    %c0_i32_0 = arith.constant 0 : i32
    %c0_i32_1 = arith.constant 0 : i32
    return %c0_i32, %c0_i32_0 : i32, i32
  }
  func.func @transform_33(%arg0: i32) -> (i32, i32) {
    %c0_i32 = arith.constant 0 : i32
    %c0_i32_0 = arith.constant 0 : i32
    %c0_i32_1 = arith.constant 0 : i32
    return %c0_i32, %c0_i32_0 : i32, i32
  }
  func.func @transform_34(%arg0: i32) -> (i32, i32) {
    %c0_i32 = arith.constant 0 : i32
    %c0_i32_0 = arith.constant 0 : i32
    %c0_i32_1 = arith.constant 0 : i32
    return %c0_i32, %c0_i32_0 : i32, i32
  }
  func.func @transform_35(%arg0: i32) -> (i32, i32) {
    %c0_i32 = arith.constant 0 : i32
    %c0_i32_0 = arith.constant 0 : i32
    %c0_i32_1 = arith.constant 0 : i32
    return %c0_i32, %c0_i32_0 : i32, i32
  }
}

</mosaic_0001>

<bundles_post_ra>
// kernel: tpu_custom_call.1
= control target key start
LH: loop header
LB: loop body
LE: loop exit
PB: predicated region body
PF: predicated region fallthrough
CT: control target
= control target key end

     0   :  { %s6189_s6 = smov 1   ;;  %s6190_s10 = smov 2   ;;  %s6806_s0 = inlined_call_operand.smem [shape: u32[36], index: -1, kind: input, shape index: {}] }
   0x1   :  { %s6263_s5 = sld [smem:[%s6806_s0]]   ;;  %s6191_s14 = smov 3  }
   0x2   :  { %s6268_s9 = sld [smem:[%s6806_s0 + %s6189_s6]]   ;;  %s6192_s18 = smov 4  }
   0x3   :  { %s6273_s13 = sld [smem:[%s6806_s0 + %s6190_s10]]   ;;  %s6193_s22 = smov 5  }
   0x4   :  { %s6278_s17 = sld [smem:[%s6806_s0 + %s6191_s14]]   ;;  %s6194_s26 = smov 6  }
   0x5   :  { %s6283_s21 = sld [smem:[%s6806_s0 + %s6192_s18]]   ;;  %s6195_s30 = smov 7  }
   0x6   :  { %s6288_s25 = sld [smem:[%s6806_s0 + %s6193_s22]]   ;;  %s6196_s4 = smov 8  }
   0x7   :  { %s6293_s29 = sld [smem:[%s6806_s0 + %s6194_s26]]   ;;  %s6197_s10 = smov 9  }
   0x8   :  { %s6298_s3 = sld [smem:[%s6806_s0 + %s6195_s30]]   ;;  %s6198_s15 = smov 10  }
   0x9   :  { %s6303_s8 = sld [smem:[%s6806_s0 + %s6196_s4]]   ;;  %s6199_s20 = smov 11  }
   0xa   :  { %s6308_s14 = sld [smem:[%s6806_s0 + %s6197_s10]]   ;;  %s6200_s26 = smov 12  }
   0xb   :  { %s6313_s19 = sld [smem:[%s6806_s0 + %s6198_s15]]   ;;  %s6201_s1 = smov 13  }
   0xc   :  { %s6318_s24 = sld [smem:[%s6806_s0 + %s6199_s20]]   ;;  %s6202_s7 = smov 14  }
   0xd   :  { %s6323_s30 = sld [smem:[%s6806_s0 + %s6200_s26]]   ;;  %s6203_s15 = smov 15  }
   0xe   :  { %s6328_s6 = sld [smem:[%s6806_s0 + %s6201_s1]]   ;;  %s6204_s22 = smov 16  }
   0xf   :  { %s6333_s12 = sld [smem:[%s6806_s0 + %s6202_s7]]   ;;  %s6205_s28 = smov 17  }
  0x10   :  { %s6338_s20 = sld [smem:[%s6806_s0 + %s6203_s15]]   ;;  %s6206_s7 = smov 18  }
  0x11   :  { %s6343_s27 = sld [smem:[%s6806_s0 + %s6204_s22]]   ;;  %s6207_s15 = smov 19  }
  0x12   :  { %6807 = sst [smem:[#allocation53_spill]] %s6318_s24  ;;  %s6208_s22 = smov 20  }
  0x13   :  { %s6348_s4 = sld [smem:[%s6806_s0 + %s6205_s28]]   ;;  %s6209_s28 = smov 21  }
  0x14   :  { %6808 = sst [smem:[#allocation54_spill]] %s6328_s6 }
  0x15   :  { %6809 = sst [smem:[#allocation55_spill]] %s6333_s12 }
  0x16   :  { %6810 = sst [smem:[#allocation56_spill]] %s6338_s20 }
  0x17   :  { %s6353_s6 = sld [smem:[%s6806_s0 + %s6206_s7]]   ;;  %s6210_s7 = smov 22  }
  0x18   :  { %s6358_s20 = sld [smem:[%s6806_s0 + %s6207_s15]]   ;;  %s6211_s15 = smov 23  }
  0x19   :  { %6811 = sst [smem:[#allocation57_spill]] %s6348_s4 }
  0x1a   :  { %s6363_s24 = sld [smem:[%s6806_s0 + %s6208_s22]]   ;;  %s6212_s22 = smov 24  }
  0x1b   :  { %s6368_s4 = sld [smem:[%s6806_s0 + %s6209_s28]]   ;;  %s6213_s28 = smov 25  }
  0x1d   :  { %6812 = sst [smem:[#allocation58_spill]] %s6353_s6 }
  0x1e   :  { %6813 = sst [smem:[#allocation59_spill]] %s6358_s20 }
  0x1f   :  { %s6373_s6 = sld [smem:[%s6806_s0 + %s6210_s7]]   ;;  %s6214_s7 = smov 26  }
  0x20   :  { %6814 = sst [smem:[#allocation60_spill]] %s6363_s24 }
  0x21   :  { %6815 = sst [smem:[#allocation61_spill]] %s6368_s4 }
  0x22   :  { %s6378_s20 = sld [smem:[%s6806_s0 + %s6211_s15]]   ;;  %s6215_s15 = smov 27  }
  0x23   :  { %s6383_s24 = sld [smem:[%s6806_s0 + %s6212_s22]]   ;;  %s6216_s22 = smov 28  }
  0x24   :  { %s6388_s4 = sld [smem:[%s6806_s0 + %s6213_s28]]   ;;  %s6217_s28 = smov 29  }
  0x25   :  { %6816 = sst [smem:[#allocation62_spill]] %s6373_s6 }
  0x26   :  { %s6393_s6 = sld [smem:[%s6806_s0 + %s6214_s7]]   ;;  %s6218_s7 = smov 30  }
  0x27   :  { %s6413_s12 = sld [smem:[%s6806_s0 + %s6218_s7]]   ;;  %s6222_s7 = smov 34  }
  0x28   :  { %6817 = sst [smem:[#allocation63_spill]] %s6378_s20 }
  0x29   :  { %6818 = sst [smem:[#allocation64_spill]] %s6383_s24 }
  0x2a   :  { %6819 = sst [smem:[#allocation65_spill]] %s6388_s4 }
  0x2b   :  { %s6398_s20 = sld [smem:[%s6806_s0 + %s6215_s15]]   ;;  %s6219_s15 = smov 31  }
  0x2c   :  { %s6403_s24 = sld [smem:[%s6806_s0 + %s6216_s22]]   ;;  %s6220_s22 = smov 32  }
  0x2d   :  { %s6408_s4 = sld [smem:[%s6806_s0 + %s6217_s28]]   ;;  %s6221_s28 = smov 33  }
  0x2e   :  { %6823 = sst [smem:[#allocation69_spill]] %s6413_s12 }
  0x2f   :  { %s6433_s12 = sld [smem:[%s6806_s0 + %s6222_s7]]  }
  0x31   :  { %6820 = sst [smem:[#allocation66_spill]] %s6398_s20 }
  0x32   :  { %6821 = sst [smem:[#allocation67_spill]] %s6403_s24 }
  0x33   :  { %6822 = sst [smem:[#allocation68_spill]] %s6408_s4 }
  0x34   :  { %s6418_s20 = sld [smem:[%s6806_s0 + %s6219_s15]]   ;;  %s6223_s15 = smov 35  }
  0x35   :  { %s6423_s24 = sld [smem:[%s6806_s0 + %s6220_s22]]  }
  0x36   :  { %s6428_s4 = sld [smem:[%s6806_s0 + %s6221_s28]]  }
  0x3a   :  { %6824 = sst [smem:[#allocation70_spill]] %s6418_s20 }
  0x3b   :  { %s6438_s20 = sld [smem:[%s6806_s0 + %s6223_s15]]  }
  0x3c   :  { %77 = vsyncpa [#allocation5], 0 }
  0x3d   :  { %78 = vsyncpa [#allocation8], 0 }
  0x3e   :  { %79 = vsyncpa [#allocation11], 0 }
  0x3f   :  { %80 = vsyncpa [#allocation14], 0 }
  0x40   :  { %81 = vsyncpa [#allocation17], 0 }
  0x41   :  { %82 = vsyncpa [#allocation20], 0 }
  0x42   :  { %83 = vsyncpa [#allocation23], 0 }
  0x43   :  { %84 = vsyncpa [#allocation26], 0 }
  0x44   :  { %85 = vsyncpa [#allocation29], 0 }
  0x45   :  { %86 = vsyncpa [#allocation6], 0 }
  0x46   :  { %87 = vsyncpa [#allocation33], 0 }
  0x47   :  { %88 = vsyncpa [#allocation36], 0 }
  0x48   :  { %89 = vsyncpa [#allocation39], 0  ;;  %s6224_s22 = smov [#allocation7]   ;;  %s6225_s26 = smov [#allocation10]  }
  0x49   :  { %s107_s23 = sshll.u32 %s6224_s22, 4  ;;  %s130_s28 = sshll.u32 %s6225_s26, 4  ;;  %s108_s23 = int_to_ptr.vmem [resolvable:$true] %s107_s23  ;;  %s131_s28 = int_to_ptr.vmem [resolvable:$true] %s130_s28 }
  0x4a   :  { %s5711_s0 = scalar_lea.vmem %s108_s23, 1024  ;;  %p5716_p1 = scmp.lt.s32.totalorder %s108_s23, %s108_s23 }
  0x4b   :  { %p5712_p0 = scmp.ne.s32.totalorder %s108_s23, %s5711_s0  ;;  %p5717_p2 = scmp.lt.s32.totalorder %s5711_s0, %s5711_s0 }
  0x4d   :  { %p5718_p3 = por %p5717_p2, %p5716_p1 }
  0x4f   :  { %p5719_p4 = pnand %p5718_p3, %p5712_p0 }
  0x51   :  { %5722 = shalt.err (!%p5719_p4)
}
  0x52   :  { %s6226_s1 = smov 128   ;;  %s6227_s2 = smov 8  }
  0x53   :  { %113 = dma.hbm_to_vmem [thread:$0]  %s6268_s9, 1024, %s108_s23, [#allocation8], %s6226_s1, %s6226_s1, %s6227_s2  }
  0x54   :  { %s5731_s7 = scalar_lea.vmem %s131_s28, 2048  ;;  %p5736_p6 = scmp.lt.s32.totalorder %s131_s28, %s131_s28 }
  0x55   :  { %p5732_p5 = scmp.ne.s32.totalorder %s131_s28, %s5731_s7  ;;  %p5737_p7 = scmp.lt.s32.totalorder %s5731_s7, %s5731_s7 }
  0x57   :  { %p5738_p8 = por %p5737_p7, %p5736_p6 }
  0x59   :  { %p5739_p9 = pnand %p5738_p8, %p5732_p5 }
  0x5b   :  { %5742 = shalt.err (!%p5739_p9)
}
  0x5c   :  { %133 = dma.hbm_to_vmem [thread:$0]  %s6278_s17, 2048, %s131_s28, [#allocation11]  }
  0x5d   :  { %s6228_s10 = smov [#allocation13]   ;;  %s6229_s15 = smov [#allocation16]  }
  0x5e   :  { %s150_s11 = sshll.u32 %s6228_s10, 4  ;;  %s172_s16 = sshll.u32 %s6229_s15, 4  ;;  %s151_s11 = int_to_ptr.vmem [resolvable:$true] %s150_s11  ;;  %s173_s16 = int_to_ptr.vmem [resolvable:$true] %s172_s16 }
  0x5f   :  { %s5751_s18 = scalar_lea.vmem %s151_s11, 16  ;;  %s5755_s22 = scalar_lea.vmem %s151_s11, 32 }
  0x60   :  { %p5752_p10 = scmp.ne.s32.totalorder %s151_s11, %s5751_s18  ;;  %p5756_p11 = scmp.lt.s32.totalorder %s151_s11, %s151_s11 }
  0x61   :  { %p5757_p12 = scmp.lt.s32.totalorder %s5755_s22, %s5751_s18 }
  0x63   :  { %p5758_p13 = por %p5757_p12, %p5756_p11 }
  0x65   :  { %p5759_p0 = pnand %p5758_p13, %p5752_p10 }
  0x67   :  { %5762 = shalt.err (!%p5759_p0)
}
  0x68   :  { %153 = dma.hbm_to_vmem [thread:$0]  %s6288_s25, 16, %s151_s11, [#allocation14]  }
  0x69   :  { %s5771_s9 = scalar_lea.vmem %s173_s16, 16  ;;  %s5775_s23 = scalar_lea.vmem %s173_s16, 32 }
  0x6a   :  { %p5772_p1 = scmp.ne.s32.totalorder %s173_s16, %s5771_s9  ;;  %p5776_p2 = scmp.lt.s32.totalorder %s173_s16, %s173_s16 }
  0x6b   :  { %p5777_p3 = scmp.lt.s32.totalorder %s5775_s23, %s5771_s9 }
  0x6d   :  { %p5778_p4 = por %p5777_p3, %p5776_p2 }
  0x6f   :  { %p5779_p5 = pnand %p5778_p4, %p5772_p1 }
  0x71   :  { %5782 = shalt.err (!%p5779_p5)
}
  0x72   :  { %175 = dma.hbm_to_vmem [thread:$0]  %s6298_s3, 16, %s173_s16, [#allocation17]  }
  0x73   :  { %s6230_s17 = smov [#allocation19]   ;;  %s6231_s28 = smov [#allocation22]  }
  0x74   :  { %s192_s26 = sshll.u32 %s6230_s17, 4  ;;  %s215_s0 = sshll.u32 %s6231_s28, 4  ;;  %s193_s26 = int_to_ptr.vmem [resolvable:$true] %s192_s26  ;;  %s216_s0 = int_to_ptr.vmem [resolvable:$true] %s215_s0 }
  0x75   :  { %s5791_s7 = scalar_lea.vmem %s193_s26, 16  ;;  %s5795_s10 = scalar_lea.vmem %s193_s26, 32 }
  0x76   :  { %p5792_p6 = scmp.ne.s32.totalorder %s193_s26, %s5791_s7  ;;  %p5796_p7 = scmp.lt.s32.totalorder %s193_s26, %s193_s26 }
  0x77   :  { %p5797_p8 = scmp.lt.s32.totalorder %s5795_s10, %s5791_s7 }
  0x79   :  { %p5798_p9 = por %p5797_p8, %p5796_p7 }
  0x7b   :  { %p5799_p10 = pnand %p5798_p9, %p5792_p6 }
  0x7d   :  { %5802 = shalt.err (!%p5799_p10)
}
  0x7e   :  { %195 = dma.hbm_to_vmem [thread:$0]  %s6308_s14, 16, %s193_s26, [#allocation20]  }
  0x7f   :  { %s5811_s25 = scalar_lea.vmem %s216_s0, 16384  ;;  %p5816_p12 = scmp.lt.s32.totalorder %s216_s0, %s216_s0 }
  0x80   :  { %p5812_p11 = scmp.ne.s32.totalorder %s216_s0, %s5811_s25  ;;  %p5817_p13 = scmp.lt.s32.totalorder %s5811_s25, %s5811_s25 }
  0x82   :  { %p5818_p0 = por %p5817_p13, %p5816_p12 }
  0x84   :  { %p5819_p1 = pnand %p5818_p0, %p5812_p11 }
  0x86   :  { %5822 = shalt.err (!%p5819_p1)
}
  0x87   :  { %s6232_s3 = smov 64   ;;  %s6233_s11 = smov 4  }
  0x88   :  { %221 = dma.hbm_to_vmem [thread:$0]  %s6323_s30, 16384, %s216_s0, [#allocation23], %s6232_s3, %s6232_s3, %s6233_s11  }
  0x89   :  { %s6234_s15 = smov [#allocation25]  }
  0x8a   :  { %s243_s16 = sshll.u32 %s6234_s15, 4  ;;  %s244_s16 = int_to_ptr.vmem [resolvable:$true] %s243_s16 }
  0x8b   :  { %s5831_s18 = scalar_lea.vmem %s244_s16, 8192  ;;  %p5836_p3 = scmp.lt.s32.totalorder %s244_s16, %s244_s16 }
  0x8c   :  { %p5832_p2 = scmp.ne.s32.totalorder %s244_s16, %s5831_s18  ;;  %p5837_p4 = scmp.lt.s32.totalorder %s5831_s18, %s5831_s18 }
  0x8e   :  { %p5838_p5 = por %p5837_p4, %p5836_p3 }
  0x90   :  { %p5839_p6 = pnand %p5838_p5, %p5832_p2 }
  0x92   :  { %5842 = shalt.err (!%p5839_p6)
}
  0x93   :  { %s6235_s14 = smov 256   ;;  %s6236_s22 = smov 16  }
  0x94   :  { %249 = dma.hbm_to_vmem [thread:$0]  %s6343_s27, 8192, %s244_s16, [#allocation26], %s6235_s14, %s6235_s14, %s6236_s22  }
  0x95   :  { %s6237_s9 = smov [#allocation28]   ;;  %s6238_s17 = smov [#allocation4]  }
  0x96   :  { %s283_s23 = sshll.u32 %s6237_s9, 4  ;;  %s95_s26 = sshll.u32 %s6238_s17, 4  ;;  %s284_s23 = int_to_ptr.vmem [resolvable:$true] %s283_s23  ;;  %s96_s26 = int_to_ptr.vmem [resolvable:$true] %s95_s26 }
  0x97   :  { %s5851_s30 = scalar_lea.vmem %s284_s23, 8192  ;;  %p5856_p8 = scmp.lt.s32.totalorder %s284_s23, %s284_s23 }
  0x98   :  { %p5852_p7 = scmp.ne.s32.totalorder %s284_s23, %s5851_s30  ;;  %p5857_p9 = scmp.lt.s32.totalorder %s5851_s30, %s5851_s30 }
  0x9a   :  { %p5858_p10 = por %p5857_p9, %p5856_p8 }
  0x9c   :  { %p5859_p11 = pnand %p5858_p10, %p5852_p7 }
  0x9e   :  { %5862 = shalt.err (!%p5859_p11)
}
  0x9f   :  { %289 = dma.hbm_to_vmem [thread:$0]  %s6393_s6, 8192, %s284_s23, [#allocation29], %s6235_s14, %s6235_s14, %s6236_s22  }
  0xa0   :  { %s5871_s28 = scalar_lea.vmem %s96_s26, 1024  ;;  %p5876_p13 = scmp.lt.s32.totalorder %s96_s26, %s96_s26 }
  0xa1   :  { %p5872_p12 = scmp.ne.s32.totalorder %s96_s26, %s5871_s28  ;;  %p5877_p0 = scmp.lt.s32.totalorder %s5871_s28, %s5871_s28 }
  0xa3   :  { %p5878_p1 = por %p5877_p0, %p5876_p13 }
  0xa5   :  { %p5879_p2 = pnand %p5878_p1, %p5872_p12 }
  0xa7   :  { %5882 = shalt.err (!%p5879_p2)
}
  0xa8   :  { %101 = dma.hbm_to_vmem [thread:$0]  %s6263_s5, 1024, %s96_s26, [#allocation5], %s6226_s1, %s6226_s1, %s6227_s2  }
  0xa9   :  { %s6239_s27 = smov [#allocation9]   ;;  %s6240_s7 = smov [#allocation12]  }
  0xaa   :  { %s120_s0 = sshll.u32 %s6239_s27, 4  ;;  %s140_s10 = sshll.u32 %s6240_s7, 4  ;;  %s121_s0 = int_to_ptr.vmem [resolvable:$true] %s120_s0  ;;  %s141_s10 = int_to_ptr.vmem [resolvable:$true] %s140_s10 }
  0xab   :  { %s5891_s25 = scalar_lea.vmem %s121_s0, 2048  ;;  %p5896_p4 = scmp.lt.s32.totalorder %s121_s0, %s121_s0 }
  0xac   :  { %p5892_p3 = scmp.ne.s32.totalorder %s121_s0, %s5891_s25  ;;  %p5897_p5 = scmp.lt.s32.totalorder %s5891_s25, %s5891_s25 }
  0xae   :  { %p5898_p6 = por %p5897_p5, %p5896_p4 }
  0xb0   :  { %p5899_p7 = pnand %p5898_p6, %p5892_p3 }
  0xb2   :  { %5902 = shalt.err (!%p5899_p7)
}
  0xb3   :  { %123 = dma.hbm_to_vmem [thread:$0]  %s6273_s13, 2048, %s121_s0, [#allocation8]  }
  0xb4   :  { %s5911_s6 = scalar_lea.vmem %s141_s10, 16  ;;  %s5915_s15 = scalar_lea.vmem %s141_s10, 32 }
  0xb5   :  { %p5912_p8 = scmp.ne.s32.totalorder %s141_s10, %s5911_s6  ;;  %p5916_p9 = scmp.lt.s32.totalorder %s141_s10, %s141_s10 }
  0xb6   :  { %p5917_p10 = scmp.lt.s32.totalorder %s5915_s15, %s5911_s6 }
  0xb8   :  { %p5918_p11 = por %p5917_p10, %p5916_p9 }
  0xba   :  { %p5919_p12 = pnand %p5918_p11, %p5912_p8 }
  0xbc   :  { %5922 = shalt.err (!%p5919_p12)
}
  0xbd   :  { %143 = dma.hbm_to_vmem [thread:$0]  %s6283_s21, 16, %s141_s10, [#allocation11]  }
  0xbe   :  { %s6241_s5 = smov [#allocation15]   ;;  %s6242_s18 = smov [#allocation18]  }
  0xbf   :  { %s159_s16 = sshll.u32 %s6241_s5, 4  ;;  %s182_s14 = sshll.u32 %s6242_s18, 4  ;;  %s160_s16 = int_to_ptr.vmem [resolvable:$true] %s159_s16  ;;  %s183_s14 = int_to_ptr.vmem [resolvable:$true] %s182_s14 }
  0xc0   :  { %s5931_s22 = scalar_lea.vmem %s160_s16, 2048  ;;  %p5936_p0 = scmp.lt.s32.totalorder %s160_s16, %s160_s16 }
  0xc1   :  { %p5932_p13 = scmp.ne.s32.totalorder %s160_s16, %s5931_s22  ;;  %p5937_p1 = scmp.lt.s32.totalorder %s5931_s22, %s5931_s22 }
  0xc3   :  { %p5938_p2 = por %p5937_p1, %p5936_p0 }
  0xc5   :  { %p5939_p3 = pnand %p5938_p2, %p5932_p13 }
  0xc7   :  { %5942 = shalt.err (!%p5939_p3)
}
  0xc8   :  { %165 = dma.hbm_to_vmem [thread:$0]  %s6293_s29, 2048, %s160_s16, [#allocation14], %s6226_s1, %s6226_s1, %s6227_s2  }
  0xc9   :  { %s5951_s13 = scalar_lea.vmem %s183_s14, 16  ;;  %s5955_s21 = scalar_lea.vmem %s183_s14, 32 }
  0xca   :  { %p5952_p4 = scmp.ne.s32.totalorder %s183_s14, %s5951_s13  ;;  %p5956_p5 = scmp.lt.s32.totalorder %s183_s14, %s183_s14 }
  0xcb   :  { %p5957_p6 = scmp.lt.s32.totalorder %s5955_s21, %s5951_s13 }
  0xcd   :  { %p5958_p7 = por %p5957_p6, %p5956_p5 }
  0xcf   :  { %p5959_p8 = pnand %p5958_p7, %p5952_p4 }
  0xd1   :  { %5962 = shalt.err (!%p5959_p8)
}
  0xd2   :  { %185 = dma.hbm_to_vmem [thread:$0]  %s6303_s8, 16, %s183_s14, [#allocation17]  }
  0xd3   :  { %s6243_s9 = smov [#allocation21]   ;;  %s6244_s17 = smov [#allocation24]  }
  0xd4   :  { %s201_s23 = sshll.u32 %s6243_s9, 4  ;;  %s229_s26 = sshll.u32 %s6244_s17, 4  ;;  %s202_s23 = int_to_ptr.vmem [resolvable:$true] %s201_s23  ;;  %s230_s26 = int_to_ptr.vmem [resolvable:$true] %s229_s26 }
  0xd5   :  { %s5971_s30 = scalar_lea.vmem %s202_s23, 2048  ;;  %p5976_p10 = scmp.lt.s32.totalorder %s202_s23, %s202_s23 }
  0xd6   :  { %p5972_p9 = scmp.ne.s32.totalorder %s202_s23, %s5971_s30  ;;  %p5977_p11 = scmp.lt.s32.totalorder %s5971_s30, %s5971_s30 }
  0xd8   :  { %p5978_p12 = por %p5977_p11, %p5976_p10 }
  0xda   :  { %p5979_p13 = pnand %p5978_p12, %p5972_p9 }
  0xdc   :  { %5982 = shalt.err (!%p5979_p13)
}
  0xdd   :  { %207 = dma.hbm_to_vmem [thread:$0]  %s6313_s19, 2048, %s202_s23, [#allocation20], %s6226_s1, %s6226_s1, %s6227_s2  }
  0xde   :  { %s5991_s29 = scalar_lea.vmem %s230_s26, 16384  ;;  %p5996_p1 = scmp.lt.s32.totalorder %s230_s26, %s230_s26 }
  0xdf   :  { %p5992_p0 = scmp.ne.s32.totalorder %s230_s26, %s5991_s29  ;;  %p5997_p2 = scmp.lt.s32.totalorder %s5991_s29, %s5991_s29 }
  0xe1   :  { %p5998_p3 = por %p5997_p2, %p5996_p1 }
  0xe3   :  { %p5999_p4 = pnand %p5998_p3, %p5992_p0 }
  0xe5   :  { %6002 = shalt.err (!%p5999_p4)
}
  0xe6   :  { %s6825_s8 = sld [smem:[#allocation55_spill]]  ;;  %s6245_s28 = smov [#allocation27]  }
  0xe7   :  { %s265_s27 = sshll.u32 %s6245_s28, 4  ;;  %s6246_s0 = smov [#allocation30]   ;;  %s266_s27 = int_to_ptr.vmem [resolvable:$true] %s265_s27 }
  0xe8   :  { %s297_s7 = sshll.u32 %s6246_s0, 4  ;;  %s6011_s10 = scalar_lea.vmem %s266_s27, 4096  ;;  %s298_s7 = int_to_ptr.vmem [resolvable:$true] %s297_s7 }
  0xe9   :  { %p6012_p5 = scmp.ne.s32.totalorder %s266_s27, %s6011_s10  ;;  %p6016_p6 = scmp.lt.s32.totalorder %s266_s27, %s266_s27 }
  0xea   :  { %p6017_p7 = scmp.lt.s32.totalorder %s6011_s10, %s6011_s10 }
  0xec   :  { %235 = dma.hbm_to_vmem [thread:$0]  %s6825_s8, 16384, %s230_s26, [#allocation23], %s6232_s3, %s6232_s3, %s6233_s11  }
  0xed   :  { %p6018_p8 = por %p6017_p7, %p6016_p6 }
  0xef   :  { %p6019_p9 = pnand %p6018_p8, %p6012_p5 }
  0xf1   :  { %6022 = shalt.err (!%p6019_p9)
}
  0xf2   :  { %s6826_s19 = sld [smem:[#allocation62_spill]]  ;;  %s6031_s25 = scalar_lea.vmem %s298_s7, 4096 }
  0xf3   :  { %p6032_p10 = scmp.ne.s32.totalorder %s298_s7, %s6031_s25  ;;  %p6036_p11 = scmp.lt.s32.totalorder %s298_s7, %s298_s7 }
  0xf4   :  { %p6037_p12 = scmp.lt.s32.totalorder %s6031_s25, %s6031_s25 }
  0xf6   :  { %p6038_p13 = por %p6037_p12, %p6036_p11 }
  0xf8   :  { %271 = dma.hbm_to_vmem [thread:$0]  %s6826_s19, 4096, %s266_s27, [#allocation26], %s6226_s1, %s6226_s1, %s6227_s2  }
  0xf9   :  { %p6039_p0 = pnand %p6038_p13, %p6032_p10 }
  0xfb   :  { %6042 = shalt.err (!%p6039_p0)
}
  0xfc   :  { %s6827_s3 = sld [smem:[#allocation67_spill]] }
 0x102   :  { %303 = dma.hbm_to_vmem [thread:$0]  %s6827_s3, 4096, %s298_s7, [#allocation29], %s6226_s1, %s6226_s1, %s6227_s2  }
 0x103   :  { %6163 = dma.done.wait [#allocation5], 1024  }
 0x104   :  { %6164 = vsyncadd [#allocation5], 4294966272 }
 0x105   :  { %6165 = dma.done.wait [#allocation8], 3072  }
 0x106   :  { %6166 = vsyncadd [#allocation8], 4294964224 }
 0x107   :  { %6167 = dma.done.wait [#allocation11], 2064  }
 0x108   :  { %6168 = vsyncadd [#allocation11], 4294965232 }
 0x109   :  { %6169 = dma.done.wait [#allocation14], 2064  }
 0x10a   :  { %6170 = vsyncadd [#allocation14], 4294965232 }
 0x10b   :  { %6171 = dma.done.wait [#allocation17], 32  }
 0x10c   :  { %6172 = vsyncadd [#allocation17], 4294967264 }
 0x10d   :  { %6173 = dma.done.wait [#allocation20], 2064  }
 0x10e   :  { %6174 = vsyncadd [#allocation20], 4294965232 }
 0x10f   :  { %6175 = dma.done.wait [#allocation23], 32768  }
 0x110   :  { %6176 = vsyncadd [#allocation23], 4294934528 }
 0x111   :  { %6177 = dma.done.wait [#allocation26], 12288  }
 0x112   :  { %6178 = vsyncadd [#allocation26], 4294955008 }
 0x113   :  { %6179 = dma.done.wait [#allocation29], 12288  }
 0x114   :  { %6180 = vsyncadd [#allocation29], 4294955008  ;;  %v358_v0 = vld [vmem:[#allocation4] sm:$0xff]  ;;  %v359_v1 = vld [vmem:[#allocation4 + $0x8] sm:$0xff]  ;;  %vm432_vm0 = vcmask 1041409   ;;  %vm434_vm1 = vcmask 1042434  }
 0x115   :  { %v360_v2 = vld [vmem:[#allocation4 + $0x10] sm:$0xff]  ;;  %v361_v3 = vld [vmem:[#allocation4 + $0x18] sm:$0xff]  ;;  %v362_v4 = vld [vmem:[#allocation4 + $0x20] sm:$0xff]  ;;  %v366_v6 = vrot.slane %v358_v0, 4  ;;  %v372_v7 = vrot.slane %v359_v1, 4  ;;  %vm436_vm2 = vcmask 1043459  }
 0x116   :  { %v363_v5 = vld [vmem:[#allocation4 + $0x28] sm:$0xff]  ;;  %v378_v8 = vrot.slane %v360_v2, 4  ;;  %v364_v9 = vld [vmem:[#allocation4 + $0x30] sm:$0xff]  ;;  %v365_v10 = vld [vmem:[#allocation4 + $0x38] sm:$0xff]  ;;  %v384_v11 = vrot.slane %v361_v3, 4  ;;  %v390_v12 = vrot.slane %v362_v4, 4 }
 0x117   :  { %v396_v13 = vrot.slane %v363_v5, 4  ;;  %v367_v14 = vadd.f32 %v366_v6, %v358_v0  ;;  %v373_v15 = vadd.f32 %v372_v7, %v359_v1  ;;  %v402_v17 = vrot.slane %v364_v9, 4  ;;  %v687_v46 = vld [vmem:[#allocation7] sm:$0xff]  ;;  %v688_v51 = vld [vmem:[#allocation7 + $0x8] sm:$0xff]  ;;  %v689_v56 = vld [vmem:[#allocation7 + $0x10] sm:$0xff]  ;;  %s6828_s1 = sld [smem:[#allocation53_spill]] }
 0x118   :  { %v379_v16 = vadd.f32 %v378_v8, %v360_v2  ;;  %v385_v18 = vadd.f32 %v384_v11, %v361_v3  ;;  %v391_v19 = vadd.f32 %v390_v12, %v362_v4  ;;  %v408_v21 = vrot.slane %v365_v10, 4  ;;  %v690_v61 = vld [vmem:[#allocation7 + $0x18] sm:$0xff]  ;;  %v691_v2 = vld [vmem:[#allocation7 + $0x20] sm:$0xff]  ;;  %s6829_s2 = sld [smem:[#allocation54_spill]]  ;;  %s6249_s23 = smov [#allocation32]  }
 0x119   :  { %v397_v20 = vadd.f32 %v396_v13, %v363_v5  ;;  %v368_v22 = vrot.slane %v367_v14, 2  ;;  %v374_v23 = vrot.slane %v373_v15, 2  ;;  %v403_v25 = vadd.f32 %v402_v17, %v364_v9  ;;  %v692_v5 = vld [vmem:[#allocation7 + $0x28] sm:$0xff]  ;;  %v693_v13 = vld [vmem:[#allocation7 + $0x30] sm:$0xff]  ;;  %s6830_s11 = sld [smem:[#allocation56_spill]]  ;;  %s4459_s17 = sshll.u32 %s6249_s23, 4  ;;  %s4460_s17 = int_to_ptr.vmem [resolvable:$true] %s4459_s17 }
 0x11a   :  { %v380_v24 = vrot.slane %v379_v16, 2  ;;  %v386_v26 = vrot.slane %v385_v18, 2  ;;  %v392_v27 = vrot.slane %v391_v19, 2  ;;  %v409_v29 = vadd.f32 %v408_v21, %v365_v10  ;;  %s6831_s6 = sld [smem:[#allocation61_spill]]  ;;  %s6250_s26 = smov [#allocation35]  }
 0x11b   :  { %v398_v28 = vrot.slane %v397_v20, 2  ;;  %v369_v30 = vadd.f32 %v368_v22, %v367_v14  ;;  %v375_v31 = vadd.f32 %v374_v23, %v373_v15  ;;  %v404_v33 = vrot.slane %v403_v25, 2  ;;  %s6832_s15 = sld [smem:[#allocation57_spill]]  ;;  %s4479_s30 = sshll.u32 %s6250_s26, 4  ;;  %s4480_s30 = int_to_ptr.vmem [resolvable:$true] %s4479_s30 }
 0x11c   :  { %v381_v32 = vadd.f32 %v380_v24, %v379_v16  ;;  %vm438_vm3 = vcmask 1044484   ;;  %v387_v34 = vadd.f32 %v386_v26, %v385_v18  ;;  %v393_v35 = vadd.f32 %v392_v27, %v391_v19  ;;  %v694_v18 = vld [vmem:[#allocation7 + $0x38] sm:$0xff]  ;;  %s6833_s5 = sld [smem:[#allocation60_spill]]  ;;  %s6043_s29 = scalar_lea.vmem %s4460_s17, 128 }
 0x11d   :  { %v399_v36 = vadd.f32 %v398_v28, %v397_v20  ;;  %v410_v37 = vrot.slane %v409_v29, 2  ;;  %vm440_vm4 = vcmask 1045509   ;;  %v370_v38 = vrot.slane %v369_v30, 1  ;;  %s6834_s16 = sld [smem:[#allocation58_spill]]  ;;  %p6044_p1 = scmp.ne.s32.totalorder %s4460_s17, %s6043_s29 }
 0x11e   :  { %v376_v39 = vrot.slane %v375_v31, 1  ;;  %v382_v40 = vrot.slane %v381_v32, 1  ;;  %v405_v41 = vadd.f32 %v404_v33, %v403_v25  ;;  %vm442_vm5 = vcmask 1046534   ;;  %s6835_s18 = sld [smem:[#allocation59_spill]]  ;;  %p6048_p2 = scmp.lt.s32.totalorder %s4460_s17, %s4460_s17 }
 0x11f   :  { %v388_v42 = vrot.slane %v387_v34, 1  ;;  %v394_v43 = vrot.slane %v393_v35, 1  ;;  %v400_v44 = vrot.slane %v399_v36, 1  ;;  %v411_v45 = vadd.f32 %v410_v37, %v409_v29  ;;  %s6836_s14 = sld [smem:[#allocation64_spill]]  ;;  %p6049_p3 = scmp.lt.s32.totalorder %s6043_s29, %s6043_s29 }
 0x120   :  { %vm444_vm6 = vcmask 1047559   ;;  %v371_v47 = vadd.f32 %v370_v38, %v369_v30  ;;  %v377_v48 = vadd.f32 %v376_v39, %v375_v31  ;;  %v383_v49 = vadd.f32 %v382_v40, %v381_v32  ;;  %s6837_s22 = sld [smem:[#allocation65_spill]] }
 0x121   :  { %v406_v50 = vrot.slane %v405_v41, 1  ;;  %v389_v52 = vadd.f32 %v388_v42, %v387_v34  ;;  %v395_v53 = vadd.f32 %v394_v43, %v393_v35  ;;  %v401_v54 = vadd.f32 %v400_v44, %v399_v36  ;;  %s6838_s13 = sld [smem:[#allocation63_spill]]  ;;  %p6050_p4 = por %p6049_p3, %p6048_p2 }
 0x122   :  { %v412_v55 = vrot.slane %v411_v45, 1  ;;  %v6481_v58 = vmul.f32 0.125, %v371_v47  ;;  %v6483_v59 = vmul.f32 0.125, %v377_v48  ;;  %v6485_v60 = vmul.f32 0.125, %v383_v49  ;;  %s6839_s21 = sld [smem:[#allocation66_spill]] }
 0x123   :  { %v407_v57 = vadd.f32 %v406_v50, %v405_v41  ;;  %v6487_v63 = vmul.f32 0.125, %v389_v52  ;;  %v6489_v0 = vmul.f32 0.125, %v395_v53  ;;  %v6491_v1 = vmul.f32 0.125, %v401_v54  ;;  %s6840_s9 = sld [smem:[#allocation68_spill]]  ;;  %p6051_p5 = pnand %p6050_p4, %p6044_p1 }
 0x124   :  { %v413_v62 = vadd.f32 %v412_v55, %v411_v45  ;;  %v433_v4 = vsel %vm432_vm0, %v6483_v59, %v6481_v58  ;;  %v695_v6 = vrot.slane %v687_v46, 4  ;;  %v701_v7 = vrot.slane %v688_v51, 4 }
 0x125   :  { %v6493_v3 = vmul.f32 0.125, %v407_v57  ;;  %v435_v9 = vsel %vm434_vm1, %v6485_v60, %v433_v4  ;;  %v707_v10 = vrot.slane %v689_v56, 4  ;;  %v713_v11 = vrot.slane %v690_v61, 4 }
 0x126   :  { %v6498_v8 = vmul.f32 0.125, %v413_v62  ;;  %v437_v12 = vsel %vm436_vm2, %v6487_v63, %v435_v9  ;;  %v696_v14 = vadd.f32 %v695_v6, %v687_v46  ;;  %v702_v15 = vadd.f32 %v701_v7, %v688_v51 }
 0x127   :  { %v719_v16 = vrot.slane %v691_v2, 4  ;;  %v439_v17 = vsel %vm438_vm3, %v6489_v0, %v437_v12  ;;  %v708_v19 = vadd.f32 %v707_v10, %v689_v56  ;;  %v714_v20 = vadd.f32 %v713_v11, %v690_v61 }
 0x128   :  { %v725_v21 = vrot.slane %v692_v5, 4  ;;  %v441_v22 = vsel %vm440_vm4, %v6491_v1, %v439_v17  ;;  %v697_v23 = vrot.slane %v696_v14, 2  ;;  %v703_v24 = vrot.slane %v702_v15, 2 }
 0x129   :  { %v720_v25 = vadd.f32 %v719_v16, %v691_v2  ;;  %v443_v26 = vsel %vm442_vm5, %v6493_v3, %v441_v22  ;;  %v709_v27 = vrot.slane %v708_v19, 2  ;;  %v715_v28 = vrot.slane %v714_v20, 2 }
 0x12a   :  { %v726_v29 = vadd.f32 %v725_v21, %v692_v5  ;;  %v445_v30 = vsel %vm444_vm6, %v6498_v8, %v443_v26  ;;  %v698_v31 = vadd.f32 %v697_v23, %v696_v14  ;;  %v704_v32 = vadd.f32 %v703_v24, %v702_v15 }
 0x12b   :  { %v721_v33 = vrot.slane %v720_v25, 2  ;;  %447 = vadd.xlane.f32.xlu0 %v445_v30  ;;  %v710_v34 = vadd.f32 %v709_v27, %v708_v19  ;;  %v716_v35 = vadd.f32 %v715_v28, %v714_v20  ;;  %v731_v37 = vrot.slane %v693_v13, 4 }
 0x12c   :  { %v727_v36 = vrot.slane %v726_v29, 2  ;;  %v699_v38 = vrot.slane %v698_v31, 1  ;;  %v705_v39 = vrot.slane %v704_v32, 1  ;;  %v737_v41 = vrot.slane %v694_v18, 4 }
 0x12d   :  { %v722_v40 = vadd.f32 %v721_v33, %v720_v25  ;;  %v711_v42 = vrot.slane %v710_v34, 1  ;;  %v717_v43 = vrot.slane %v716_v35, 1  ;;  %v732_v45 = vadd.f32 %v731_v37, %v693_v13 }
 0x12e   :  { %v728_v44 = vadd.f32 %v727_v36, %v726_v29  ;;  %v700_v46 = vadd.f32 %v699_v38, %v698_v31  ;;  %v706_v47 = vadd.f32 %v705_v39, %v704_v32  ;;  %v738_v49 = vadd.f32 %v737_v41, %v694_v18 }
 0x12f   :  { %v723_v48 = vrot.slane %v722_v40, 1  ;;  %v712_v50 = vadd.f32 %v711_v42, %v710_v34  ;;  %v718_v51 = vadd.f32 %v717_v43, %v716_v35  ;;  %v733_v53 = vrot.slane %v732_v45, 2 }
 0x130   :  { %v729_v52 = vrot.slane %v728_v44, 1  ;;  %v739_v55 = vrot.slane %v738_v49, 2  ;;  %v6512_v56 = vmul.f32 0.125, %v700_v46  ;;  %v6514_v57 = vmul.f32 0.125, %v706_v47 }
 0x131   :  { %v724_v54 = vadd.f32 %v723_v48, %v722_v40  ;;  %v734_v62 = vadd.f32 %v733_v53, %v732_v45  ;;  %v6516_v2 = vmul.f32 0.125, %v712_v50  ;;  %v6518_v4 = vmul.f32 0.125, %v718_v51 }
 0x132   :  { %v730_v61 = vadd.f32 %v729_v52, %v728_v44  ;;  %v740_v5 = vadd.f32 %v739_v55, %v738_v49  ;;  %v761_v7 = vsel %vm432_vm0, %v6514_v57, %v6512_v56  ;;  %vm6248_vm7 = vmmov 0  }
 0x133   :  { %v6520_v6 = vmul.f32 0.125, %v724_v54  ;;  %v735_v9 = vrot.slane %v734_v62, 1  ;;  %v762_v11 = vsel %vm434_vm1, %v6516_v2, %v761_v7 }
 0x134   :  { %v6525_v10 = vmul.f32 0.125, %v730_v61  ;;  %v741_v12 = vrot.slane %v740_v5, 1  ;;  %v763_v13 = vsel %vm436_vm2, %v6518_v4, %v762_v11 }
 0x135   :  { %v736_v14 = vadd.f32 %v735_v9, %v734_v62  ;;  %v764_v15 = vsel %vm438_vm3, %v6520_v6, %v763_v13 }
 0x136   :  { %v742_v16 = vadd.f32 %v741_v12, %v740_v5  ;;  %v765_v17 = vsel %vm440_vm4, %v6525_v10, %v764_v15 }
 0x137   :  { %v749_v18 = vmul.f32 0.125, %v736_v14 }
 0x138   :  { %v750_v19 = vmul.f32 0.125, %v742_v16 }
 0x139   :  { %v766_v20 = vsel %vm442_vm5, %v749_v18, %v765_v17 }
 0x13a   :  { %v767_v21 = vsel %vm444_vm6, %v750_v19, %v766_v20 }
 0x13b   :  { %769 = vadd.xlane.f32.xlu0 %v767_v21 }
 0x1b4   :  { %v448_v22 = vpop.xlane.xlu0 %447 }
 0x1b5   :  { %v450_v23 = vmul.f32 0.0078125, %v448_v22 }
 0x1b7   :  { %v452_v24 = vrot.slane %v450_v23, 1  ;;  %v453_v25 = vrot.slane %v450_v23, 2  ;;  %v454_v26 = vrot.slane %v450_v23, 3  ;;  %v455_v27 = vrot.slane %v450_v23, 4 }
 0x1b8   :  { %v456_v28 = vrot.slane %v450_v23, 5  ;;  %v457_v29 = vrot.slane %v450_v23, 6  ;;  %v458_v30 = vrot.slane %v450_v23, 7  ;;  %v6538_v31 = vsub.f32 %v6481_v58, %v450_v23 }
 0x1b9   :  { %v6541_v32 = vsub.f32 %v6483_v59, %v452_v24  ;;  %v6544_v33 = vsub.f32 %v6485_v60, %v453_v25  ;;  %v6547_v34 = vsub.f32 %v6487_v63, %v454_v26  ;;  %v6550_v35 = vsub.f32 %v6489_v0, %v455_v27 }
 0x1ba   :  { %v6553_v36 = vsub.f32 %v6491_v1, %v456_v28  ;;  %v6556_v37 = vsub.f32 %v6493_v3, %v457_v29  ;;  %v6559_v58 = vsub.f32 %v6498_v8, %v458_v30  ;;  %v475_v38 = vmul.f32 %v6538_v31, %v6538_v31 }
 0x1bb   :  { %v476_v59 = vmul.f32 %v6541_v32, %v6541_v32  ;;  %v477_v60 = vmul.f32 %v6544_v33, %v6544_v33  ;;  %v478_v63 = vmul.f32 %v6547_v34, %v6547_v34  ;;  %v479_v0 = vmul.f32 %v6550_v35, %v6550_v35 }
 0x1bc   :  { %v480_v1 = vmul.f32 %v6553_v36, %v6553_v36  ;;  %v481_v3 = vmul.f32 %v6556_v37, %v6556_v37  ;;  %v482_v8 = vmul.f32 %v6559_v58, %v6559_v58 }
 0x1bd   :  { %v491_v39 = vrot.slane %v476_v59, 7  ;;  %v493_v40 = vrot.slane %v477_v60, 6  ;;  %v495_v41 = vrot.slane %v478_v63, 5  ;;  %v497_v42 = vrot.slane %v479_v0, 4 }
 0x1be   :  { %v499_v43 = vrot.slane %v480_v1, 3  ;;  %v501_v44 = vrot.slane %v481_v3, 2  ;;  %v503_v45 = vrot.slane %v482_v8, 1  ;;  %v6247_v3 = vmov 0.0   ;;  %v586_v8 = vld [vmem:[#allocation15 + $0x78] sm:$0xff] }
 0x1bf   :  { %v492_v46 = vsel %vm432_vm0, %v491_v39, %v475_v38  ;;  %5291 = vmatprep.subr.mxu0 %v6247_v3  ;;  %5326 = vmatprep.subr.mxu1 %v6247_v3  ;;  %v585_v38 = vld [vmem:[#allocation15 + $0x70] sm:$0xff]  ;;  %v584_v39 = vld [vmem:[#allocation15 + $0x68] sm:$0xff] }
 0x1c0   :  { %v494_v47 = vsel %vm434_vm1, %v493_v40, %v492_v46  ;;  %5292 = vmatpush3.msra.mxu0 %v586_v8  ;;  %v907_v40 = vld [vmem:[#allocation21 + $0x78] sm:$0xff]  ;;  %v581_v46 = vld [vmem:[#allocation15 + $0x50] sm:$0xff]  ;;  %5323 = vmatprep.mubr.msk.f32.mxu0 %vm6248_vm7, %v6247_v3 }
 0x1c1   :  { %v496_v48 = vsel %vm436_vm2, %v495_v41, %v494_v47  ;;  %5293 = vmatprep.subr.mxu0 %v6247_v3  ;;  %5327 = vmatpush3.msra.mxu1 %v907_v40  ;;  %v583_v41 = vld [vmem:[#allocation15 + $0x60] sm:$0xff] }
 0x1c2   :  { %v498_v49 = vsel %vm438_vm3, %v497_v42, %v496_v48  ;;  %5294 = vmatpush3.msra.mxu0 %v585_v38  ;;  %v906_v42 = vld [vmem:[#allocation21 + $0x70] sm:$0xff]  ;;  %5328 = vmatprep.subr.mxu1 %v6247_v3  ;;  %v903_v47 = vld [vmem:[#allocation21 + $0x58] sm:$0xff]  ;;  %v580_v48 = vld [vmem:[#allocation15 + $0x48] sm:$0xff] }
 0x1c3   :  { %v500_v50 = vsel %vm440_vm4, %v499_v43, %v498_v49  ;;  %5295 = vmatprep.subr.mxu0 %v6247_v3  ;;  %v905_v43 = vld [vmem:[#allocation21 + $0x68] sm:$0xff]  ;;  %5329 = vmatpush3.msra.mxu1 %v906_v42  ;;  %v902_v49 = vld [vmem:[#allocation21 + $0x50] sm:$0xff] }
 0x1c4   :  { %v770_v51 = vpop.xlane.xlu0 %769  ;;  %v502_v52 = vsel %vm442_vm5, %v501_v44, %v500_v50  ;;  %5296 = vmatpush3.msra.mxu0 %v584_v39  ;;  %v582_v44 = vld [vmem:[#allocation15 + $0x58] sm:$0xff]  ;;  %5330 = vmatprep.subr.mxu1 %v6247_v3  ;;  %v579_v50 = vld [vmem:[#allocation15 + $0x40] sm:$0xff] }
 0x1c5   :  { %v771_v53 = vmul.f32 0.0078125, %v770_v51  ;;  %v504_v54 = vsel %vm444_vm6, %v503_v45, %v502_v52  ;;  %5297 = vmatprep.subr.mxu0 %v6247_v3  ;;  %v904_v45 = vld [vmem:[#allocation21 + $0x60] sm:$0xff]  ;;  %5331 = vmatpush3.msra.mxu1 %v905_v43  ;;  %v901_v51 = vld [vmem:[#allocation21 + $0x48] sm:$0xff]  ;;  %v578_v52 = vld [vmem:[#allocation15 + $0x38] sm:$0xff] }
 0x1c6   :  { %506 = vadd.xlane.f32.xlu1 %v504_v54  ;;  %5298 = vmatpush3.msra.mxu0 %v583_v41  ;;  %v577_v54 = vld [vmem:[#allocation15 + $0x30] sm:$0xff]  ;;  %v4570_v41 = vld [vmem:[#allocation13] ss:$0 sm:$0xff] }
 0x1c7   :  { %v773_v55 = vrot.slane %v771_v53, 1  ;;  %v774_v61 = vrot.slane %v771_v53, 2  ;;  %v775_v62 = vrot.slane %v771_v53, 3  ;;  %v776_v5 = vrot.slane %v771_v53, 4  ;;  %5299 = vmatprep.subr.mxu0 %v6247_v3  ;;  %5332 = vmatprep.subr.mxu1 %v6247_v3 }
 0x1c8   :  { %v777_v7 = vrot.slane %v771_v53, 5  ;;  %v778_v9 = vrot.slane %v771_v53, 6  ;;  %v779_v11 = vrot.slane %v771_v53, 7  ;;  %v6585_v12 = vsub.f32 %v6512_v56, %v771_v53  ;;  %5300 = vmatpush3.msra.mxu0 %v582_v44  ;;  %5333 = vmatpush3.msra.mxu1 %v904_v45  ;;  %v900_v53 = vld [vmem:[#allocation21 + $0x40] sm:$0xff] }
 0x1c9   :  { %v6588_v13 = vsub.f32 %v6514_v57, %v773_v55  ;;  %v6591_v14 = vsub.f32 %v6516_v2, %v774_v61  ;;  %v6594_v15 = vsub.f32 %v6518_v4, %v775_v62  ;;  %v6597_v16 = vsub.f32 %v6520_v6, %v776_v5  ;;  %5301 = vmatprep.subr.mxu0 %v6247_v3  ;;  %v899_v55 = vld [vmem:[#allocation21 + $0x38] sm:$0xff]  ;;  %v576_v61 = vld [vmem:[#allocation15 + $0x28] sm:$0xff]  ;;  %v898_v62 = vld [vmem:[#allocation21 + $0x30] sm:$0xff] }
 0x1ca   :  { %v6600_v17 = vsub.f32 %v6525_v10, %v777_v7  ;;  %v6602_v20 = vsub.f32 %v749_v18, %v778_v9  ;;  %v6604_v21 = vsub.f32 %v750_v19, %v779_v11  ;;  %v796_v19 = vmul.f32 %v6585_v12, %v6585_v12  ;;  %5302 = vmatpush3.msra.mxu0 %v581_v46  ;;  %v575_v5 = vld [vmem:[#allocation15 + $0x20] sm:$0xff]  ;;  %v897_v7 = vld [vmem:[#allocation21 + $0x28] sm:$0xff]  ;;  %v574_v9 = vld [vmem:[#allocation15 + $0x18] sm:$0xff] }
 0x1cb   :  { %v797_v56 = vmul.f32 %v6588_v13, %v6588_v13  ;;  %v798_v57 = vmul.f32 %v6591_v14, %v6591_v14  ;;  %v799_v2 = vmul.f32 %v6594_v15, %v6594_v15  ;;  %v800_v4 = vmul.f32 %v6597_v16, %v6597_v16  ;;  %5334 = vmatprep.subr.mxu1 %v6247_v3  ;;  %v896_v11 = vld [vmem:[#allocation21 + $0x20] sm:$0xff] }
 0x1cc   :  { %v801_v6 = vmul.f32 %v6600_v17, %v6600_v17  ;;  %v802_v10 = vmul.f32 %v6602_v20, %v6602_v20  ;;  %v803_v18 = vmul.f32 %v6604_v21, %v6604_v21  ;;  %5303 = vmatprep.subr.mxu0 %v6247_v3  ;;  %5335 = vmatpush3.msra.mxu1 %v903_v47 }
 0x1cd   :  { %v812_v22 = vrot.slane %v797_v56, 7  ;;  %v814_v23 = vrot.slane %v798_v57, 6  ;;  %v816_v24 = vrot.slane %v799_v2, 5  ;;  %v818_v25 = vrot.slane %v800_v4, 4  ;;  %5304 = vmatpush3.msra.mxu0 %v580_v48  ;;  %5336 = vmatprep.subr.mxu1 %v6247_v3  ;;  %v573_v56 = vld [vmem:[#allocation15 + $0x10] sm:$0xff]  ;;  %v895_v57 = vld [vmem:[#allocation21 + $0x18] sm:$0xff] }
 0x1ce   :  { %v820_v26 = vrot.slane %v801_v6, 3  ;;  %v822_v27 = vrot.slane %v802_v10, 2  ;;  %v824_v28 = vrot.slane %v803_v18, 1  ;;  %5305 = vmatprep.subr.mxu0 %v6247_v3  ;;  %5337 = vmatpush3.msra.mxu1 %v902_v49  ;;  %v572_v2 = vld [vmem:[#allocation15 + $0x8] sm:$0xff]  ;;  %v894_v4 = vld [vmem:[#allocation21 + $0x10] sm:$0xff]  ;;  %v571_v6 = vld [vmem:[#allocation15] sm:$0xff] }
 0x1cf   :  { %v813_v29 = vsel %vm432_vm0, %v812_v22, %v796_v19  ;;  %5306 = vmatpush3.msra.mxu0 %v579_v50  ;;  %5338 = vmatprep.subr.mxu1 %v6247_v3  ;;  %v5427_v10 = vld [vmem:[#allocation22 + $0x78] sm:$0xff]   ;;  %v893_v18 = vld [vmem:[#allocation21 + $0x8] sm:$0xff]  ;;  %v892_v19 = vld [vmem:[#allocation21] sm:$0xff] }
 0x1d0   :  { %v815_v30 = vsel %vm434_vm1, %v814_v23, %v813_v29  ;;  %5307 = vmatprep.subr.mxu0 %v6247_v3  ;;  %5339 = vmatpush3.msra.mxu1 %v901_v51  ;;  %v5430_v22 = vld [vmem:[#allocation22 + $0xf8] sm:$0xff]  }
 0x1d1   :  { %v817_v59 = vsel %vm436_vm2, %v816_v24, %v815_v30  ;;  %5308 = vmatpush3.msra.mxu0 %v578_v52  ;;  %5340 = vmatprep.subr.mxu1 %v6247_v3 }
 0x1d2   :  { %v819_v60 = vsel %vm438_vm3, %v818_v25, %v817_v59  ;;  %5309 = vmatprep.subr.mxu0 %v6247_v3  ;;  %5341 = vmatpush3.msra.mxu1 %v900_v53 }
 0x1d3   :  { %v821_v63 = vsel %vm440_vm4, %v820_v26, %v819_v60  ;;  %5310 = vmatpush3.msra.mxu0 %v577_v54  ;;  %5342 = vmatprep.subr.mxu1 %v6247_v3 }
 0x1d4   :  { %v823_v0 = vsel %vm442_vm5, %v822_v27, %v821_v63  ;;  %5311 = vmatprep.subr.mxu0 %v6247_v3  ;;  %5343 = vmatpush3.msra.mxu1 %v899_v55  ;;  %v4569_v63 = vld [vmem:[#allocation12] ss:$0 sm:$0xff] }
 0x1d5   :  { %v825_v1 = vsel %vm444_vm6, %v824_v28, %v823_v0  ;;  %5312 = vmatpush3.msra.mxu0 %v576_v61  ;;  %5344 = vmatprep.subr.mxu1 %v6247_v3 }
 0x1d6   :  { %827 = vadd.xlane.f32.xlu1 %v825_v1  ;;  %5313 = vmatprep.subr.mxu0 %v6247_v3 }
 0x1d7   :  { %5345 = vmatpush3.msra.mxu1 %v898_v62  ;;  %5314 = vmatpush3.msra.mxu0 %v575_v5 }
 0x1d8   :  { %5346 = vmatprep.subr.mxu1 %v6247_v3  ;;  %5315 = vmatprep.subr.mxu0 %v6247_v3 }
 0x1d9   :  { %5347 = vmatpush3.msra.mxu1 %v897_v7  ;;  %5316 = vmatpush3.msra.mxu0 %v574_v9 }
 0x1da   :  { %5348 = vmatprep.subr.mxu1 %v6247_v3  ;;  %5317 = vmatprep.subr.mxu0 %v6247_v3 }
 0x1db   :  { %5349 = vmatpush3.msra.mxu1 %v896_v11  ;;  %5318 = vmatpush3.msra.mxu0 %v573_v56 }
 0x1dc   :  { %5350 = vmatprep.subr.mxu1 %v6247_v3  ;;  %5319 = vmatprep.subr.mxu0 %v6247_v3 }
 0x1dd   :  { %5351 = vmatpush3.msra.mxu1 %v895_v57  ;;  %5320 = vmatpush3.msra.mxu0 %v572_v2 }
 0x1de   :  { %5352 = vmatprep.subr.mxu1 %v6247_v3  ;;  %5321 = vmatprep.subr.mxu0 %v6247_v3 }
 0x1df   :  { %5353 = vmatpush3.msra.mxu1 %v894_v4  ;;  %5322 = vmatpush3.msra.mxu0 %v571_v6 }
 0x1e0   :  { %5354 = vmatprep.subr.mxu1 %v6247_v3  ;;  %4869 = vmatprep.subr.bf16.mxu0 %v5427_v10  ;;  %v1009_v10 = vld [vmem:[#allocation9 + $0x8] sm:$0xff] }
 0x1e1   :  { %5355 = vmatpush3.msra.mxu1 %v893_v18  ;;  %5358 = vmatprep.mubr.msk.f32.mxu1 %vm6248_vm7, %v6247_v3 }
 0x1e2   :  { %5356 = vmatprep.subr.mxu1 %v6247_v3 }
 0x1e3   :  { %5357 = vmatpush3.msra.mxu1 %v892_v19 }
 0x1e4   :  { %4891 = vmatprep.subr.bf16.mxu1 %v5430_v22 }
 0x24f   :  { %v507_v23 = vpop.xlane.xlu1 %506 }
 0x250   :  { %v508_v24 = vmul.f32 0.0078125, %v507_v23 }
 0x252   :  { %v509_v25 = vadd.f32 1e-05, %v508_v24 }
 0x254   :  { %5683 = vrsqrt.f32 %v509_v25 }
 0x25f   :  { %v828_v26 = vpop.xlane.xlu1 %827 }
 0x260   :  { %v829_v27 = vmul.f32 0.0078125, %v828_v26 }
 0x261   :  { %v5684_v28 = vpop.eup %5683 }
 0x262   :  { %v830_v29 = vadd.f32 1e-05, %v829_v27  ;;  %v512_v30 = vrot.slane %v5684_v28, 1  ;;  %v513_v59 = vrot.slane %v5684_v28, 2  ;;  %v514_v60 = vrot.slane %v5684_v28, 3 }
 0x263   :  { %v515_v0 = vrot.slane %v5684_v28, 4  ;;  %v516_v1 = vrot.slane %v5684_v28, 5  ;;  %v517_v8 = vrot.slane %v5684_v28, 6  ;;  %v518_v38 = vrot.slane %v5684_v28, 7 }
 0x264   :  { %5685 = vrsqrt.f32 %v830_v29  ;;  %v527_v3 = vmul.f32 %v5684_v28, %v6538_v31  ;;  %v528_v39 = vmul.f32 %v512_v30, %v6541_v32  ;;  %v529_v40 = vmul.f32 %v513_v59, %v6544_v33  ;;  %v5428_v30 = vld [vmem:[#allocation22 + $0x38] sm:$0xff]  }
 0x265   :  { %v530_v42 = vmul.f32 %v514_v60, %v6547_v34  ;;  %v531_v43 = vmul.f32 %v515_v0, %v6550_v35  ;;  %v532_v44 = vmul.f32 %v516_v1, %v6553_v36  ;;  %v533_v45 = vmul.f32 %v517_v8, %v6556_v37  ;;  %v5429_v1 = vld [vmem:[#allocation22 + $0x70] sm:$0xff]   ;;  %v4572_v8 = vld [vmem:[#allocation18] ss:$0 sm:$0xff] }
 0x266   :  { %v534_v46 = vmul.f32 %v518_v38, %v6559_v58  ;;  %v541_v47 = vmul.f32 %v4569_v63, %v527_v3  ;;  %v542_v48 = vmul.f32 %v4569_v63, %v528_v39  ;;  %v543_v49 = vmul.f32 %v4569_v63, %v529_v40 }
 0x267   :  { %v544_v50 = vmul.f32 %v4569_v63, %v530_v42  ;;  %v545_v31 = vmul.f32 %v4569_v63, %v531_v43  ;;  %v546_v51 = vmul.f32 %v4569_v63, %v532_v44  ;;  %v547_v32 = vmul.f32 %v4569_v63, %v533_v45  ;;  %v4573_v44 = vld [vmem:[#allocation19] ss:$0 sm:$0xff] }
 0x268   :  { %v548_v52 = vmul.f32 %v4569_v63, %v534_v46  ;;  %v555_v33 = vadd.f32 %v4570_v41, %v541_v47  ;;  %v556_v53 = vadd.f32 %v4570_v41, %v542_v48  ;;  %v557_v54 = vadd.f32 %v4570_v41, %v543_v49 }
 0x269   :  { %v558_v34 = vadd.f32 %v4570_v41, %v544_v50  ;;  %v559_v55 = vadd.f32 %v4570_v41, %v545_v31  ;;  %v560_v35 = vadd.f32 %v4570_v41, %v546_v51  ;;  %v561_v61 = vadd.f32 %v4570_v41, %v547_v32 }
 0x26a   :  { %v562_v36 = vadd.f32 %v4570_v41, %v548_v52  ;;  %v564_v62 = vmax.f32 %v556_v53, 0.0  ;;  %v565_v37 = vmax.f32 %v557_v54, 0.0  ;;  %v563_v7 = vmax.f32 %v555_v33, 0.0 }
 0x26b   :  { %v566_v5 = vmax.f32 %v558_v34, 0.0  ;;  %v567_v58 = vmax.f32 %v559_v55, 0.0  ;;  %v568_v9 = vmax.f32 %v560_v35, 0.0  ;;  %v569_v57 = vmax.f32 %v561_v61, 0.0 }
 0x26c   :  { %v602_v11 = vrot.slane %v564_v62, 7  ;;  %v604_v56 = vrot.slane %v565_v37, 6  ;;  %v570_v2 = vmax.f32 %v562_v36, 0.0  ;;  %v1025_v28 = vpack.c.bf16 %v1009_v10, %v1009_v10  ;;  %v5435_v36 = vld [vmem:[#allocation22 + $0x28] sm:$0xff]   ;;  %v5439_v10 = vld [vmem:[#allocation22 + $0x20] sm:$0xff]  }
 0x26d   :  { %v606_v6 = vrot.slane %v566_v5, 5  ;;  %v608_v19 = vrot.slane %v567_v58, 4  ;;  %v610_v23 = vrot.slane %v568_v9, 3  ;;  %v612_v26 = vrot.slane %v569_v57, 2  ;;  %v5437_v58 = vld [vmem:[#allocation22 + $0x60] sm:$0xff]  }
 0x26e   :  { %v603_v4 = vsel %vm432_vm0, %v602_v11, %v563_v7  ;;  %v614_v27 = vrot.slane %v570_v2, 1 }
 0x26f   :  { %v605_v18 = vsel %vm434_vm1, %v604_v56, %v603_v4 }
 0x270   :  { %v607_v22 = vsel %vm436_vm2, %v606_v6, %v605_v18 }
 0x271   :  { %v5686_v24 = vpop.eup %5685  ;;  %v609_v25 = vsel %vm438_vm3, %v608_v19, %v607_v22  ;;  %v5441_v22 = vld [vmem:[#allocation22 + $0x58] sm:$0xff]  }
 0x272   :  { %v611_v29 = vsel %vm440_vm4, %v610_v23, %v609_v25  ;;  %v833_v59 = vrot.slane %v5686_v24, 1  ;;  %v834_v60 = vrot.slane %v5686_v24, 2  ;;  %v835_v63 = vrot.slane %v5686_v24, 3 }
 0x273   :  { %v613_v0 = vsel %vm442_vm5, %v612_v26, %v611_v29  ;;  %v836_v38 = vrot.slane %v5686_v24, 4  ;;  %v837_v3 = vrot.slane %v5686_v24, 5  ;;  %v838_v39 = vrot.slane %v5686_v24, 6 }
 0x274   :  { %v615_v40 = vsel %vm444_vm6, %v614_v27, %v613_v0  ;;  %v839_v41 = vrot.slane %v5686_v24, 7  ;;  %v848_v42 = vmul.f32 %v5686_v24, %v6585_v12  ;;  %v849_v43 = vmul.f32 %v833_v59, %v6588_v13  ;;  %v5431_v12 = vld [vmem:[#allocation22 + $0x30] sm:$0xff]   ;;  %v5443_v59 = vld [vmem:[#allocation22 + $0x18] sm:$0xff]  }
 0x275   :  { %5324 = vmatmul.mubr.f32.vlgmr.msra.gmra.mxu0 %v615_v40  ;;  %v850_v45 = vmul.f32 %v834_v60, %v6591_v14  ;;  %v851_v46 = vmul.f32 %v835_v63, %v6594_v15  ;;  %v852_v47 = vmul.f32 %v836_v38, %v6597_v16  ;;  %v853_v48 = vmul.f32 %v837_v3, %v6600_v17  ;;  %v5433_v14 = vld [vmem:[#allocation22 + $0x68] sm:$0xff]   ;;  %v5434_v63 = vld [vmem:[#allocation22 + $0xf0] sm:$0xff]  }
 0x276   :  { %4870 = vmatpush3.bf16.msra.mxu0 %v5428_v30  ;;  %v854_v49 = vmul.f32 %v838_v39, %v6602_v20  ;;  %v855_v50 = vmul.f32 %v839_v41, %v6604_v21  ;;  %v862_v31 = vmul.f32 %v4572_v8, %v848_v42  ;;  %v863_v51 = vmul.f32 %v4572_v8, %v849_v43  ;;  %v1011_v27 = vld [vmem:[#allocation9 + $0x18] sm:$0xff]  ;;  %v5432_v30 = vld [vmem:[#allocation22 + $0xb8] sm:$0xff]   ;;  %v5442_v43 = vld [vmem:[#allocation22 + $0xe0] sm:$0xff]  }
 0x277   :  { %4871 = vmatprep.subr.bf16.mxu0 %v5429_v1  ;;  %v864_v13 = vmul.f32 %v4572_v8, %v850_v45  ;;  %v865_v32 = vmul.f32 %v4572_v8, %v851_v46  ;;  %v866_v52 = vmul.f32 %v4572_v8, %v852_v47  ;;  %v867_v33 = vmul.f32 %v4572_v8, %v853_v48  ;;  %v5445_v0 = vld [vmem:[#allocation22 + $0x50] sm:$0xff]   ;;  %v5438_v39 = vld [vmem:[#allocation22 + $0xe8] sm:$0xff]   ;;  %v5444_v45 = vld [vmem:[#allocation22 + $0xa0] sm:$0xff]  }
 0x278   :  { %v868_v53 = vmul.f32 %v4572_v8, %v854_v49  ;;  %v869_v15 = vmul.f32 %v4572_v8, %v855_v50  ;;  %v876_v54 = vadd.f32 %v4573_v44, %v862_v31  ;;  %v877_v16 = vadd.f32 %v4573_v44, %v863_v51  ;;  %2103 = vmatprep.mubr.bf16.mxu0 %v1025_v28  ;;  %v5436_v38 = vld [vmem:[#allocation22 + $0xb0] sm:$0xff]   ;;  %v5449_v40 = vld [vmem:[#allocation22 + $0x48] sm:$0xff]   ;;  %v5455_v46 = vld [vmem:[#allocation22] sm:$0xff]  }
 0x279   :  { %v878_v17 = vadd.f32 %v4573_v44, %v864_v13  ;;  %v879_v34 = vadd.f32 %v4573_v44, %v865_v32  ;;  %v880_v55 = vadd.f32 %v4573_v44, %v866_v52  ;;  %v881_v20 = vadd.f32 %v4573_v44, %v867_v33  ;;  %v5447_v3 = vld [vmem:[#allocation22 + $0x10] sm:$0xff]   ;;  %v5440_v41 = vld [vmem:[#allocation22 + $0xa8] sm:$0xff]   ;;  %v5446_v48 = vld [vmem:[#allocation22 + $0xd8] sm:$0xff]  }
 0x27a   :  { %v882_v35 = vadd.f32 %v4573_v44, %v868_v53  ;;  %v883_v21 = vadd.f32 %v4573_v44, %v869_v15  ;;  %v885_v61 = vmax.f32 %v877_v16, 0.0  ;;  %4872 = vmatpush3.bf16.msra.mxu0 %v5431_v12  ;;  %v884_v7 = vmax.f32 %v876_v54, 0.0  ;;  %v5451_v42 = vld [vmem:[#allocation22 + $0x8] sm:$0xff]   ;;  %v5453_v44 = vld [vmem:[#allocation22 + $0x40] sm:$0xff]   ;;  %v1008_v47 = vld [vmem:[#allocation9] sm:$0xff] }
 0x27b   :  { %v886_v62 = vmax.f32 %v878_v17, 0.0  ;;  %v887_v37 = vmax.f32 %v879_v34, 0.0  ;;  %v888_v5 = vmax.f32 %v880_v55, 0.0  ;;  %4873 = vmatprep.subr.bf16.mxu0 %v5433_v14  ;;  %v889_v9 = vmax.f32 %v881_v20, 0.0  ;;  %v5458_v49 = vld [vmem:[#allocation22 + $0x178] sm:$0xff]   ;;  %v5450_v13 = vld [vmem:[#allocation22 + $0xd0] sm:$0xff]  }
 0x27c   :  { %v923_v11 = vrot.slane %v885_v61, 7  ;;  %v890_v56 = vmax.f32 %v882_v35, 0.0  ;;  %v891_v2 = vmax.f32 %v883_v21, 0.0  ;;  %v1027_v8 = vpack.c.bf16 %v1011_v27, %v1011_v27  ;;  %v1013_v31 = vld [vmem:[#allocation9 + $0x28] sm:$0xff]  ;;  %v5461_v32 = vld [vmem:[#allocation22 + $0x170] sm:$0xff]   ;;  %v5454_v53 = vld [vmem:[#allocation22 + $0xc8] sm:$0xff]  }
 0x27d   :  { %v925_v57 = vrot.slane %v886_v62, 6  ;;  %v927_v6 = vrot.slane %v887_v37, 5  ;;  %v929_v19 = vrot.slane %v888_v5, 4  ;;  %v931_v24 = vrot.slane %v889_v9, 3  ;;  %v5448_v51 = vld [vmem:[#allocation22 + $0x98] sm:$0xff]   ;;  %v5452_v33 = vld [vmem:[#allocation22 + $0x90] sm:$0xff]  }
 0x27e   :  { %v924_v4 = vsel %vm432_vm0, %v923_v11, %v884_v7  ;;  %4874 = vmatpush3.bf16.msra.mxu0 %v5435_v36  ;;  %v933_v26 = vrot.slane %v890_v56, 2  ;;  %v935_v29 = vrot.slane %v891_v2, 1  ;;  %v1024_v50 = vpack.c.bf16 %v1008_v47, %v1008_v47  ;;  %v5460_v12 = vld [vmem:[#allocation22 + $0x138] sm:$0xff]   ;;  %v5463_v14 = vld [vmem:[#allocation22 + $0x130] sm:$0xff]   ;;  %v5465_v15 = vld [vmem:[#allocation22 + $0x168] sm:$0xff]  }
 0x27f   :  { %v926_v18 = vsel %vm434_vm1, %v925_v57, %v924_v4  ;;  %4875 = vmatprep.subr.bf16.mxu0 %v5437_v58  ;;  %v1029_v52 = vpack.c.bf16 %v1013_v31, %v1013_v31  ;;  %v5456_v54 = vld [vmem:[#allocation22 + $0x88] sm:$0xff]   ;;  %v5457_v17 = vld [vmem:[#allocation22 + $0xc0] sm:$0xff]   ;;  %v5462_v21 = vld [vmem:[#allocation22 + $0x1f8] sm:$0xff]  }
 0x280   :  { %v928_v23 = vsel %vm436_vm2, %v927_v6, %v926_v18  ;;  %v5467_v16 = vld [vmem:[#allocation22 + $0x128] sm:$0xff]   ;;  %v5469_v34 = vld [vmem:[#allocation22 + $0x160] sm:$0xff]   ;;  %v5473_v61 = vld [vmem:[#allocation22 + $0x158] sm:$0xff]  }
 0x281   :  { %v930_v25 = vsel %vm438_vm3, %v929_v19, %v928_v23  ;;  %v5459_v55 = vld [vmem:[#allocation22 + $0x80] sm:$0xff]   ;;  %v1015_v62 = vld [vmem:[#allocation9 + $0x38] sm:$0xff]  ;;  %v5464_v37 = vld [vmem:[#allocation22 + $0x1b8] sm:$0xff]  }
 0x282   :  { %v932_v28 = vsel %vm440_vm4, %v931_v24, %v930_v25  ;;  %4876 = vmatpush3.bf16.msra.mxu0 %v5439_v10  ;;  %v1010_v20 = vld [vmem:[#allocation9 + $0x10] sm:$0xff]  ;;  %v5475_v5 = vld [vmem:[#allocation22 + $0x118] sm:$0xff]   ;;  %v5466_v58 = vld [vmem:[#allocation22 + $0x1f0] sm:$0xff]   ;;  %v1031_v9 = vpack.c.bf16 %v1015_v62, %v1015_v62 }
 0x283   :  { %v934_v60 = vsel %vm442_vm5, %v933_v26, %v932_v28  ;;  %4877 = vmatprep.subr.bf16.mxu0 %v5441_v22  ;;  %v5471_v35 = vld [vmem:[#allocation22 + $0x120] sm:$0xff]   ;;  %v1026_v36 = vpack.c.bf16 %v1010_v20, %v1010_v20  ;;  %v5477_v7 = vld [vmem:[#allocation22 + $0x150] sm:$0xff]   ;;  %v5470_v57 = vld [vmem:[#allocation22 + $0x1e8] sm:$0xff]  }
 0x284   :  { %v936_v1 = vsel %vm444_vm6, %v935_v29, %v934_v60  ;;  %v5468_v11 = vld [vmem:[#allocation22 + $0x1b0] sm:$0xff]   ;;  %v5481_v2 = vld [vmem:[#allocation22 + $0x148] sm:$0xff]   ;;  %v5474_v10 = vld [vmem:[#allocation22 + $0x1e0] sm:$0xff]  }
 0x285   :  { %5359 = vmatmul.mubr.f32.vlgmr.msra.gmra.mxu1 %v936_v1  ;;  %v5479_v56 = vld [vmem:[#allocation22 + $0x110] sm:$0xff]   ;;  %v5472_v4 = vld [vmem:[#allocation22 + $0x1a8] sm:$0xff]   ;;  %v5485_v18 = vld [vmem:[#allocation22 + $0x140] sm:$0xff]  }
 0x286   :  { %4892 = vmatpush3.bf16.msra.mxu1 %v5432_v30  ;;  %4878 = vmatpush3.bf16.msra.mxu0 %v5443_v59  ;;  %v5483_v6 = vld [vmem:[#allocation22 + $0x108] sm:$0xff]   ;;  %v5476_v19 = vld [vmem:[#allocation22 + $0x1a0] sm:$0xff]   ;;  %v1012_v23 = vld [vmem:[#allocation9 + $0x20] sm:$0xff] }
 0x287   :  { %4893 = vmatprep.subr.bf16.mxu1 %v5434_v63  ;;  %4879 = vmatprep.subr.bf16.mxu0 %v5445_v0  ;;  %v5487_v22 = vld [vmem:[#allocation22 + $0x100] sm:$0xff]   ;;  %v5478_v24 = vld [vmem:[#allocation22 + $0x1d8] sm:$0xff]   ;;  %v1028_v26 = vpack.c.bf16 %v1012_v23, %v1012_v23  ;;  %v5482_v30 = vld [vmem:[#allocation22 + $0x1d0] sm:$0xff]  }
 0x288   :  { %2143 = vmatprep.mubr.bf16.mxu1 %v1027_v8  ;;  %v5490_v25 = vld [vmem:[#allocation22 + $0x278] sm:$0xff]   ;;  %v5493_v59 = vld [vmem:[#allocation22 + $0x270] sm:$0xff]   ;;  %v5486_v1 = vld [vmem:[#allocation22 + $0x1c8] sm:$0xff]  }
 0x289   :  { %v1017_v27 = vld [vmem:[#allocation9 + $0x48] sm:$0xff]  ;;  %v5484_v63 = vld [vmem:[#allocation22 + $0x190] sm:$0xff]   ;;  %v5497_v8 = vld [vmem:[#allocation22 + $0x268] sm:$0xff]  }
 0x28a   :  { %4894 = vmatpush3.bf16.msra.mxu1 %v5436_v38  ;;  %4880 = vmatpush3.bf16.msra.mxu0 %v5447_v3  ;;  %v5480_v28 = vld [vmem:[#allocation22 + $0x198] sm:$0xff]   ;;  %v1033_v60 = vpack.c.bf16 %v1017_v27, %v1017_v27  ;;  %v5495_v0 = vld [vmem:[#allocation22 + $0x230] sm:$0xff]   ;;  %v5488_v38 = vld [vmem:[#allocation22 + $0x188] sm:$0xff]  }
 0x28b   :  { %4895 = vmatprep.subr.bf16.mxu1 %v5438_v39  ;;  %4881 = vmatprep.subr.bf16.mxu0 %v5449_v40  ;;  %v5492_v29 = vld [vmem:[#allocation22 + $0x238] sm:$0xff]   ;;  %v5499_v3 = vld [vmem:[#allocation22 + $0x228] sm:$0xff]   ;;  %v5489_v39 = vld [vmem:[#allocation22 + $0x1c0] sm:$0xff]  }
 0x28c   :  { %v5501_v40 = vld [vmem:[#allocation22 + $0x260] sm:$0xff]   ;;  %v1019_v47 = vld [vmem:[#allocation9 + $0x58] sm:$0xff] }
 0x28d   :  { %v5509_v31 = vld [vmem:[#allocation22 + $0x250] sm:$0xff]  }
 0x28e   :  { %4896 = vmatpush3.bf16.msra.mxu1 %v5440_v41  ;;  %4882 = vmatpush3.bf16.msra.mxu0 %v5451_v42  ;;  %v5491_v41 = vld [vmem:[#allocation22 + $0x180] sm:$0xff]   ;;  %v5525_v62 = vld [vmem:[#allocation22 + $0x370] sm:$0xff]  }
 0x28f   :  { %4897 = vmatprep.subr.bf16.mxu1 %v5442_v43  ;;  %4883 = vmatprep.subr.bf16.mxu0 %v5453_v44  ;;  %v1014_v42 = vld [vmem:[#allocation9 + $0x30] sm:$0xff]  ;;  %v5494_v44 = vld [vmem:[#allocation22 + $0x2f8] sm:$0xff]   ;;  %v1023_v23 = vld [vmem:[#allocation9 + $0x78] sm:$0xff] }
 0x290   :  { %v5503_v43 = vld [vmem:[#allocation22 + $0x220] sm:$0xff]   ;;  %v5541_v27 = vld [vmem:[#allocation22 + $0x350] sm:$0xff]  }
 0x292   :  { %4898 = vmatpush3.bf16.msra.mxu1 %v5444_v45  ;;  %4884 = vmatpush3.bf16.msra.mxu0 %v5455_v46  ;;  %v5505_v45 = vld [vmem:[#allocation22 + $0x258] sm:$0xff]   ;;  %v1030_v46 = vpack.c.bf16 %v1014_v42, %v1014_v42 }
 0x293   :  { %4899 = vmatprep.subr.bf16.mxu1 %v5446_v48  ;;  %4913 = vmatprep.subr.bf16.mxu0 %v5458_v49  ;;  %v5496_v48 = vld [vmem:[#allocation22 + $0x2b8] sm:$0xff]  }
 0x294   :  { %v5507_v49 = vld [vmem:[#allocation22 + $0x218] sm:$0xff]  }
 0x295   :  { %2104 = vmatmul.mubr.bf16.vlgmr.msra.gmra.mxu0 %v1024_v50  ;;  %v5498_v50 = vld [vmem:[#allocation22 + $0x2f0] sm:$0xff]  }
 0x296   :  { %4900 = vmatpush3.bf16.msra.mxu1 %v5448_v51  ;;  %4914 = vmatpush3.bf16.msra.mxu0 %v5460_v12  ;;  %v1035_v51 = vpack.c.bf16 %v1019_v47, %v1019_v47  ;;  %v5500_v12 = vld [vmem:[#allocation22 + $0x2b0] sm:$0xff]  }
 0x297   :  { %4901 = vmatprep.subr.bf16.mxu1 %v5450_v13  ;;  %4915 = vmatprep.subr.bf16.mxu0 %v5461_v32  ;;  %v5511_v13 = vld [vmem:[#allocation22 + $0x210] sm:$0xff]   ;;  %v5502_v32 = vld [vmem:[#allocation22 + $0x2e8] sm:$0xff]  }
 0x298   :  { %2183 = vmatprep.mubr.bf16.mxu0 %v1029_v52  ;;  %v5513_v52 = vld [vmem:[#allocation22 + $0x248] sm:$0xff]   ;;  %v5557_v47 = vld [vmem:[#allocation24 + $0x70] sm:$0xff]  }
 0x29a   :  { %4902 = vmatpush3.bf16.msra.mxu1 %v5452_v33  ;;  %4916 = vmatpush3.bf16.msra.mxu0 %v5463_v14  ;;  %v5504_v33 = vld [vmem:[#allocation22 + $0x2a8] sm:$0xff]  }
 0x29b   :  { %4903 = vmatprep.subr.bf16.mxu1 %v5454_v53  ;;  %4917 = vmatprep.subr.bf16.mxu0 %v5465_v15  ;;  %v5515_v14 = vld [vmem:[#allocation22 + $0x208] sm:$0xff]   ;;  %v5506_v53 = vld [vmem:[#allocation22 + $0x2e0] sm:$0xff]  }
 0x29c   :  { %v5517_v15 = vld [vmem:[#allocation22 + $0x240] sm:$0xff]  }
 0x29e   :  { %4904 = vmatpush3.bf16.msra.mxu1 %v5456_v54  ;;  %4918 = vmatpush3.bf16.msra.mxu0 %v5467_v16  ;;  %v5508_v54 = vld [vmem:[#allocation22 + $0x2a0] sm:$0xff]  }
 0x29f   :  { %4905 = vmatprep.subr.bf16.mxu1 %v5457_v17  ;;  %4919 = vmatprep.subr.bf16.mxu0 %v5469_v34  ;;  %v5519_v16 = vld [vmem:[#allocation22 + $0x200] sm:$0xff]   ;;  %v1016_v17 = vld [vmem:[#allocation9 + $0x40] sm:$0xff] }
 0x2a0   :  { %v5510_v34 = vld [vmem:[#allocation22 + $0x2d8] sm:$0xff]   ;;  %v1032_v20 = vpack.c.bf16 %v1016_v17, %v1016_v17  ;;  %v2394_v17 = vld [vmem:[#allocation10 + $0x18] sm:$0xff] }
 0x2a2   :  { %4906 = vmatpush3.bf16.msra.mxu1 %v5459_v55  ;;  %4920 = vmatpush3.bf16.msra.mxu0 %v5471_v35  ;;  %v5522_v55 = vld [vmem:[#allocation22 + $0x378] sm:$0xff]  }
 0x2a3   :  { %4935 = vmatprep.subr.bf16.mxu1 %v5462_v21  ;;  %4921 = vmatprep.subr.bf16.mxu0 %v5473_v61  ;;  %v1021_v35 = vld [vmem:[#allocation9 + $0x68] sm:$0xff] }
 0x2a4   :  { %v5512_v21 = vld [vmem:[#allocation22 + $0x298] sm:$0xff]  }
 0x2a5   :  { %2144 = vmatmul.mubr.bf16.vlgmr.msra.gmra.mxu1 %v1026_v36  ;;  %v5524_v61 = vld [vmem:[#allocation22 + $0x338] sm:$0xff]   ;;  %v5514_v36 = vld [vmem:[#allocation22 + $0x2d0] sm:$0xff]  }
 0x2a6   :  { %4936 = vmatpush3.bf16.msra.mxu1 %v5464_v37  ;;  %4922 = vmatpush3.bf16.msra.mxu0 %v5475_v5  ;;  %v1037_v37 = vpack.c.bf16 %v1021_v35, %v1021_v35  ;;  %v5516_v5 = vld [vmem:[#allocation22 + $0x290] sm:$0xff]  }
 0x2a7   :  { %4937 = vmatprep.subr.bf16.mxu1 %v5466_v58  ;;  %4923 = vmatprep.subr.bf16.mxu0 %v5477_v7  ;;  %v5527_v58 = vld [vmem:[#allocation22 + $0x330] sm:$0xff]   ;;  %v5518_v7 = vld [vmem:[#allocation22 + $0x2c8] sm:$0xff]  }
 0x2a8   :  { %2223 = vmatprep.mubr.bf16.mxu1 %v1031_v9  ;;  %v5529_v9 = vld [vmem:[#allocation22 + $0x368] sm:$0xff]   ;;  %v5573_v35 = vld [vmem:[#allocation24 + $0x50] sm:$0xff]  }
 0x2aa   :  { %4938 = vmatpush3.bf16.msra.mxu1 %v5468_v11  ;;  %4924 = vmatpush3.bf16.msra.mxu0 %v5479_v56  ;;  %v5520_v11 = vld [vmem:[#allocation22 + $0x288] sm:$0xff]  }
 0x2ab   :  { %4939 = vmatprep.subr.bf16.mxu1 %v5470_v57  ;;  %4925 = vmatprep.subr.bf16.mxu0 %v5481_v2  ;;  %v5531_v56 = vld [vmem:[#allocation22 + $0x328] sm:$0xff]   ;;  %v5521_v57 = vld [vmem:[#allocation22 + $0x2c0] sm:$0xff]  }
 0x2ac   :  { %v5533_v2 = vld [vmem:[#allocation22 + $0x360] sm:$0xff]  }
 0x2ae   :  { %4940 = vmatpush3.bf16.msra.mxu1 %v5472_v4  ;;  %4926 = vmatpush3.bf16.msra.mxu0 %v5483_v6  ;;  %v5523_v4 = vld [vmem:[#allocation22 + $0x280] sm:$0xff]  }
 0x2af   :  { %4941 = vmatprep.subr.bf16.mxu1 %v5474_v10  ;;  %4927 = vmatprep.subr.bf16.mxu0 %v5485_v18  ;;  %v1018_v6 = vld [vmem:[#allocation9 + $0x50] sm:$0xff]  ;;  %v5526_v18 = vld [vmem:[#allocation22 + $0x3f8] sm:$0xff]  }
 0x2b0   :  { %v5535_v10 = vld [vmem:[#allocation22 + $0x320] sm:$0xff]  }
 0x2b2   :  { %4942 = vmatpush3.bf16.msra.mxu1 %v5476_v19  ;;  %4928 = vmatpush3.bf16.msra.mxu0 %v5487_v22  ;;  %v5537_v19 = vld [vmem:[#allocation22 + $0x358] sm:$0xff]   ;;  %v1034_v22 = vpack.c.bf16 %v1018_v6, %v1018_v6 }
 0x2b3   :  { %4943 = vmatprep.subr.bf16.mxu1 %v5478_v24  ;;  %4957 = vmatprep.subr.bf16.mxu0 %v5490_v25  ;;  %v5528_v24 = vld [vmem:[#allocation22 + $0x3b8] sm:$0xff]  }
 0x2b4   :  { %v5539_v25 = vld [vmem:[#allocation22 + $0x318] sm:$0xff]  }
 0x2b5   :  { %2184 = vmatmul.mubr.bf16.vlgmr.msra.gmra.mxu0 %v1028_v26  ;;  %v5530_v26 = vld [vmem:[#allocation22 + $0x3f0] sm:$0xff]  }
 0x2b6   :  { %4944 = vmatpush3.bf16.msra.mxu1 %v5480_v28  ;;  %4958 = vmatpush3.bf16.msra.mxu0 %v5492_v29  ;;  %v1039_v28 = vpack.c.bf16 %v1023_v23, %v1023_v23  ;;  %v5532_v29 = vld [vmem:[#allocation22 + $0x3b0] sm:$0xff]  }
 0x2b7   :  { %4945 = vmatprep.subr.bf16.mxu1 %v5482_v30  ;;  %4959 = vmatprep.subr.bf16.mxu0 %v5493_v59  ;;  %v5543_v30 = vld [vmem:[#allocation22 + $0x310] sm:$0xff]   ;;  %v5534_v59 = vld [vmem:[#allocation22 + $0x3e8] sm:$0xff]  }
 0x2b8   :  { %2263 = vmatprep.mubr.bf16.mxu0 %v1033_v60  ;;  %v5545_v60 = vld [vmem:[#allocation22 + $0x348] sm:$0xff]   ;;  %v5589_v23 = vld [vmem:[#allocation24 + $0x170] sm:$0xff]  }
 0x2ba   :  { %4946 = vmatpush3.bf16.msra.mxu1 %v5484_v63  ;;  %4960 = vmatpush3.bf16.msra.mxu0 %v5495_v0  ;;  %v5536_v63 = vld [vmem:[#allocation22 + $0x3a8] sm:$0xff]  }
 0x2bb   :  { %4947 = vmatprep.subr.bf16.mxu1 %v5486_v1  ;;  %4961 = vmatprep.subr.bf16.mxu0 %v5497_v8  ;;  %v5547_v0 = vld [vmem:[#allocation22 + $0x308] sm:$0xff]   ;;  %v5538_v1 = vld [vmem:[#allocation22 + $0x3e0] sm:$0xff]  }
 0x2bc   :  { %v5549_v8 = vld [vmem:[#allocation22 + $0x340] sm:$0xff]  }
 0x2be   :  { %4948 = vmatpush3.bf16.msra.mxu1 %v5488_v38  ;;  %4962 = vmatpush3.bf16.msra.mxu0 %v5499_v3  ;;  %v5540_v38 = vld [vmem:[#allocation22 + $0x3a0] sm:$0xff]  }
 0x2bf   :  { %4949 = vmatprep.subr.bf16.mxu1 %v5489_v39  ;;  %4963 = vmatprep.subr.bf16.mxu0 %v5501_v40  ;;  %v5551_v3 = vld [vmem:[#allocation22 + $0x300] sm:$0xff]   ;;  %v1020_v39 = vld [vmem:[#allocation9 + $0x60] sm:$0xff] }
 0x2c0   :  { %v5542_v40 = vld [vmem:[#allocation22 + $0x3d8] sm:$0xff]   ;;  %v1036_v42 = vpack.c.bf16 %v1020_v39, %v1020_v39  ;;  %v2398_v39 = vld [vmem:[#allocation10 + $0x38] sm:$0xff] }
 0x2c2   :  { %4950 = vmatpush3.bf16.msra.mxu1 %v5491_v41  ;;  %4964 = vmatpush3.bf16.msra.mxu0 %v5503_v43  ;;  %v5554_v41 = vld [vmem:[#allocation24 + $0x78] sm:$0xff]  }
 0x2c3   :  { %4979 = vmatprep.subr.bf16.mxu1 %v5494_v44  ;;  %4965 = vmatprep.subr.bf16.mxu0 %v5505_v45  ;;  %v2392_v43 = vld [vmem:[#allocation10 + $0x8] sm:$0xff] }
 0x2c4   :  { %v5544_v44 = vld [vmem:[#allocation22 + $0x398] sm:$0xff]  }
 0x2c5   :  { %2224 = vmatmul.mubr.bf16.vlgmr.msra.gmra.mxu1 %v1030_v46  ;;  %v5556_v45 = vld [vmem:[#allocation24 + $0x38] sm:$0xff]   ;;  %v5546_v46 = vld [vmem:[#allocation22 + $0x3d0] sm:$0xff]  }
 0x2c6   :  { %4980 = vmatpush3.bf16.msra.mxu1 %v5496_v48  ;;  %4966 = vmatpush3.bf16.msra.mxu0 %v5507_v49  ;;  %v2408_v48 = vpack.c.bf16 %v2392_v43, %v2392_v43  ;;  %v5548_v49 = vld [vmem:[#allocation22 + $0x390] sm:$0xff]  }
 0x2c7   :  { %4981 = vmatprep.subr.bf16.mxu1 %v5498_v50  ;;  %4967 = vmatprep.subr.bf16.mxu0 %v5509_v31  ;;  %v5559_v50 = vld [vmem:[#allocation24 + $0x30] sm:$0xff]   ;;  %v5550_v31 = vld [vmem:[#allocation22 + $0x3c8] sm:$0xff]  }
 0x2c8   :  { %2303 = vmatprep.mubr.bf16.mxu1 %v1035_v51  ;;  %v5561_v51 = vld [vmem:[#allocation24 + $0x68] sm:$0xff]   ;;  %v5605_v43 = vld [vmem:[#allocation24 + $0x150] sm:$0xff]  }
 0x2ca   :  { %4982 = vmatpush3.bf16.msra.mxu1 %v5500_v12  ;;  %4968 = vmatpush3.bf16.msra.mxu0 %v5511_v13  ;;  %v5552_v12 = vld [vmem:[#allocation22 + $0x388] sm:$0xff]  }
 0x2cb   :  { %4983 = vmatprep.subr.bf16.mxu1 %v5502_v32  ;;  %4969 = vmatprep.subr.bf16.mxu0 %v5513_v52  ;;  %v5563_v13 = vld [vmem:[#allocation24 + $0x28] sm:$0xff]   ;;  %v5553_v32 = vld [vmem:[#allocation22 + $0x3c0] sm:$0xff]  }
 0x2cc   :  { %v5565_v52 = vld [vmem:[#allocation24 + $0x60] sm:$0xff]  }
 0x2ce   :  { %4984 = vmatpush3.bf16.msra.mxu1 %v5504_v33  ;;  %4970 = vmatpush3.bf16.msra.mxu0 %v5515_v14  ;;  %v5555_v33 = vld [vmem:[#allocation22 + $0x380] sm:$0xff]  }
 0x2cf   :  { %4985 = vmatprep.subr.bf16.mxu1 %v5506_v53  ;;  %4971 = vmatprep.subr.bf16.mxu0 %v5517_v15  ;;  %v1022_v14 = vld [vmem:[#allocation9 + $0x70] sm:$0xff]  ;;  %v5558_v15 = vld [vmem:[#allocation24 + $0xf8] sm:$0xff]  }
 0x2d0   :  { %v5567_v53 = vld [vmem:[#allocation24 + $0x20] sm:$0xff]  }
 0x2d2   :  { %4986 = vmatpush3.bf16.msra.mxu1 %v5508_v54  ;;  %4972 = vmatpush3.bf16.msra.mxu0 %v5519_v16  ;;  %v5569_v54 = vld [vmem:[#allocation24 + $0x58] sm:$0xff]   ;;  %v1038_v16 = vpack.c.bf16 %v1022_v14, %v1022_v14 }
 0x2d3   :  { %4987 = vmatprep.subr.bf16.mxu1 %v5510_v34  ;;  %5001 = vmatprep.subr.bf16.mxu0 %v5522_v55  ;;  %v5560_v34 = vld [vmem:[#allocation24 + $0xb8] sm:$0xff]  }
 0x2d4   :  { %v5571_v55 = vld [vmem:[#allocation24 + $0x18] sm:$0xff]  }
 0x2d5   :  { %2264 = vmatmul.mubr.bf16.vlgmr.msra.gmra.mxu0 %v1032_v20  ;;  %v5562_v20 = vld [vmem:[#allocation24 + $0xf0] sm:$0xff]  }
 0x2d6   :  { %4988 = vmatpush3.bf16.msra.mxu1 %v5512_v21  ;;  %5002 = vmatpush3.bf16.msra.mxu0 %v5524_v61  ;;  %v2410_v21 = vpack.c.bf16 %v2394_v17, %v2394_v17  ;;  %v5564_v61 = vld [vmem:[#allocation24 + $0xb0] sm:$0xff]  }
 0x2d7   :  { %4989 = vmatprep.subr.bf16.mxu1 %v5514_v36  ;;  %5003 = vmatprep.subr.bf16.mxu0 %v5525_v62  ;;  %v5575_v36 = vld [vmem:[#allocation24 + $0x10] sm:$0xff]   ;;  %v5566_v62 = vld [vmem:[#allocation24 + $0xe8] sm:$0xff]  }
 0x2d8   :  { %2343 = vmatprep.mubr.bf16.mxu0 %v1037_v37  ;;  %v5577_v37 = vld [vmem:[#allocation24 + $0x48] sm:$0xff]   ;;  %v5621_v17 = vld [vmem:[#allocation24 + $0x270] sm:$0xff]  }
 0x2da   :  { %4990 = vmatpush3.bf16.msra.mxu1 %v5516_v5  ;;  %5004 = vmatpush3.bf16.msra.mxu0 %v5527_v58  ;;  %v5568_v5 = vld [vmem:[#allocation24 + $0xa8] sm:$0xff]  }
 0x2db   :  { %4991 = vmatprep.subr.bf16.mxu1 %v5518_v7  ;;  %5005 = vmatprep.subr.bf16.mxu0 %v5529_v9  ;;  %v5579_v58 = vld [vmem:[#allocation24 + $0x8] sm:$0xff]   ;;  %v5570_v7 = vld [vmem:[#allocation24 + $0xe0] sm:$0xff]  }
 0x2dc   :  { %v5581_v9 = vld [vmem:[#allocation24 + $0x40] sm:$0xff]  }
 0x2de   :  { %4992 = vmatpush3.bf16.msra.mxu1 %v5520_v11  ;;  %5006 = vmatpush3.bf16.msra.mxu0 %v5531_v56  ;;  %v5572_v11 = vld [vmem:[#allocation24 + $0xa0] sm:$0xff]  }
 0x2df   :  { %4993 = vmatprep.subr.bf16.mxu1 %v5521_v57  ;;  %5007 = vmatprep.subr.bf16.mxu0 %v5533_v2  ;;  %v5583_v56 = vld [vmem:[#allocation24] sm:$0xff]   ;;  %v2391_v57 = vld [vmem:[#allocation10] sm:$0xff] }
 0x2e0   :  { %v5574_v2 = vld [vmem:[#allocation24 + $0xd8] sm:$0xff]   ;;  %v2407_v6 = vpack.c.bf16 %v2391_v57, %v2391_v57 }
 0x2e1   :  { %v5633_v57 = vld [vmem:[#allocation24 + $0x258] sm:$0xff]  }
 0x2e2   :  { %4994 = vmatpush3.bf16.msra.mxu1 %v5523_v4  ;;  %5008 = vmatpush3.bf16.msra.mxu0 %v5535_v10  ;;  %v5586_v4 = vld [vmem:[#allocation24 + $0x178] sm:$0xff]  }
 0x2e3   :  { %5023 = vmatprep.subr.bf16.mxu1 %v5526_v18  ;;  %5009 = vmatprep.subr.bf16.mxu0 %v5537_v19  ;;  %v2396_v10 = vld [vmem:[#allocation10 + $0x28] sm:$0xff] }
 0x2e4   :  { %v5576_v18 = vld [vmem:[#allocation24 + $0x98] sm:$0xff]  }
 0x2e5   :  { %2304 = vmatmul.mubr.bf16.vlgmr.msra.gmra.mxu1 %v1034_v22  ;;  %v5588_v19 = vld [vmem:[#allocation24 + $0x138] sm:$0xff]   ;;  %v5578_v22 = vld [vmem:[#allocation24 + $0xd0] sm:$0xff]  }
 0x2e6   :  { %5024 = vmatpush3.bf16.msra.mxu1 %v5528_v24  ;;  %5010 = vmatpush3.bf16.msra.mxu0 %v5539_v25  ;;  %v2412_v24 = vpack.c.bf16 %v2396_v10, %v2396_v10  ;;  %v5580_v25 = vld [vmem:[#allocation24 + $0x90] sm:$0xff]   ;;  %v5624_v10 = vld [vmem:[#allocation24 + $0x2b8] sm:$0xff]  }
 0x2e7   :  { %5025 = vmatprep.subr.bf16.mxu1 %v5530_v26  ;;  %5011 = vmatprep.subr.bf16.mxu0 %v5541_v27  ;;  %v5591_v26 = vld [vmem:[#allocation24 + $0x130] sm:$0xff]   ;;  %v5582_v27 = vld [vmem:[#allocation24 + $0xc8] sm:$0xff]  }
 0x2e8   :  { %2383 = vmatprep.mubr.bf16.mxu1 %v1039_v28  ;;  %v5593_v28 = vld [vmem:[#allocation24 + $0x168] sm:$0xff]  }
 0x2ea   :  { %5026 = vmatpush3.bf16.msra.mxu1 %v5532_v29  ;;  %5012 = vmatpush3.bf16.msra.mxu0 %v5543_v30  ;;  %v5584_v29 = vld [vmem:[#allocation24 + $0x88] sm:$0xff]  }
 0x2eb   :  { %5027 = vmatprep.subr.bf16.mxu1 %v5534_v59  ;;  %5013 = vmatprep.subr.bf16.mxu0 %v5545_v60  ;;  %v5595_v30 = vld [vmem:[#allocation24 + $0x128] sm:$0xff]   ;;  %v5585_v59 = vld [vmem:[#allocation24 + $0xc0] sm:$0xff]  }
 0x2ec   :  { %v5597_v60 = vld [vmem:[#allocation24 + $0x160] sm:$0xff]  }
 0x2ee   :  { %5028 = vmatpush3.bf16.msra.mxu1 %v5536_v63  ;;  %5014 = vmatpush3.bf16.msra.mxu0 %v5547_v0  ;;  %v5587_v63 = vld [vmem:[#allocation24 + $0x80] sm:$0xff]  }
 0x2ef   :  { %5029 = vmatprep.subr.bf16.mxu1 %v5538_v1  ;;  %5015 = vmatprep.subr.bf16.mxu0 %v5549_v8  ;;  %v2393_v0 = vld [vmem:[#allocation10 + $0x10] sm:$0xff]  ;;  %v5590_v8 = vld [vmem:[#allocation24 + $0x1f8] sm:$0xff]  }
 0x2f0   :  { %v5599_v1 = vld [vmem:[#allocation24 + $0x120] sm:$0xff]  }
 0x2f2   :  { %5030 = vmatpush3.bf16.msra.mxu1 %v5540_v38  ;;  %5016 = vmatpush3.bf16.msra.mxu0 %v5551_v3  ;;  %v5601_v38 = vld [vmem:[#allocation24 + $0x158] sm:$0xff]   ;;  %v2409_v3 = vpack.c.bf16 %v2393_v0, %v2393_v0  ;;  %v5632_v0 = vld [vmem:[#allocation24 + $0x2a8] sm:$0xff]  }
 0x2f3   :  { %5031 = vmatprep.subr.bf16.mxu1 %v5542_v40  ;;  %5045 = vmatprep.subr.bf16.mxu0 %v5554_v41  ;;  %v5592_v40 = vld [vmem:[#allocation24 + $0x1b8] sm:$0xff]  }
 0x2f4   :  { %v5603_v41 = vld [vmem:[#allocation24 + $0x118] sm:$0xff]  }
 0x2f5   :  { %2344 = vmatmul.mubr.bf16.vlgmr.msra.gmra.mxu0 %v1036_v42  ;;  %v5594_v42 = vld [vmem:[#allocation24 + $0x1f0] sm:$0xff]  }
 0x2f6   :  { %5032 = vmatpush3.bf16.msra.mxu1 %v5544_v44  ;;  %5046 = vmatpush3.bf16.msra.mxu0 %v5556_v45  ;;  %v2414_v44 = vpack.c.bf16 %v2398_v39, %v2398_v39  ;;  %v5596_v45 = vld [vmem:[#allocation24 + $0x1b0] sm:$0xff]   ;;  %v5636_v39 = vld [vmem:[#allocation24 + $0x2a0] sm:$0xff]  }
 0x2f7   :  { %5033 = vmatprep.subr.bf16.mxu1 %v5546_v46  ;;  %5047 = vmatprep.subr.bf16.mxu0 %v5557_v47  ;;  %v5607_v46 = vld [vmem:[#allocation24 + $0x110] sm:$0xff]   ;;  %v5598_v47 = vld [vmem:[#allocation24 + $0x1e8] sm:$0xff]  }
 0x2f8   :  { %3486 = vmatprep.mubr.bf16.mxu0 %v2408_v48  ;;  %v5609_v48 = vld [vmem:[#allocation24 + $0x148] sm:$0xff]  }
 0x2fa   :  { %5034 = vmatpush3.bf16.msra.mxu1 %v5548_v49  ;;  %5048 = vmatpush3.bf16.msra.mxu0 %v5559_v50  ;;  %v5600_v49 = vld [vmem:[#allocation24 + $0x1a8] sm:$0xff]  }
 0x2fb   :  { %5035 = vmatprep.subr.bf16.mxu1 %v5550_v31  ;;  %5049 = vmatprep.subr.bf16.mxu0 %v5561_v51  ;;  %v5611_v50 = vld [vmem:[#allocation24 + $0x108] sm:$0xff]   ;;  %v5602_v31 = vld [vmem:[#allocation24 + $0x1e0] sm:$0xff]  }
 0x2fc   :  { %v5613_v51 = vld [vmem:[#allocation24 + $0x140] sm:$0xff]  }
 0x2fe   :  { %5036 = vmatpush3.bf16.msra.mxu1 %v5552_v12  ;;  %5050 = vmatpush3.bf16.msra.mxu0 %v5563_v13  ;;  %v5604_v12 = vld [vmem:[#allocation24 + $0x1a0] sm:$0xff]  }
 0x2ff   :  { %5037 = vmatprep.subr.bf16.mxu1 %v5553_v32  ;;  %5051 = vmatprep.subr.bf16.mxu0 %v5565_v52  ;;  %v5615_v13 = vld [vmem:[#allocation24 + $0x100] sm:$0xff]   ;;  %v2395_v32 = vld [vmem:[#allocation10 + $0x20] sm:$0xff] }
 0x300   :  { %v5606_v52 = vld [vmem:[#allocation24 + $0x1d8] sm:$0xff]   ;;  %v2411_v14 = vpack.c.bf16 %v2395_v32, %v2395_v32  ;;  %v5655_v32 = vld [vmem:[#allocation24 + $0x330] sm:$0xff]  }
 0x302   :  { %5038 = vmatpush3.bf16.msra.mxu1 %v5555_v33  ;;  %5052 = vmatpush3.bf16.msra.mxu0 %v5567_v53  ;;  %v5618_v33 = vld [vmem:[#allocation24 + $0x278] sm:$0xff]  }
 0x303   :  { %5067 = vmatprep.subr.bf16.mxu1 %v5558_v15  ;;  %5053 = vmatprep.subr.bf16.mxu0 %v5569_v54  ;;  %v2400_v53 = vld [vmem:[#allocation10 + $0x48] sm:$0xff] }
 0x304   :  { %v5608_v15 = vld [vmem:[#allocation24 + $0x198] sm:$0xff]  }
 0x305   :  { %2384 = vmatmul.mubr.bf16.vlgmr.msra.gmra.mxu1 %v1038_v16  ;;  %v5620_v54 = vld [vmem:[#allocation24 + $0x238] sm:$0xff]   ;;  %v5610_v16 = vld [vmem:[#allocation24 + $0x1d0] sm:$0xff]  }
 0x306   :  { %5068 = vmatpush3.bf16.msra.mxu1 %v5560_v34  ;;  %5054 = vmatpush3.bf16.msra.mxu0 %v5571_v55  ;;  %v2416_v34 = vpack.c.bf16 %v2400_v53, %v2400_v53  ;;  %v5648_v53 = vld [vmem:[#allocation24 + $0x288] sm:$0xff]  }
 0x307   :  { %5069 = vmatprep.subr.bf16.mxu1 %v5562_v20  ;;  %5055 = vmatprep.subr.bf16.mxu0 %v5573_v35  ;;  %v5612_v20 = vld [vmem:[#allocation24 + $0x190] sm:$0xff]  }
 0x308   :  { %3526 = vmatprep.mubr.bf16.mxu1 %v2410_v21  ;;  %v5623_v35 = vld [vmem:[#allocation24 + $0x230] sm:$0xff]   ;;  %v5614_v21 = vld [vmem:[#allocation24 + $0x1c8] sm:$0xff]  }
 0x30a   :  { %5070 = vmatpush3.bf16.msra.mxu1 %v5564_v61  ;;  %5056 = vmatpush3.bf16.msra.mxu0 %v5575_v36  ;;  %v5625_v36 = vld [vmem:[#allocation24 + $0x268] sm:$0xff]  }
 0x30b   :  { %5071 = vmatprep.subr.bf16.mxu1 %v5566_v62  ;;  %5057 = vmatprep.subr.bf16.mxu0 %v5577_v37  ;;  %v5616_v62 = vld [vmem:[#allocation24 + $0x188] sm:$0xff]  }
 0x30c   :  { %v5627_v37 = vld [vmem:[#allocation24 + $0x228] sm:$0xff]  }
 0x30e   :  { %5072 = vmatpush3.bf16.msra.mxu1 %v5568_v5  ;;  %5058 = vmatpush3.bf16.msra.mxu0 %v5579_v58  ;;  %v5617_v5 = vld [vmem:[#allocation24 + $0x1c0] sm:$0xff]  }
 0x30f   :  { %5073 = vmatprep.subr.bf16.mxu1 %v5570_v7  ;;  %5059 = vmatprep.subr.bf16.mxu0 %v5581_v9  ;;  %v5629_v58 = vld [vmem:[#allocation24 + $0x260] sm:$0xff]  }
 0x310   :  { %v5619_v7 = vld [vmem:[#allocation24 + $0x180] sm:$0xff]  }
 0x311   :  { %v2397_v9 = vld [vmem:[#allocation10 + $0x30] sm:$0xff] }
 0x312   :  { %5074 = vmatpush3.bf16.msra.mxu1 %v5572_v11  ;;  %5060 = vmatpush3.bf16.msra.mxu0 %v5583_v56  ;;  %v5631_v11 = vld [vmem:[#allocation24 + $0x220] sm:$0xff]   ;;  %v5622_v56 = vld [vmem:[#allocation24 + $0x2f8] sm:$0xff]  }
 0x313   :  { %5075 = vmatprep.subr.bf16.mxu1 %v5574_v2  ;;  %5089 = vmatprep.subr.bf16.mxu0 %v5586_v4  ;;  %v2413_v2 = vpack.c.bf16 %v2397_v9, %v2397_v9  ;;  %v2402_v4 = vld [vmem:[#allocation10 + $0x58] sm:$0xff] }
 0x314   :  { %v5669_v9 = vld [vmem:[#allocation24 + $0x350] sm:$0xff]  }
 0x315   :  { %3487 = vmatmul.mubr.bf16.vlgmr.msra.gmra.mxu0 %v2407_v6  ;;  %v4571_v6 = vld [vmem:[#allocation16] ss:$0 sm:$0xff] }
 0x316   :  { %5076 = vmatpush3.bf16.msra.mxu1 %v5576_v18  ;;  %5090 = vmatpush3.bf16.msra.mxu0 %v5588_v19  ;;  %v5635_v18 = vld [vmem:[#allocation24 + $0x218] sm:$0xff]   ;;  %v4574_v19 = vld [vmem:[%s6828_s1] ss:$0 sm:$0xff] }
 0x317   :  { %5077 = vmatprep.subr.bf16.mxu1 %v5578_v22  ;;  %5091 = vmatprep.subr.bf16.mxu0 %v5589_v23  ;;  %v5626_v22 = vld [vmem:[#allocation24 + $0x2f0] sm:$0xff]  }
 0x318   :  { %3566 = vmatprep.mubr.bf16.mxu0 %v2412_v24  ;;  %v5637_v23 = vld [vmem:[#allocation24 + $0x250] sm:$0xff]   ;;  %v2418_v24 = vpack.c.bf16 %v2402_v4, %v2402_v4  ;;  %v5662_v4 = vld [vmem:[#allocation24 + $0x3e8] sm:$0xff]  }
 0x31a   :  { %5078 = vmatpush3.bf16.msra.mxu1 %v5580_v25  ;;  %5092 = vmatpush3.bf16.msra.mxu0 %v5591_v26 }
 0x31b   :  { %5079 = vmatprep.subr.bf16.mxu1 %v5582_v27  ;;  %5093 = vmatprep.subr.bf16.mxu0 %v5593_v28  ;;  %v5628_v28 = vld [vmem:[#allocation24 + $0x2b0] sm:$0xff]  }
 0x31e   :  { %5080 = vmatpush3.bf16.msra.mxu1 %v5584_v29  ;;  %5094 = vmatpush3.bf16.msra.mxu0 %v5595_v30  ;;  %v5630_v30 = vld [vmem:[#allocation24 + $0x2e8] sm:$0xff]  }
 0x31f   :  { %5081 = vmatprep.subr.bf16.mxu1 %v5585_v59  ;;  %5095 = vmatprep.subr.bf16.mxu0 %v5597_v60  ;;  %v5639_v59 = vld [vmem:[#allocation24 + $0x210] sm:$0xff]  }
 0x322   :  { %5082 = vmatpush3.bf16.msra.mxu1 %v5587_v63  ;;  %5096 = vmatpush3.bf16.msra.mxu0 %v5599_v1  ;;  %v5641_v63 = vld [vmem:[#allocation24 + $0x248] sm:$0xff]   ;;  %v5634_v1 = vld [vmem:[#allocation24 + $0x2e0] sm:$0xff]  }
 0x323   :  { %5111 = vmatprep.subr.bf16.mxu1 %v5590_v8  ;;  %5097 = vmatprep.subr.bf16.mxu0 %v5601_v38  ;;  %v5643_v8 = vld [vmem:[#allocation24 + $0x208] sm:$0xff]  }
 0x325   :  { %3527 = vmatmul.mubr.bf16.vlgmr.msra.gmra.mxu1 %v2409_v3  ;;  %v5645_v3 = vld [vmem:[#allocation24 + $0x240] sm:$0xff]  }
 0x326   :  { %5112 = vmatpush3.bf16.msra.mxu1 %v5592_v40  ;;  %5098 = vmatpush3.bf16.msra.mxu0 %v5603_v41  ;;  %v5638_v40 = vld [vmem:[#allocation24 + $0x2d8] sm:$0xff]   ;;  %v5647_v41 = vld [vmem:[#allocation24 + $0x200] sm:$0xff]  }
 0x327   :  { %5113 = vmatprep.subr.bf16.mxu1 %v5594_v42  ;;  %5099 = vmatprep.subr.bf16.mxu0 %v5605_v43  ;;  %v2399_v42 = vld [vmem:[#allocation10 + $0x40] sm:$0xff] }
 0x328   :  { %3606 = vmatprep.mubr.bf16.mxu1 %v2414_v44  ;;  %v5650_v43 = vld [vmem:[#allocation24 + $0x378] sm:$0xff]  }
 0x329   :  { %v2404_v44 = vld [vmem:[#allocation10 + $0x68] sm:$0xff] }
 0x32a   :  { %5114 = vmatpush3.bf16.msra.mxu1 %v5596_v45  ;;  %5100 = vmatpush3.bf16.msra.mxu0 %v5607_v46  ;;  %v5640_v45 = vld [vmem:[#allocation24 + $0x298] sm:$0xff]   ;;  %v2415_v46 = vpack.c.bf16 %v2399_v42, %v2399_v42 }
 0x32b   :  { %5115 = vmatprep.subr.bf16.mxu1 %v5598_v47  ;;  %5101 = vmatprep.subr.bf16.mxu0 %v5609_v48  ;;  %v5642_v47 = vld [vmem:[#allocation24 + $0x2d0] sm:$0xff]   ;;  %v5652_v48 = vld [vmem:[#allocation24 + $0x338] sm:$0xff]  }
 0x32e   :  { %5116 = vmatpush3.bf16.msra.mxu1 %v5600_v49  ;;  %5102 = vmatpush3.bf16.msra.mxu0 %v5611_v50  ;;  %v5653_v49 = vld [vmem:[#allocation24 + $0x370] sm:$0xff]   ;;  %v2420_v50 = vpack.c.bf16 %v2404_v44, %v2404_v44 }
 0x32f   :  { %5117 = vmatprep.subr.bf16.mxu1 %v5602_v31  ;;  %5103 = vmatprep.subr.bf16.mxu0 %v5613_v51  ;;  %v5644_v51 = vld [vmem:[#allocation24 + $0x290] sm:$0xff]  }
 0x332   :  { %5118 = vmatpush3.bf16.msra.mxu1 %v5604_v12  ;;  %5104 = vmatpush3.bf16.msra.mxu0 %v5615_v13  ;;  %v5646_v12 = vld [vmem:[#allocation24 + $0x2c8] sm:$0xff]  }
 0x333   :  { %5119 = vmatprep.subr.bf16.mxu1 %v5606_v52  ;;  %5133 = vmatprep.subr.bf16.mxu0 %v5618_v33  ;;  %v5657_v33 = vld [vmem:[#allocation24 + $0x368] sm:$0xff]  }
 0x335   :  { %3567 = vmatmul.mubr.bf16.vlgmr.msra.gmra.mxu0 %v2411_v14  ;;  %v683_v55 = vpop.f32.mrf.mxu0 }
 0x336   :  { %5120 = vmatpush3.bf16.msra.mxu1 %v5608_v15  ;;  %5134 = vmatpush3.bf16.msra.mxu0 %v5620_v54  ;;  %v6694_v26 = vadd.f32 %v4571_v6, %v683_v55  ;;  %v5649_v15 = vld [vmem:[#allocation24 + $0x2c0] sm:$0xff]   ;;  %v5671_v6 = vld [vmem:[#allocation24 + $0x310] sm:$0xff]  }
 0x337   :  { %5121 = vmatprep.subr.bf16.mxu1 %v5610_v16  ;;  %v5325_v61 = vpop.f32.mrf.mxu0  ;;  %5135 = vmatprep.subr.bf16.mxu0 %v5621_v17  ;;  %v5659_v16 = vld [vmem:[#allocation24 + $0x328] sm:$0xff]   ;;  %v5661_v17 = vld [vmem:[#allocation24 + $0x360] sm:$0xff]  }
 0x338   :  { %3646 = vmatprep.mubr.bf16.mxu0 %v2416_v34  ;;  %v5651_v34 = vld [vmem:[#allocation24 + $0x280] sm:$0xff]   ;;  %v5665_v61 = vld [vmem:[#allocation24 + $0x358] sm:$0xff]  }
 0x339   :  { %v2401_v55 = vld [vmem:[#allocation10 + $0x50] sm:$0xff] }
 0x33a   :  { %5122 = vmatpush3.bf16.msra.mxu1 %v5612_v20  ;;  %5136 = vmatpush3.bf16.msra.mxu0 %v5623_v35  ;;  %v5654_v20 = vld [vmem:[#allocation24 + $0x3f8] sm:$0xff]   ;;  %v5663_v35 = vld [vmem:[#allocation24 + $0x320] sm:$0xff]  }
 0x33b   :  { %5123 = vmatprep.subr.bf16.mxu1 %v5614_v21  ;;  %5137 = vmatprep.subr.bf16.mxu0 %v5625_v36  ;;  %v2406_v21 = vld [vmem:[#allocation10 + $0x78] sm:$0xff]  ;;  %v2417_v36 = vpack.c.bf16 %v2401_v55, %v2401_v55  ;;  %v3800_v55 = vld [vmem:[#allocation25 + $0xa0] sm:$0xff] }
 0x33e   :  { %5124 = vmatpush3.bf16.msra.mxu1 %v5616_v62  ;;  %5138 = vmatpush3.bf16.msra.mxu0 %v5627_v37  ;;  %v5656_v62 = vld [vmem:[#allocation24 + $0x3b8] sm:$0xff]   ;;  %v2422_v37 = vpack.c.bf16 %v2406_v21, %v2406_v21  ;;  %v3798_v21 = vld [vmem:[#allocation25 + $0x90] sm:$0xff] }
 0x33f   :  { %5125 = vmatprep.subr.bf16.mxu1 %v5617_v5  ;;  %5139 = vmatprep.subr.bf16.mxu0 %v5629_v58  ;;  %v4575_v5 = vld [vmem:[%s6829_s2] ss:$0 sm:$0xff] }
 0x340   :  { %v5658_v58 = vld [vmem:[#allocation24 + $0x3f0] sm:$0xff]  }
 0x342   :  { %5126 = vmatpush3.bf16.msra.mxu1 %v5619_v7  ;;  %5140 = vmatpush3.bf16.msra.mxu0 %v5631_v11  ;;  %v5667_v7 = vld [vmem:[#allocation24 + $0x318] sm:$0xff]  }
 0x343   :  { %5155 = vmatprep.subr.bf16.mxu1 %v5622_v56  ;;  %5141 = vmatprep.subr.bf16.mxu0 %v5633_v57  ;;  %v5660_v57 = vld [vmem:[#allocation24 + $0x3b0] sm:$0xff]  }
 0x345   :  { %3607 = vmatmul.mubr.bf16.vlgmr.msra.gmra.mxu1 %v2413_v2  ;;  %v1004_v25 = vpop.f32.mrf.mxu1 }
 0x346   :  { %v6696_v27 = vadd.f32 %v4574_v19, %v1004_v25  ;;  %5156 = vmatpush3.bf16.msra.mxu1 %v5624_v10  ;;  %5142 = vmatpush3.bf16.msra.mxu0 %v5635_v18  ;;  %v5673_v18 = vld [vmem:[#allocation24 + $0x348] sm:$0xff]   ;;  %v5666_v25 = vld [vmem:[#allocation24 + $0x3e0] sm:$0xff]  }
 0x347   :  { %v5360_v29 = vpop.f32.mrf.mxu1  ;;  %5157 = vmatprep.subr.bf16.mxu1 %v5626_v22  ;;  %5143 = vmatprep.subr.bf16.mxu0 %v5637_v23  ;;  %v5664_v23 = vld [vmem:[#allocation24 + $0x3a8] sm:$0xff]  }
 0x348   :  { %v4100_v60 = vadd.f32 %v6696_v27, %v6694_v26  ;;  %3686 = vmatprep.mubr.bf16.mxu1 %v2418_v24  ;;  %v4408_v38 = vmul.f32 %v6696_v27, %v6696_v27  ;;  %v5677_v29 = vld [vmem:[#allocation24 + $0x340] sm:$0xff]  }
 0x34a   :  { %5158 = vmatpush3.bf16.msra.mxu1 %v5628_v28  ;;  %4101 = vadd.xlane.f32.xlu0 %v4100_v60  ;;  %v5675_v28 = vld [vmem:[#allocation24 + $0x308] sm:$0xff]   ;;  %v5679_v60 = vld [vmem:[#allocation24 + $0x300] sm:$0xff]  }
 0x34b   :  { %5159 = vmatprep.subr.bf16.mxu1 %v5630_v30  ;;  %5144 = vmatpush3.bf16.msra.mxu0 %v5639_v59  ;;  %v5668_v30 = vld [vmem:[#allocation24 + $0x3a0] sm:$0xff]   ;;  %v5670_v59 = vld [vmem:[#allocation24 + $0x3d8] sm:$0xff]  }
 0x34c   :  { %5145 = vmatprep.subr.bf16.mxu0 %v5641_v63  ;;  %v2403_v63 = vld [vmem:[#allocation10 + $0x60] sm:$0xff] }
 0x34e   :  { %5160 = vmatpush3.bf16.msra.mxu1 %v5632_v0  ;;  %4409 = vadd.xlane.f32.xlu0 %v4408_v38  ;;  %v5672_v0 = vld [vmem:[#allocation24 + $0x398] sm:$0xff]  }
 0x34f   :  { %5161 = vmatprep.subr.bf16.mxu1 %v5634_v1  ;;  %5146 = vmatpush3.bf16.msra.mxu0 %v5643_v8  ;;  %v2419_v1 = vpack.c.bf16 %v2403_v63, %v2403_v63  ;;  %v5674_v8 = vld [vmem:[#allocation24 + $0x3d0] sm:$0xff]  }
 0x350   :  { %5147 = vmatprep.subr.bf16.mxu0 %v5645_v3  ;;  %v5676_v3 = vld [vmem:[#allocation24 + $0x390] sm:$0xff]  }
 0x351   :  { %v3842_v63 = vld [vmem:[#allocation25 + $0x1f0] sm:$0xff] }
 0x352   :  { %5162 = vmatpush3.bf16.msra.mxu1 %v5636_v39  ;;  %v5678_v39 = vld [vmem:[#allocation24 + $0x3c8] sm:$0xff]  }
 0x353   :  { %5163 = vmatprep.subr.bf16.mxu1 %v5638_v40  ;;  %5148 = vmatpush3.bf16.msra.mxu0 %v5647_v41 }
 0x354   :  { %5177 = vmatprep.subr.bf16.mxu0 %v5650_v43  ;;  %v5680_v43 = vld [vmem:[#allocation24 + $0x388] sm:$0xff]  }
 0x355   :  { %v4885_v31 = vpop.f32.mrf.mxu0 }
 0x356   :  { %5164 = vmatpush3.bf16.msra.mxu1 %v5640_v45  ;;  %3647 = vmatmul.mubr.bf16.vlgmr.msra.gmra.mxu0 %v2415_v46  ;;  %v5681_v45 = vld [vmem:[#allocation24 + $0x3c0] sm:$0xff]  }
 0x357   :  { %5165 = vmatprep.subr.bf16.mxu1 %v5642_v47  ;;  %5178 = vmatpush3.bf16.msra.mxu0 %v5652_v48  ;;  %v4886_v13 = vpop.f32.mrf.mxu0  ;;  %v5682_v47 = vld [vmem:[#allocation24 + $0x380] sm:$0xff]  }
 0x358   :  { %v4887_v52 = vadd.f32 %v4886_v13, %v4885_v31  ;;  %5179 = vmatprep.subr.bf16.mxu0 %v5653_v49  ;;  %3726 = vmatprep.mubr.bf16.mxu0 %v2420_v50  ;;  %v2405_v48 = vld [vmem:[#allocation10 + $0x70] sm:$0xff]  ;;  %v3811_v13 = vld [vmem:[#allocation25 + $0xf8] sm:$0xff] }
 0x359   :  { %v4888_v14 = vpop.f32.mrf.mxu0  ;;  %v2421_v49 = vpack.c.bf16 %v2405_v48, %v2405_v48  ;;  %v3830_v48 = vld [vmem:[#allocation25 + $0x190] sm:$0xff] }
 0x35a   :  { %5166 = vmatpush3.bf16.msra.mxu1 %v5644_v51  ;;  %v2106_v56 = vadd.f32 %v4887_v52, %v4575_v5  ;;  %v3809_v52 = vld [vmem:[#allocation25 + $0xe8] sm:$0xff]  ;;  %v3807_v14 = vld [vmem:[#allocation25 + $0xd8] sm:$0xff] }
 0x35b   :  { %5167 = vmatprep.subr.bf16.mxu1 %v5646_v12  ;;  %5180 = vmatpush3.bf16.msra.mxu0 %v5655_v32  ;;  %v4889_v54 = vpop.f32.mrf.mxu0  ;;  %v3810_v32 = vld [vmem:[#allocation25 + $0xf0] sm:$0xff]  ;;  %v3795_v5 = vld [vmem:[#allocation25 + $0x78] sm:$0xff] }
 0x35c   :  { %5181 = vmatprep.subr.bf16.mxu0 %v5657_v33  ;;  %v3808_v33 = vld [vmem:[#allocation25 + $0xe0] sm:$0xff] }
 0x35d   :  { %v3804_v54 = vld [vmem:[#allocation25 + $0xc0] sm:$0xff] }
 0x35e   :  { %5168 = vmatpush3.bf16.msra.mxu1 %v5648_v53  ;;  %v3806_v53 = vld [vmem:[#allocation25 + $0xd0] sm:$0xff] }
 0x35f   :  { %5169 = vmatprep.subr.bf16.mxu1 %v5649_v15  ;;  %5182 = vmatpush3.bf16.msra.mxu0 %v5659_v16  ;;  %v3805_v15 = vld [vmem:[#allocation25 + $0xc8] sm:$0xff]  ;;  %v3803_v16 = vld [vmem:[#allocation25 + $0xb8] sm:$0xff] }
 0x360   :  { %5183 = vmatprep.subr.bf16.mxu0 %v5661_v17  ;;  %v3802_v17 = vld [vmem:[#allocation25 + $0xb0] sm:$0xff] }
 0x362   :  { %5170 = vmatpush3.bf16.msra.mxu1 %v5651_v34  ;;  %v3801_v34 = vld [vmem:[#allocation25 + $0xa8] sm:$0xff] }
 0x363   :  { %5199 = vmatprep.subr.bf16.mxu1 %v5654_v20  ;;  %5184 = vmatpush3.bf16.msra.mxu0 %v5663_v35  ;;  %v3799_v35 = vld [vmem:[#allocation25 + $0x98] sm:$0xff] }
 0x364   :  { %5185 = vmatprep.subr.bf16.mxu0 %v5665_v61 }
 0x365   :  { %v4907_v11 = vpop.f32.mrf.mxu1  ;;  %3687 = vmatmul.mubr.bf16.vlgmr.msra.gmra.mxu1 %v2417_v36  ;;  %v3797_v36 = vld [vmem:[#allocation25 + $0x88] sm:$0xff] }
 0x366   :  { %5200 = vmatpush3.bf16.msra.mxu1 %v5656_v62  ;;  %3766 = vmatprep.mubr.bf16.mxu1 %v2422_v37  ;;  %v3796_v62 = vld [vmem:[#allocation25 + $0x80] sm:$0xff] }
 0x367   :  { %v4908_v2 = vpop.f32.mrf.mxu1  ;;  %5201 = vmatprep.subr.bf16.mxu1 %v5658_v58  ;;  %5186 = vmatpush3.bf16.msra.mxu0 %v5667_v7  ;;  %v3794_v58 = vld [vmem:[#allocation25 + $0x70] sm:$0xff] }
 0x368   :  { %v4909_v10 = vadd.f32 %v4908_v2, %v4907_v11  ;;  %5187 = vmatprep.subr.bf16.mxu0 %v5669_v9  ;;  %v3793_v9 = vld [vmem:[#allocation25 + $0x68] sm:$0xff]  ;;  %v3792_v11 = vld [vmem:[#allocation25 + $0x60] sm:$0xff] }
 0x369   :  { %v4910_v19 = vpop.f32.mrf.mxu1  ;;  %v3789_v2 = vld [vmem:[#allocation25 + $0x48] sm:$0xff] }
 0x36a   :  { %v2146_v22 = vadd.f32 %v4909_v10, %v2106_v56  ;;  %5202 = vmatpush3.bf16.msra.mxu1 %v5660_v57  ;;  %v3791_v56 = vld [vmem:[#allocation25 + $0x58] sm:$0xff]  ;;  %v3790_v57 = vld [vmem:[#allocation25 + $0x50] sm:$0xff] }
 0x36b   :  { %v4911_v24 = vpop.f32.mrf.mxu1  ;;  %5203 = vmatprep.subr.bf16.mxu1 %v5662_v4  ;;  %5188 = vmatpush3.bf16.msra.mxu0 %v5671_v6  ;;  %v3788_v4 = vld [vmem:[#allocation25 + $0x40] sm:$0xff]  ;;  %v3787_v10 = vld [vmem:[#allocation25 + $0x38] sm:$0xff] }
 0x36c   :  { %5189 = vmatprep.subr.bf16.mxu0 %v5673_v18  ;;  %v3786_v18 = vld [vmem:[#allocation25 + $0x30] sm:$0xff] }
 0x36e   :  { %5204 = vmatpush3.bf16.msra.mxu1 %v5664_v23  ;;  %v3784_v23 = vld [vmem:[#allocation25 + $0x20] sm:$0xff] }
 0x36f   :  { %5205 = vmatprep.subr.bf16.mxu1 %v5666_v25  ;;  %5190 = vmatpush3.bf16.msra.mxu0 %v5675_v28  ;;  %v3783_v25 = vld [vmem:[#allocation25 + $0x18] sm:$0xff]  ;;  %v3782_v28 = vld [vmem:[#allocation25 + $0x10] sm:$0xff] }
 0x370   :  { %5191 = vmatprep.subr.bf16.mxu0 %v5677_v29 }
 0x372   :  { %5206 = vmatpush3.bf16.msra.mxu1 %v5668_v30  ;;  %v3781_v30 = vld [vmem:[#allocation25 + $0x8] sm:$0xff] }
 0x373   :  { %5207 = vmatprep.subr.bf16.mxu1 %v5670_v59  ;;  %5192 = vmatpush3.bf16.msra.mxu0 %v5679_v60  ;;  %v3780_v59 = vld [vmem:[#allocation25] sm:$0xff]  ;;  %v3843_v60 = vld [vmem:[#allocation25 + $0x1f8] sm:$0xff] }
 0x374   :  { %3856 = vmatprep.subr.mxu0 %v3811_v13 }
 0x375   :  { %v4929_v38 = vpop.f32.mrf.mxu0 }
 0x376   :  { %5208 = vmatpush3.bf16.msra.mxu1 %v5672_v0  ;;  %3727 = vmatmul.mubr.bf16.vlgmr.msra.gmra.mxu0 %v2419_v1  ;;  %v3841_v0 = vld [vmem:[#allocation25 + $0x1e8] sm:$0xff]  ;;  %v3840_v1 = vld [vmem:[#allocation25 + $0x1e0] sm:$0xff] }
 0x377   :  { %5209 = vmatprep.subr.bf16.mxu1 %v5674_v8  ;;  %v4930_v40 = vpop.f32.mrf.mxu0  ;;  %3857 = vmatpush1.msra.mxu0 %v3810_v32  ;;  %v3839_v8 = vld [vmem:[#allocation25 + $0x1d8] sm:$0xff] }
 0x378   :  { %v4931_v41 = vadd.f32 %v4930_v40, %v4929_v38  ;;  %3858 = vmatprep.subr.mxu0 %v3809_v52  ;;  %v3838_v38 = vld [vmem:[#allocation25 + $0x1d0] sm:$0xff]  ;;  %v3835_v40 = vld [vmem:[#allocation25 + $0x1b8] sm:$0xff] }
 0x379   :  { %v4932_v42 = vpop.f32.mrf.mxu0  ;;  %3859 = vmatpush1.msra.mxu0 %v3808_v33  ;;  %v3827_v32 = vld [vmem:[#allocation25 + $0x178] sm:$0xff]  ;;  %v3826_v52 = vld [vmem:[#allocation25 + $0x170] sm:$0xff]  ;;  %v3825_v33 = vld [vmem:[#allocation25 + $0x168] sm:$0xff] }
 0x37a   :  { %5210 = vmatpush3.bf16.msra.mxu1 %v5676_v3  ;;  %v6703_v44 = vadd.f32 %v4931_v41, %v2146_v22  ;;  %3860 = vmatprep.subr.mxu0 %v3807_v14  ;;  %v3785_v22 = vld [vmem:[#allocation25 + $0x28] sm:$0xff]  ;;  %v3834_v41 = vld [vmem:[#allocation25 + $0x1b0] sm:$0xff] }
 0x37b   :  { %5211 = vmatprep.subr.bf16.mxu1 %v5678_v39  ;;  %v4933_v46 = vpop.f32.mrf.mxu0  ;;  %3861 = vmatpush1.msra.mxu0 %v3806_v53  ;;  %v3837_v3 = vld [vmem:[#allocation25 + $0x1c8] sm:$0xff]  ;;  %v3836_v39 = vld [vmem:[#allocation25 + $0x1c0] sm:$0xff] }
 0x37c   :  { %3862 = vmatprep.subr.mxu0 %v3805_v15  ;;  %v3824_v53 = vld [vmem:[#allocation25 + $0x160] sm:$0xff]  ;;  %v3823_v15 = vld [vmem:[#allocation25 + $0x158] sm:$0xff] }
 0x37d   :  { %3863 = vmatpush1.msra.mxu0 %v3804_v54 }
 0x37e   :  { %5212 = vmatpush3.bf16.msra.mxu1 %v5680_v43  ;;  %3864 = vmatprep.subr.mxu0 %v3803_v16  ;;  %v3833_v43 = vld [vmem:[#allocation25 + $0x1a8] sm:$0xff]  ;;  %v3822_v16 = vld [vmem:[#allocation25 + $0x150] sm:$0xff] }
 0x37f   :  { %5213 = vmatprep.subr.bf16.mxu1 %v5681_v45  ;;  %3865 = vmatpush1.msra.mxu0 %v3802_v17  ;;  %v3832_v45 = vld [vmem:[#allocation25 + $0x1a0] sm:$0xff]  ;;  %v3821_v17 = vld [vmem:[#allocation25 + $0x148] sm:$0xff] }
 0x380   :  { %3866 = vmatprep.subr.mxu0 %v3801_v34 }
 0x381   :  { %3867 = vmatpush1.msra.mxu0 %v3800_v55 }
 0x382   :  { %5214 = vmatpush3.bf16.msra.mxu1 %v5682_v47  ;;  %3868 = vmatprep.subr.mxu0 %v3799_v35  ;;  %v3831_v47 = vld [vmem:[#allocation25 + $0x198] sm:$0xff]  ;;  %v3820_v35 = vld [vmem:[#allocation25 + $0x140] sm:$0xff] }
 0x383   :  { %3869 = vmatpush1.msra.mxu0 %v3798_v21 }
 0x384   :  { %3870 = vmatprep.subr.mxu0 %v3797_v36  ;;  %v3819_v36 = vld [vmem:[#allocation25 + $0x138] sm:$0xff] }
 0x385   :  { %v6705_v50 = vpop.f32.mrf.mxu1  ;;  %3767 = vmatmul.mubr.bf16.vlgmr.msra.gmra.mxu1 %v2421_v49  ;;  %3871 = vmatpush1.msra.mxu0 %v3796_v62  ;;  %v3818_v62 = vld [vmem:[#allocation25 + $0x130] sm:$0xff] }
 0x386   :  { %3872 = vmatprep.subr.mxu0 %v3795_v5 }
 0x387   :  { %v6707_v31 = vpop.f32.mrf.mxu1  ;;  %3873 = vmatpush1.msra.mxu0 %v3794_v58  ;;  %v3816_v58 = vld [vmem:[#allocation25 + $0x120] sm:$0xff] }
 0x388   :  { %3874 = vmatprep.subr.mxu0 %v3793_v9  ;;  %v4953_v14 = vadd.f32 %v6707_v31, %v6705_v50  ;;  %v3815_v9 = vld [vmem:[#allocation25 + $0x118] sm:$0xff] }
 0x389   :  { %v4954_v51 = vpop.f32.mrf.mxu1  ;;  %3875 = vmatpush1.msra.mxu0 %v3792_v11 }
 0x38a   :  { %3876 = vmatprep.subr.mxu0 %v3791_v56  ;;  %v3829_v51 = vld [vmem:[#allocation25 + $0x188] sm:$0xff]  ;;  %v2226_v34 = vadd.f32 %v4953_v14, %v6703_v44  ;;  %v3814_v56 = vld [vmem:[#allocation25 + $0x110] sm:$0xff] }
 0x38b   :  { %v4955_v12 = vpop.f32.mrf.mxu1  ;;  %3877 = vmatpush1.msra.mxu0 %v3790_v57 }
 0x38c   :  { %3878 = vmatprep.subr.mxu0 %v3789_v2  ;;  %v3828_v12 = vld [vmem:[#allocation25 + $0x180] sm:$0xff]  ;;  %v3813_v2 = vld [vmem:[#allocation25 + $0x108] sm:$0xff] }
 0x38d   :  { %3879 = vmatpush1.msra.mxu0 %v3788_v4  ;;  %v3812_v4 = vld [vmem:[#allocation25 + $0x100] sm:$0xff] }
 0x38e   :  { %3880 = vmatprep.subr.mxu0 %v3787_v10 }
 0x38f   :  { %3881 = vmatpush1.msra.mxu0 %v3786_v18 }
 0x390   :  { %3882 = vmatprep.subr.mxu0 %v3785_v22 }
 0x391   :  { %3883 = vmatpush1.msra.mxu0 %v3784_v23 }
 0x392   :  { %3884 = vmatprep.subr.mxu0 %v3783_v25 }
 0x393   :  { %3885 = vmatpush1.msra.mxu0 %v3782_v28 }
 0x394   :  { %3886 = vmatprep.subr.mxu0 %v3781_v30 }
 0x395   :  { %v6709_v20 = vpop.f32.mrf.mxu0  ;;  %3887 = vmatpush1.msra.mxu0 %v3780_v59 }
 0x396   :  { %3888 = vmatprep.subr.mxu0 %v3843_v60 }
 0x397   :  { %v6711_v61 = vpop.f32.mrf.mxu0  ;;  %3889 = vmatpush2.msra.mxu0 %v3842_v63 }
 0x398   :  { %3890 = vmatprep.subr.mxu0 %v3841_v0  ;;  %v4975_v54 = vadd.f32 %v6711_v61, %v6709_v20 }
 0x399   :  { %v4976_v37 = vpop.f32.mrf.mxu0  ;;  %3891 = vmatpush2.msra.mxu0 %v3840_v1  ;;  %v4422_v1 = vmul.f32 %v6694_v26, %v6694_v26 }
 0x39a   :  { %3892 = vmatprep.subr.mxu0 %v3839_v8  ;;  %v2266_v50 = vadd.f32 %v4975_v54, %v2226_v34  ;;  %v3817_v37 = vld [vmem:[#allocation25 + $0x128] sm:$0xff]  ;;  %v4704_v8 = vld [vmem:[%s6830_s11] ss:$0 sm:$0xff] }
 0x39b   :  { %v4977_v7 = vpop.f32.mrf.mxu0  ;;  %3893 = vmatpush2.msra.mxu0 %v3838_v38 }
 0x39c   :  { %3894 = vmatprep.subr.mxu0 %v3837_v3 }
 0x39d   :  { %3895 = vmatpush2.msra.mxu0 %v3836_v39 }
 0x39e   :  { %3896 = vmatprep.subr.mxu0 %v3835_v40 }
 0x39f   :  { %3897 = vmatpush2.msra.mxu0 %v3834_v41 }
 0x3a0   :  { %3898 = vmatprep.subr.mxu0 %v3833_v43 }
 0x3a1   :  { %3899 = vmatpush2.msra.mxu0 %v3832_v45 }
 0x3a2   :  { %3900 = vmatprep.subr.mxu0 %v3831_v47 }
 0x3a3   :  { %3901 = vmatpush2.msra.mxu0 %v3830_v48 }
 0x3a4   :  { %3902 = vmatprep.subr.mxu0 %v3829_v51 }
 0x3a5   :  { %v6713_v6 = vpop.f32.mrf.mxu1  ;;  %3903 = vmatpush2.msra.mxu0 %v3828_v12 }
 0x3a6   :  { %3904 = vmatprep.subr.mxu0 %v3827_v32 }
 0x3a7   :  { %v6715_v19 = vpop.f32.mrf.mxu1  ;;  %3905 = vmatpush2.msra.mxu0 %v3826_v52 }
 0x3a8   :  { %3906 = vmatprep.subr.mxu0 %v3825_v33  ;;  %v4997_v55 = vadd.f32 %v6715_v19, %v6713_v6 }
 0x3a9   :  { %v4998_v24 = vpop.f32.mrf.mxu1  ;;  %3907 = vmatpush2.msra.mxu0 %v3824_v53 }
 0x3aa   :  { %3908 = vmatprep.subr.mxu0 %v3823_v15  ;;  %v2306_v20 = vadd.f32 %v4997_v55, %v2266_v50 }
 0x3ab   :  { %v4999_v29 = vpop.f32.mrf.mxu1  ;;  %3909 = vmatpush2.msra.mxu0 %v3822_v16 }
 0x3ac   :  { %3910 = vmatprep.subr.mxu0 %v3821_v17 }
 0x3ad   :  { %3911 = vmatpush2.msra.mxu0 %v3820_v35 }
 0x3ae   :  { %3912 = vmatprep.subr.mxu0 %v3819_v36 }
 0x3af   :  { %3913 = vmatpush2.msra.mxu0 %v3818_v62 }
 0x3b0   :  { %3914 = vmatprep.subr.mxu0 %v3817_v37 }
 0x3b1   :  { %3915 = vmatpush2.msra.mxu0 %v3816_v58 }
 0x3b2   :  { %3916 = vmatprep.subr.mxu0 %v3815_v9 }
 0x3b3   :  { %3917 = vmatpush2.msra.mxu0 %v3814_v56 }
 0x3b4   :  { %3918 = vmatprep.subr.mxu0 %v3813_v2 }
 0x3b5   :  { %v5017_v42 = vpop.f32.mrf.mxu0  ;;  %3919 = vmatpush2.msra.mxu0 %v3812_v4 }
 0x3b7   :  { %v5018_v46 = vpop.f32.mrf.mxu0 }
 0x3b8   :  { %v5019_v31 = vadd.f32 %v5018_v46, %v5017_v42 }
 0x3b9   :  { %v5020_v49 = vpop.f32.mrf.mxu0 }
 0x3ba   :  { %v2346_v5 = vadd.f32 %v5019_v31, %v2306_v20 }
 0x3bb   :  { %v5021_v13 = vpop.f32.mrf.mxu0 }
 0x3c5   :  { %v5039_v21 = vpop.f32.mrf.mxu1 }
 0x3c7   :  { %v5040_v61 = vpop.f32.mrf.mxu1 }
 0x3c8   :  { %v5041_v44 = vadd.f32 %v5040_v61, %v5039_v21 }
 0x3c9   :  { %v5042_v7 = vpop.f32.mrf.mxu1 }
 0x3ca   :  { %v6724_v11 = vadd.f32 %v5041_v44, %v2346_v5 }
 0x3cb   :  { %v5043_v57 = vpop.f32.mrf.mxu1 }
 0x3cc   :  { %v4401_v6 = vmul.f32 %v6724_v11, %v6724_v11 }
 0x3ce   :  { %4402 = vadd.xlane.f32.xlu0 %v4401_v6 }
 0x3d3   :  { %v4102_v10 = vpop.xlane.xlu0 %4101 }
 0x3d4   :  { %v4104_v18 = vmul.f32 0.00390625, %v4102_v10 }
 0x3d5   :  { %v5061_v19 = vpop.f32.mrf.mxu0 }
 0x3d6   :  { %v6729_v22 = vsub.f32 %v6696_v27, %v4104_v18  ;;  %v6732_v23 = vsub.f32 %v6694_v26, %v4104_v18 }
 0x3d7   :  { %v4410_v24 = vpop.xlane.xlu0 %4409  ;;  %v5062_v25 = vpop.f32.mrf.mxu0 }
 0x3d8   :  { %v4411_v28 = vmax.f32 %v4410_v24, 1e-24  ;;  %v4107_v29 = vmul.f32 %v6729_v22, %v6729_v22  ;;  %v4108_v30 = vmul.f32 %v6732_v23, %v6732_v23  ;;  %v5063_v59 = vadd.f32 %v5062_v25, %v5061_v19  ;;  %v4018_v19 = vld [vmem:[#allocation27 + $0xf8] sm:$0xff]  ;;  %v4017_v25 = vld [vmem:[#allocation27 + $0xf0] sm:$0xff] }
 0x3d9   :  { %v5064_v60 = vpop.f32.mrf.mxu0  ;;  %v4002_v24 = vld [vmem:[#allocation27 + $0x78] sm:$0xff]  ;;  %5221 = vmatprep.subr.mxu1 %v4018_v19 }
 0x3da   :  { %5687 = vrsqrt.f32 %v4411_v28  ;;  %v4109_v63 = vadd.f32 %v4108_v30, %v4107_v29  ;;  %v3489_v3 = vadd.f32 %v5063_v59, %v4704_v8  ;;  %v4001_v28 = vld [vmem:[#allocation27 + $0x70] sm:$0xff]  ;;  %5222 = vmatpush3.msra.mxu1 %v4002_v24  ;;  %v4016_v29 = vld [vmem:[#allocation27 + $0xe8] sm:$0xff]  ;;  %v4015_v59 = vld [vmem:[#allocation27 + $0xe0] sm:$0xff] }
 0x3db   :  { %v5065_v0 = vpop.f32.mrf.mxu0  ;;  %5223 = vmatprep.subr.mxu1 %v4017_v25  ;;  %v4000_v30 = vld [vmem:[#allocation27 + $0x68] sm:$0xff]  ;;  %v3999_v60 = vld [vmem:[#allocation27 + $0x60] sm:$0xff]  ;;  %v3997_v8 = vld [vmem:[#allocation27 + $0x50] sm:$0xff] }
 0x3dc   :  { %4110 = vadd.xlane.f32.xlu1 %v4109_v63  ;;  %5224 = vmatpush3.msra.mxu1 %v4001_v28  ;;  %v4014_v63 = vld [vmem:[#allocation27 + $0xd8] sm:$0xff] }
 0x3dd   :  { %5225 = vmatprep.subr.mxu1 %v4016_v29  ;;  %v3998_v0 = vld [vmem:[#allocation27 + $0x58] sm:$0xff] }
 0x3de   :  { %5226 = vmatpush3.msra.mxu1 %v4000_v30 }
 0x3df   :  { %5227 = vmatprep.subr.mxu1 %v4015_v59  ;;  %v3971_v59 = vld [vmem:[%s6835_s18] sm:$0x3] }
 0x3e0   :  { %4423 = vadd.xlane.f32.xlu1 %v4422_v1  ;;  %5228 = vmatpush3.msra.mxu1 %v3999_v60  ;;  %v4013_v1 = vld [vmem:[#allocation27 + $0xd0] sm:$0xff] }
 0x3e1   :  { %5229 = vmatprep.subr.mxu1 %v4014_v63  ;;  %v6768_v60 = vld [vmem:[%s6836_s14] sm:$0x3] }
 0x3e2   :  { %5230 = vmatpush3.msra.mxu1 %v3998_v0 }
 0x3e3   :  { %5231 = vmatprep.subr.mxu1 %v4013_v1 }
 0x3e4   :  { %5232 = vmatpush3.msra.mxu1 %v3997_v8 }
 0x3e5   :  { %v5083_v38 = vpop.f32.mrf.mxu1 }
 0x3e7   :  { %v5688_v39 = vpop.eup %5687  ;;  %v5084_v40 = vpop.f32.mrf.mxu1 }
 0x3e8   :  { %v5085_v41 = vadd.f32 %v5084_v40, %v5083_v38  ;;  %v4413_v42 = vmul.f32 %v5688_v39, %v6696_v27  ;;  %v4012_v38 = vld [vmem:[#allocation27 + $0xc8] sm:$0xff]  ;;  %v4011_v40 = vld [vmem:[#allocation27 + $0xc0] sm:$0xff] }
 0x3e9   :  { %v5086_v43 = vpop.f32.mrf.mxu1  ;;  %v3996_v39 = vld [vmem:[#allocation27 + $0x48] sm:$0xff]  ;;  %5233 = vmatprep.subr.mxu1 %v4012_v38 }
 0x3ea   :  { %v3529_v45 = vadd.f32 %v5085_v41, %v3489_v3  ;;  %4414 = vst [vmem:[#allocation32] sm:$0xff] %v4413_v42  ;;  %v3995_v42 = vld [vmem:[#allocation27 + $0x40] sm:$0xff]  ;;  %5234 = vmatpush3.msra.mxu1 %v3996_v39  ;;  %v4010_v43 = vld [vmem:[#allocation27 + $0xb8] sm:$0xff] }
 0x3eb   :  { %v5087_v46 = vpop.f32.mrf.mxu1  ;;  %5235 = vmatprep.subr.mxu1 %v4011_v40 }
 0x3ec   :  { %5236 = vmatpush3.msra.mxu1 %v3995_v42 }
 0x3ed   :  { %5237 = vmatprep.subr.mxu1 %v4010_v43  ;;  %v6780_v43 = vld [vmem:[%s6837_s22] sm:$0x3] }
 0x3f5   :  { %v5105_v47 = vpop.f32.mrf.mxu0 }
 0x3f7   :  { %v5106_v48 = vpop.f32.mrf.mxu0 }
 0x3f8   :  { %v5107_v49 = vadd.f32 %v5106_v48, %v5105_v47 }
 0x3f9   :  { %v5108_v51 = vpop.f32.mrf.mxu0 }
 0x3fa   :  { %v3569_v12 = vadd.f32 %v5107_v49, %v3529_v45  ;;  %v3994_v51 = vld [vmem:[#allocation27 + $0x38] sm:$0xff] }
 0x3fb   :  { %v5109_v13 = vpop.f32.mrf.mxu0  ;;  %5238 = vmatpush3.msra.mxu1 %v3994_v51 }
 0x3fc   :  { %v3993_v13 = vld [vmem:[#allocation27 + $0x30] sm:$0xff] }
 0x405   :  { %v5127_v32 = vpop.f32.mrf.mxu1 }
 0x407   :  { %v5128_v52 = vpop.f32.mrf.mxu1 }
 0x408   :  { %v5129_v36 = vadd.f32 %v5128_v52, %v5127_v32  ;;  %v4008_v32 = vld [vmem:[#allocation27 + $0xa8] sm:$0xff]  ;;  %v4007_v52 = vld [vmem:[#allocation27 + $0xa0] sm:$0xff] }
 0x409   :  { %v5130_v33 = vpop.f32.mrf.mxu1 }
 0x40a   :  { %v3609_v20 = vadd.f32 %v5129_v36, %v3569_v12  ;;  %v4009_v12 = vld [vmem:[#allocation27 + $0xb0] sm:$0xff]  ;;  %v3991_v33 = vld [vmem:[#allocation27 + $0x20] sm:$0xff] }
 0x40b   :  { %v5131_v14 = vpop.f32.mrf.mxu1  ;;  %5239 = vmatprep.subr.mxu1 %v4009_v12 }
 0x40c   :  { %5240 = vmatpush3.msra.mxu1 %v3993_v13  ;;  %v4006_v14 = vld [vmem:[#allocation27 + $0x98] sm:$0xff]  ;;  %v4173_v13 = vld [vmem:[#allocation28 + $0xf0] sm:$0xff] }
 0x40d   :  { %5241 = vmatprep.subr.mxu1 %v4008_v32  ;;  %v4172_v32 = vld [vmem:[#allocation28 + $0xe8] sm:$0xff] }
 0x416   :  { %v5149_v53 = vpop.f32.mrf.mxu0 }
 0x418   :  { %v5150_v15 = vpop.f32.mrf.mxu0 }
 0x419   :  { %v5151_v62 = vadd.f32 %v5150_v15, %v5149_v53  ;;  %v3990_v53 = vld [vmem:[#allocation27 + $0x18] sm:$0xff]  ;;  %v4005_v15 = vld [vmem:[#allocation27 + $0x90] sm:$0xff] }
 0x41a   :  { %v5152_v54 = vpop.f32.mrf.mxu0 }
 0x41b   :  { %v3649_v37 = vadd.f32 %v5151_v62, %v3609_v20  ;;  %v4004_v54 = vld [vmem:[#allocation27 + $0x88] sm:$0xff] }
 0x41c   :  { %v5153_v16 = vpop.f32.mrf.mxu0 }
 0x41d   :  { %v3988_v16 = vld [vmem:[#allocation27 + $0x8] sm:$0xff] }
 0x425   :  { %v5171_v17 = vpop.f32.mrf.mxu1 }
 0x427   :  { %v5172_v27 = vpop.f32.mrf.mxu1 }
 0x428   :  { %v5173_v61 = vadd.f32 %v5172_v27, %v5171_v17  ;;  %v4003_v17 = vld [vmem:[#allocation27 + $0x80] sm:$0xff] }
 0x429   :  { %v5174_v34 = vpop.f32.mrf.mxu1  ;;  %v3987_v27 = vld [vmem:[#allocation27] sm:$0xff] }
 0x42a   :  { %v3689_v58 = vadd.f32 %v5173_v61, %v3649_v37  ;;  %v4174_v34 = vld [vmem:[#allocation28 + $0xf8] sm:$0xff]  ;;  %v3846_v61 = vlaneseq }
 0x42b   :  { %v5175_v55 = vpop.f32.mrf.mxu1 }
 0x42c   :  { %v3847_v37 = vshrl.u32 %v3846_v61, 7  ;;  %v4151_v61 = vld [vmem:[#allocation28 + $0x40] sm:$0xff] }
 0x436   :  { %v5193_v35 = vpop.f32.mrf.mxu0 }
 0x438   :  { %v5194_v50 = vpop.f32.mrf.mxu0 }
 0x439   :  { %v5195_v5 = vadd.f32 %v5194_v50, %v5193_v35 }
 0x43a   :  { %v5196_v31 = vpop.f32.mrf.mxu0 }
 0x43b   :  { %v3729_v9 = vadd.f32 %v5195_v5, %v3689_v58  ;;  %v3844_v5 = vld [vmem:[%s6832_s15] sm:$0x3] }
 0x43c   :  { %v5197_v21 = vpop.f32.mrf.mxu0  ;;  %v3927_v58 = vld [vmem:[%s6833_s5] sm:$0x3] }
 0x43d   :  { %v3941_v21 = vld [vmem:[%s6831_s6] sm:$0x3] }
 0x43e   :  { %v3942_v36 = vadd.f32 1e-05, %v3941_v21  ;;  %v4155_v21 = vld [vmem:[#allocation28 + $0x60] sm:$0xff] }
 0x445   :  { %v5215_v44 = vpop.f32.mrf.mxu1 }
 0x447   :  { %v5216_v7 = vpop.f32.mrf.mxu1 }
 0x448   :  { %v5217_v56 = vadd.f32 %v5216_v7, %v5215_v44  ;;  %v6753_v44 = vsub.s32 0, %v3847_v37 }
 0x449   :  { %v5218_v57 = vpop.f32.mrf.mxu1 }
 0x44a   :  { %v6742_v2 = vadd.f32 %v5217_v56, %v3729_v9  ;;  %v3849_v7 = vrot.slane %v3844_v5, %v6753_v44  ;;  %v6757_v9 = vsub.s32 1, %v3847_v37  ;;  %v3932_v57 = vrot.slane %v3927_v58, %v6753_v44  ;;  %v4150_v37 = vld [vmem:[#allocation28 + $0x38] sm:$0xff] }
 0x44b   :  { %v5219_v4 = vpop.f32.mrf.mxu1  ;;  %v3976_v38 = vrot.slane %v3971_v59, %v6753_v44 }
 0x44c   :  { %3920 = vmatprep.mubr.f32.mxu0 %v6742_v2  ;;  %v4415_v6 = vmul.f32 %v6742_v2, %v6742_v2  ;;  %v3936_v19 = vrot.slane %v3927_v58, %v6757_v9  ;;  %v4148_v58 = vld [vmem:[#allocation28 + $0x28] sm:$0xff] }
 0x44d   :  { %3921 = vmatmul.mubr.f32.vlgmr.msra.gmra.mxu0 %v6724_v11 }
 0x44e   :  { %4416 = vadd.xlane.f32.xlu1 %v4415_v6  ;;  %v3957_v6 = vld [vmem:[%s6834_s16] sm:$0x3] }
 0x44f   :  { %v3962_v28 = vrot.slane %v3957_v6, %v6753_v44  ;;  %v3966_v8 = vrot.slane %v3957_v6, %v6757_v9  ;;  %v4206_v6 = vld [vmem:[#allocation28 + $0x1f8] sm:$0xff] }
 0x457   :  { %v4403_v10 = vpop.xlane.xlu0 %4402 }
 0x458   :  { %v4404_v18 = vmax.f32 %v4403_v10, 1e-24 }
 0x45a   :  { %5689 = vrsqrt.f32 %v4404_v18 }
 0x465   :  { %v4111_v3 = vpop.xlane.xlu1 %4110 }
 0x466   :  { %v4112_v62 = vmul.f32 0.00390625, %v4111_v3  ;;  %v4125_v3 = vrot.slane %v6768_v60, %v6757_v9 }
 0x467   :  { %v5690_v41 = vpop.eup %5689 }
 0x468   :  { %v4406_v45 = vmul.f32 %v5690_v41, %v6724_v11  ;;  %v3992_v11 = vld [vmem:[#allocation27 + $0x28] sm:$0xff]  ;;  %v4113_v20 = vadd.f32 1e-05, %v4112_v62  ;;  %v3980_v41 = vrot.slane %v3971_v59, %v6757_v9  ;;  %v4153_v62 = vld [vmem:[#allocation28 + $0x50] sm:$0xff] }
 0x469   :  { %v4424_v46 = vpop.xlane.xlu1 %4423  ;;  %5242 = vmatpush3.msra.mxu1 %v3992_v11  ;;  %v4197_v59 = vld [vmem:[#allocation28 + $0x1b0] sm:$0xff] }
 0x46a   :  { %v4425_v47 = vmax.f32 %v4424_v46, 1e-24  ;;  %4407 = vst [vmem:[#allocation31] sm:$0xff] %v4406_v45  ;;  %5243 = vmatprep.subr.mxu1 %v4007_v52  ;;  %v4171_v52 = vld [vmem:[#allocation28 + $0xe0] sm:$0xff] }
 0x46b   :  { %5244 = vmatpush3.msra.mxu1 %v3991_v33  ;;  %v4169_v33 = vld [vmem:[#allocation28 + $0xd0] sm:$0xff] }
 0x46c   :  { %5691 = vrsqrt.f32 %v4425_v47  ;;  %5245 = vmatprep.subr.mxu1 %v4006_v14  ;;  %v4168_v14 = vld [vmem:[#allocation28 + $0xc8] sm:$0xff] }
 0x46d   :  { %5246 = vmatpush3.msra.mxu1 %v3990_v53  ;;  %v4167_v53 = vld [vmem:[#allocation28 + $0xc0] sm:$0xff] }
 0x46e   :  { %5247 = vmatprep.subr.mxu1 %v4005_v15  ;;  %v4166_v15 = vld [vmem:[#allocation28 + $0xb8] sm:$0xff] }
 0x479   :  { %v5692_v48 = vpop.eup %5691 }
 0x47a   :  { %v4427_v49 = vmul.f32 %v5692_v48, %v6694_v26  ;;  %v3989_v26 = vld [vmem:[#allocation27 + $0x10] sm:$0xff] }
 0x47b   :  { %5248 = vmatpush3.msra.mxu1 %v3989_v26  ;;  %v4165_v26 = vld [vmem:[#allocation28 + $0xb0] sm:$0xff] }
 0x47c   :  { %4428 = vst [vmem:[#allocation35] sm:$0xff] %v4427_v49  ;;  %5249 = vmatprep.subr.mxu1 %v4004_v54  ;;  %v4138_v49 = vrot.slane %v6780_v43, %v6757_v9  ;;  %v4164_v54 = vld [vmem:[#allocation28 + $0xa8] sm:$0xff] }
 0x47d   :  { %5250 = vmatpush3.msra.mxu1 %v3988_v16  ;;  %v4163_v16 = vld [vmem:[#allocation28 + $0xa0] sm:$0xff] }
 0x47e   :  { %5251 = vmatprep.subr.mxu1 %v4003_v17  ;;  %v4162_v17 = vld [vmem:[#allocation28 + $0x98] sm:$0xff] }
 0x47f   :  { %5252 = vmatpush3.msra.mxu1 %v3987_v27  ;;  %v4161_v27 = vld [vmem:[#allocation28 + $0x90] sm:$0xff] }
 0x480   :  { %4219 = vmatprep.subr.mxu1 %v4174_v34  ;;  %v4160_v34 = vld [vmem:[#allocation28 + $0x88] sm:$0xff] }
 0x4d7   :  { %v4417_v55 = vpop.xlane.xlu1 %4416 }
 0x4d8   :  { %v4418_v35 = vmax.f32 %v4417_v55, 1e-24  ;;  %v4159_v55 = vld [vmem:[#allocation28 + $0x80] sm:$0xff] }
 0x4da   :  { %5693 = vrsqrt.f32 %v4418_v35  ;;  %v4158_v35 = vld [vmem:[#allocation28 + $0x78] sm:$0xff] }
 0x4db   :  { %5695 = vrsqrt.f32 %v3942_v36  ;;  %v4154_v36 = vld [vmem:[#allocation28 + $0x58] sm:$0xff] }
 0x4dc   :  { %5697 = vrsqrt.f32 %v4113_v20  ;;  %v4152_v20 = vld [vmem:[#allocation28 + $0x48] sm:$0xff] }
 0x4e7   :  { %v5694_v50 = vpop.eup %5693 }
 0x4e8   :  { %v4420_v31 = vmul.f32 %v5694_v50, %v6742_v2  ;;  %v5696_v56 = vpop.eup %5695  ;;  %v3853_v2 = vrot.slane %v3844_v5, %v6757_v9  ;;  %v4157_v50 = vld [vmem:[#allocation28 + $0x70] sm:$0xff] }
 0x4e9   :  { %v3948_v18 = vrot.slane %v5696_v56, %v6753_v44  ;;  %v3952_v30 = vrot.slane %v5696_v56, %v6757_v9  ;;  %v6770_v63 = vpop.eup %5697  ;;  %v4149_v5 = vld [vmem:[#allocation28 + $0x30] sm:$0xff]  ;;  %v4146_v56 = vld [vmem:[#allocation28 + $0x18] sm:$0xff] }
 0x4ea   :  { %4421 = vst [vmem:[#allocation34] sm:$0xff] %v4420_v31  ;;  %v4116_v42 = vmul.f32 %v6770_v63, %v6732_v23  ;;  %v4170_v23 = vld [vmem:[#allocation28 + $0xd8] sm:$0xff]  ;;  %v4156_v31 = vld [vmem:[#allocation28 + $0x68] sm:$0xff] }
 0x4ec   :  { %v4129_v48 = vmul.f32 %v4125_v3, %v4116_v42  ;;  %v4192_v3 = vld [vmem:[#allocation28 + $0x188] sm:$0xff] }
 0x4ed   :  { %v4188_v42 = vld [vmem:[#allocation28 + $0x168] sm:$0xff] }
 0x4ee   :  { %v4142_v11 = vadd.f32 %v4138_v49, %v4129_v48  ;;  %v4184_v48 = vld [vmem:[#allocation28 + $0x148] sm:$0xff]  ;;  %v4183_v49 = vld [vmem:[#allocation28 + $0x140] sm:$0xff] }
 0x50d   :  { %v3922_v4 = vpop.f32.mrf.mxu0 }
 0x50e   :  { %v3923_v10 = vadd.f32 %v3922_v4, %v3849_v7  ;;  %v4147_v7 = vld [vmem:[#allocation28 + $0x20] sm:$0xff] }
 0x50f   :  { %v3924_v24 = vpop.f32.mrf.mxu0  ;;  %v4143_v4 = vld [vmem:[#allocation28] sm:$0xff] }
 0x510   :  { %v3939_v25 = vsub.f32 %v3923_v10, %v3932_v57  ;;  %v3925_v29 = vadd.f32 %v3924_v24, %v3853_v2  ;;  %v4145_v57 = vld [vmem:[#allocation28 + $0x10] sm:$0xff]  ;;  %v4144_v2 = vld [vmem:[#allocation28 + $0x8] sm:$0xff]  ;;  %v4202_v24 = vld [vmem:[#allocation28 + $0x1d8] sm:$0xff] }
 0x511   :  { %v4205_v10 = vld [vmem:[#allocation28 + $0x1f0] sm:$0xff] }
 0x512   :  { %v3955_v0 = vmul.f32 %v3948_v18, %v3939_v25  ;;  %v3940_v1 = vsub.f32 %v3925_v29, %v3936_v19  ;;  %v4204_v18 = vld [vmem:[#allocation28 + $0x1e8] sm:$0xff]  ;;  %v4203_v19 = vld [vmem:[#allocation28 + $0x1e0] sm:$0xff]  ;;  %v4201_v25 = vld [vmem:[#allocation28 + $0x1d0] sm:$0xff] }
 0x513   :  { %v4199_v29 = vld [vmem:[#allocation28 + $0x1c0] sm:$0xff] }
 0x514   :  { %v3969_v39 = vmul.f32 %v3962_v28, %v3955_v0  ;;  %v3956_v40 = vmul.f32 %v3952_v30, %v3940_v1  ;;  %v4200_v28 = vld [vmem:[#allocation28 + $0x1c8] sm:$0xff]  ;;  %v4198_v30 = vld [vmem:[#allocation28 + $0x1b8] sm:$0xff]  ;;  %v4195_v1 = vld [vmem:[#allocation28 + $0x1a0] sm:$0xff] }
 0x515   :  { %v4196_v0 = vld [vmem:[#allocation28 + $0x1a8] sm:$0xff] }
 0x516   :  { %v3970_v45 = vmul.f32 %v3966_v8, %v3956_v40  ;;  %v3983_v46 = vadd.f32 %v3976_v38, %v3969_v39  ;;  %v4194_v8 = vld [vmem:[#allocation28 + $0x198] sm:$0xff]  ;;  %v4193_v38 = vld [vmem:[#allocation28 + $0x190] sm:$0xff]  ;;  %v4191_v39 = vld [vmem:[#allocation28 + $0x180] sm:$0xff] }
 0x517   :  { %v4190_v40 = vld [vmem:[#allocation28 + $0x178] sm:$0xff] }
 0x518   :  { %v3984_v47 = vadd.f32 %v3980_v41, %v3970_v45  ;;  %v3985_v12 = vmax.f32 %v3983_v46, 0.0  ;;  %v4189_v41 = vld [vmem:[#allocation28 + $0x170] sm:$0xff]  ;;  %v4187_v45 = vld [vmem:[#allocation28 + $0x160] sm:$0xff]  ;;  %v4186_v46 = vld [vmem:[#allocation28 + $0x158] sm:$0xff] }
 0x51a   :  { %v3986_v51 = vmax.f32 %v3984_v47, 0.0  ;;  %v4185_v47 = vld [vmem:[#allocation28 + $0x150] sm:$0xff] }
 0x51c   :  { %4090 = vmatprep.mubr.f32.mxu1 %v3986_v51  ;;  %v4182_v51 = vld [vmem:[#allocation28 + $0x138] sm:$0xff] }
 0x51d   :  { %4091 = vmatmul.mubr.f32.vlgmr.msra.gmra.mxu1 %v3985_v12  ;;  %v4121_v12 = vrot.slane %v6768_v60, %v6753_v44  ;;  %v4175_v60 = vld [vmem:[#allocation28 + $0x100] sm:$0xff] }
 0x51e   :  { %4220 = vmatpush1.msra.mxu1 %v4173_v13  ;;  %4283 = vmatprep.mubr.f32.mxu1 %v4142_v11  ;;  %v4181_v13 = vld [vmem:[#allocation28 + $0x130] sm:$0xff]  ;;  %v4180_v11 = vld [vmem:[#allocation28 + $0x128] sm:$0xff] }
 0x51f   :  { %4221 = vmatprep.subr.mxu1 %v4172_v32  ;;  %v4115_v32 = vmul.f32 %v6770_v63, %v6729_v22  ;;  %v4323_v22 = vld [vmem:[#allocation30 + $0xf8] sm:$0xff] }
 0x520   :  { %4222 = vmatpush1.msra.mxu1 %v4171_v52  ;;  %v4179_v52 = vld [vmem:[#allocation28 + $0x120] sm:$0xff]  ;;  %v4307_v63 = vld [vmem:[#allocation30 + $0x78] sm:$0xff]  ;;  %5256 = vmatprep.subr.mxu0 %v4323_v22 }
 0x521   :  { %4223 = vmatprep.subr.mxu1 %v4170_v23  ;;  %v4178_v23 = vld [vmem:[#allocation28 + $0x118] sm:$0xff]  ;;  %5257 = vmatpush3.msra.mxu0 %v4307_v63 }
 0x522   :  { %4224 = vmatpush1.msra.mxu1 %v4169_v33  ;;  %v4134_v33 = vrot.slane %v6780_v43, %v6753_v44  ;;  %v4305_v43 = vld [vmem:[#allocation30 + $0x68] sm:$0xff] }
 0x523   :  { %4225 = vmatprep.subr.mxu1 %v4168_v14  ;;  %v4177_v14 = vld [vmem:[#allocation28 + $0x110] sm:$0xff] }
 0x524   :  { %4226 = vmatpush1.msra.mxu1 %v4167_v53  ;;  %v4128_v53 = vmul.f32 %v4121_v12, %v4115_v32  ;;  %v4834_v32 = vld [vmem:[%s6840_s9] ss:$0 sm:$0xff] }
 0x525   :  { %4227 = vmatprep.subr.mxu1 %v4166_v15  ;;  %v4176_v15 = vld [vmem:[#allocation28 + $0x108] sm:$0xff] }
 0x526   :  { %4228 = vmatpush1.msra.mxu1 %v4165_v26  ;;  %v4141_v26 = vadd.f32 %v4134_v33, %v4128_v53 }
 0x527   :  { %4229 = vmatprep.subr.mxu1 %v4164_v54  ;;  %v4322_v54 = vld [vmem:[#allocation30 + $0xf0] sm:$0xff] }
 0x528   :  { %4230 = vmatpush1.msra.mxu1 %v4163_v16  ;;  %v4306_v16 = vld [vmem:[#allocation30 + $0x70] sm:$0xff]  ;;  %5258 = vmatprep.subr.mxu0 %v4322_v54 }
 0x529   :  { %4231 = vmatprep.subr.mxu1 %v4162_v17  ;;  %v4321_v17 = vld [vmem:[#allocation30 + $0xe8] sm:$0xff]  ;;  %5259 = vmatpush3.msra.mxu0 %v4306_v16 }
 0x52a   :  { %4232 = vmatpush1.msra.mxu1 %v4161_v27  ;;  %v4320_v27 = vld [vmem:[#allocation30 + $0xe0] sm:$0xff]  ;;  %5260 = vmatprep.subr.mxu0 %v4321_v17 }
 0x52b   :  { %4233 = vmatprep.subr.mxu1 %v4160_v34  ;;  %v4304_v34 = vld [vmem:[#allocation30 + $0x60] sm:$0xff]  ;;  %5261 = vmatpush3.msra.mxu0 %v4305_v43 }
 0x52c   :  { %4234 = vmatpush1.msra.mxu1 %v4159_v55  ;;  %v4319_v55 = vld [vmem:[#allocation30 + $0xd8] sm:$0xff]  ;;  %5262 = vmatprep.subr.mxu0 %v4320_v27 }
 0x52d   :  { %4235 = vmatprep.subr.mxu1 %v4158_v35  ;;  %v4303_v35 = vld [vmem:[#allocation30 + $0x58] sm:$0xff]  ;;  %5263 = vmatpush3.msra.mxu0 %v4304_v34 }
 0x52e   :  { %4236 = vmatpush1.msra.mxu1 %v4157_v50  ;;  %v4318_v50 = vld [vmem:[#allocation30 + $0xd0] sm:$0xff]  ;;  %5264 = vmatprep.subr.mxu0 %v4319_v55 }
 0x52f   :  { %4237 = vmatprep.subr.mxu1 %v4156_v31  ;;  %v4302_v31 = vld [vmem:[#allocation30 + $0x50] sm:$0xff]  ;;  %5265 = vmatpush3.msra.mxu0 %v4303_v35 }
 0x530   :  { %4238 = vmatpush1.msra.mxu1 %v4155_v21  ;;  %v4317_v21 = vld [vmem:[#allocation30 + $0xc8] sm:$0xff]  ;;  %5266 = vmatprep.subr.mxu0 %v4318_v50 }
 0x531   :  { %4239 = vmatprep.subr.mxu1 %v4154_v36  ;;  %v4301_v36 = vld [vmem:[#allocation30 + $0x48] sm:$0xff]  ;;  %5267 = vmatpush3.msra.mxu0 %v4302_v31 }
 0x532   :  { %4240 = vmatpush1.msra.mxu1 %v4153_v62  ;;  %v4316_v62 = vld [vmem:[#allocation30 + $0xc0] sm:$0xff]  ;;  %5268 = vmatprep.subr.mxu0 %v4317_v21 }
 0x533   :  { %4241 = vmatprep.subr.mxu1 %v4152_v20  ;;  %v4300_v20 = vld [vmem:[#allocation30 + $0x40] sm:$0xff]  ;;  %5269 = vmatpush3.msra.mxu0 %v4301_v36 }
 0x534   :  { %4242 = vmatpush1.msra.mxu1 %v4151_v61  ;;  %v4315_v61 = vld [vmem:[#allocation30 + $0xb8] sm:$0xff]  ;;  %5270 = vmatprep.subr.mxu0 %v4316_v62 }
 0x535   :  { %4243 = vmatprep.subr.mxu1 %v4150_v37  ;;  %v4299_v37 = vld [vmem:[#allocation30 + $0x38] sm:$0xff]  ;;  %5271 = vmatpush3.msra.mxu0 %v4300_v20 }
 0x536   :  { %4244 = vmatpush1.msra.mxu1 %v4149_v5  ;;  %v4314_v5 = vld [vmem:[#allocation30 + $0xb0] sm:$0xff]  ;;  %5272 = vmatprep.subr.mxu0 %v4315_v61 }
 0x537   :  { %4245 = vmatprep.subr.mxu1 %v4148_v58  ;;  %v4298_v58 = vld [vmem:[#allocation30 + $0x30] sm:$0xff]  ;;  %5273 = vmatpush3.msra.mxu0 %v4299_v37 }
 0x538   :  { %4246 = vmatpush1.msra.mxu1 %v4147_v7  ;;  %v4313_v7 = vld [vmem:[#allocation30 + $0xa8] sm:$0xff]  ;;  %5274 = vmatprep.subr.mxu0 %v4314_v5 }
 0x539   :  { %4247 = vmatprep.subr.mxu1 %v4146_v56  ;;  %v4297_v56 = vld [vmem:[#allocation30 + $0x28] sm:$0xff]  ;;  %5275 = vmatpush3.msra.mxu0 %v4298_v58 }
 0x53a   :  { %4248 = vmatpush1.msra.mxu1 %v4145_v57  ;;  %v4312_v57 = vld [vmem:[#allocation30 + $0xa0] sm:$0xff]  ;;  %5276 = vmatprep.subr.mxu0 %v4313_v7 }
 0x53b   :  { %4249 = vmatprep.subr.mxu1 %v4144_v2  ;;  %v4296_v2 = vld [vmem:[#allocation30 + $0x20] sm:$0xff]  ;;  %5277 = vmatpush3.msra.mxu0 %v4297_v56 }
 0x53c   :  { %4250 = vmatpush1.msra.mxu1 %v4143_v4  ;;  %5278 = vmatprep.subr.mxu0 %v4312_v57  ;;  %v4311_v4 = vld [vmem:[#allocation30 + $0x98] sm:$0xff] }
 0x53d   :  { %4251 = vmatprep.subr.mxu1 %v4206_v6  ;;  %5279 = vmatpush3.msra.mxu0 %v4296_v2  ;;  %v4295_v6 = vld [vmem:[#allocation30 + $0x18] sm:$0xff] }
 0x53e   :  { %4252 = vmatpush2.msra.mxu1 %v4205_v10  ;;  %5280 = vmatprep.subr.mxu0 %v4311_v4  ;;  %v4310_v10 = vld [vmem:[#allocation30 + $0x90] sm:$0xff] }
 0x53f   :  { %4253 = vmatprep.subr.mxu1 %v4204_v18  ;;  %5281 = vmatpush3.msra.mxu0 %v4295_v6  ;;  %v4294_v18 = vld [vmem:[#allocation30 + $0x10] sm:$0xff] }
 0x540   :  { %4254 = vmatpush2.msra.mxu1 %v4203_v19  ;;  %5282 = vmatprep.subr.mxu0 %v4310_v10  ;;  %v4309_v19 = vld [vmem:[#allocation30 + $0x88] sm:$0xff] }
 0x541   :  { %4255 = vmatprep.subr.mxu1 %v4202_v24  ;;  %5283 = vmatpush3.msra.mxu0 %v4294_v18  ;;  %v4293_v24 = vld [vmem:[#allocation30 + $0x8] sm:$0xff] }
 0x542   :  { %4256 = vmatpush2.msra.mxu1 %v4201_v25  ;;  %5284 = vmatprep.subr.mxu0 %v4309_v19  ;;  %v4308_v25 = vld [vmem:[#allocation30 + $0x80] sm:$0xff] }
 0x543   :  { %4257 = vmatprep.subr.mxu1 %v4200_v28  ;;  %5285 = vmatpush3.msra.mxu0 %v4293_v24  ;;  %v4292_v28 = vld [vmem:[#allocation30] sm:$0xff] }
 0x544   :  { %4258 = vmatpush2.msra.mxu1 %v4199_v29  ;;  %5286 = vmatprep.subr.mxu0 %v4308_v25 }
 0x545   :  { %4259 = vmatprep.subr.mxu1 %v4198_v30  ;;  %5287 = vmatpush3.msra.mxu0 %v4292_v28  ;;  %v4833_v30 = vld [vmem:[%s6838_s13] ss:$0 sm:$0xff] }
 0x546   :  { %4260 = vmatpush2.msra.mxu1 %v4197_v59 }
 0x547   :  { %4261 = vmatprep.subr.mxu1 %v4196_v0 }
 0x548   :  { %4262 = vmatpush2.msra.mxu1 %v4195_v1 }
 0x549   :  { %4263 = vmatprep.subr.mxu1 %v4194_v8 }
 0x54a   :  { %4264 = vmatpush2.msra.mxu1 %v4193_v38  ;;  %v4207_v38 = vld [vmem:[%s6839_s21] sm:$0x3] }
 0x54b   :  { %4265 = vmatprep.subr.mxu1 %v4192_v3  ;;  %v4212_v3 = vrot.slane %v4207_v38, %v6753_v44 }
 0x54c   :  { %4266 = vmatpush2.msra.mxu1 %v4191_v39  ;;  %v4216_v39 = vrot.slane %v4207_v38, %v6757_v9 }
 0x54d   :  { %4267 = vmatprep.subr.mxu1 %v4190_v40 }
 0x54e   :  { %4268 = vmatpush2.msra.mxu1 %v4189_v41 }
 0x54f   :  { %4269 = vmatprep.subr.mxu1 %v4188_v42 }
 0x550   :  { %4270 = vmatpush2.msra.mxu1 %v4187_v45 }
 0x551   :  { %4271 = vmatprep.subr.mxu1 %v4186_v46 }
 0x552   :  { %4272 = vmatpush2.msra.mxu1 %v4185_v47 }
 0x553   :  { %4273 = vmatprep.subr.mxu1 %v4184_v48 }
 0x554   :  { %4274 = vmatpush2.msra.mxu1 %v4183_v49 }
 0x555   :  { %4275 = vmatprep.subr.mxu1 %v4182_v51 }
 0x556   :  { %4276 = vmatpush2.msra.mxu1 %v4181_v13 }
 0x557   :  { %4277 = vmatprep.subr.mxu1 %v4180_v11 }
 0x558   :  { %4278 = vmatpush2.msra.mxu1 %v4179_v52 }
 0x559   :  { %4279 = vmatprep.subr.mxu1 %v4178_v23 }
 0x55a   :  { %4280 = vmatpush2.msra.mxu1 %v4177_v14 }
 0x55b   :  { %4281 = vmatprep.subr.mxu1 %v4176_v15 }
 0x55c   :  { %4282 = vmatpush2.msra.mxu1 %v4175_v60 }
 0x55d   :  { %4284 = vmatmul.mubr.f32.vlgmr.msra.gmra.mxu1 %v4141_v26 }
 0x5dd   :  { %v5253_v29 = vpop.f32.mrf.mxu1 }
 0x5df   :  { %v5254_v59 = vpop.f32.mrf.mxu1 }
 0x5e0   :  { %v5255_v0 = vadd.f32 %v5254_v59, %v5253_v29 }
 0x5e2   :  { %v4093_v1 = vadd.f32 %v5255_v0, %v4833_v30 }
 0x5e4   :  { %v4429_v8 = vmul.f32 %v4093_v1, %v4093_v1 }
 0x5e6   :  { %4430 = vadd.xlane.f32.xlu0 %v4429_v8 }
 0x61d   :  { %v4285_v40 = vpop.f32.mrf.mxu1 }
 0x61e   :  { %v4286_v41 = vadd.f32 %v4285_v40, %v4212_v3 }
 0x61f   :  { %v4287_v42 = vpop.f32.mrf.mxu1 }
 0x620   :  { %v4288_v45 = vadd.f32 %v4287_v42, %v4216_v39  ;;  %v4290_v47 = vmax.f32 %v4286_v41, 0.0 }
 0x622   :  { %v4291_v46 = vmax.f32 %v4288_v45, 0.0 }
 0x624   :  { %4395 = vmatprep.mubr.f32.mxu0 %v4291_v46 }
 0x625   :  { %4396 = vmatmul.mubr.f32.vlgmr.msra.gmra.mxu0 %v4290_v47 }
 0x66f   :  { %v4431_v48 = vpop.xlane.xlu0 %4430 }
 0x670   :  { %v4432_v49 = vmax.f32 %v4431_v48, 1e-24 }
 0x672   :  { %5699 = vrsqrt.f32 %v4432_v49 }
 0x67f   :  { %v5700_v51 = vpop.eup %5699 }
 0x680   :  { %v4434_v12 = vmul.f32 %v5700_v51, %v4093_v1 }
 0x682   :  { %4435 = vst [vmem:[#allocation37] sm:$0xff] %v4434_v12 }
 0x6e5   :  { %v5288_v13 = vpop.f32.mrf.mxu0 }
 0x6e7   :  { %v5289_v44 = vpop.f32.mrf.mxu0 }
 0x6e8   :  { %v5290_v11 = vadd.f32 %v5289_v44, %v5288_v13 }
 0x6ea   :  { %v6795_v9 = vadd.f32 %v5290_v11, %v4834_v32 }
 0x6ec   :  { %v4436_v52 = vmul.f32 %v6795_v9, %v6795_v9 }
 0x6ee   :  { %4437 = vadd.xlane.f32.xlu1 %v4436_v52 }
 0x6ef   :  { %6054 = shalt.err (!%p6051_p5)
}
 0x6f0   :  { %s6841_s8 = sld [smem:[#allocation70_spill]]  ;;  %s6063_s28 = scalar_lea.vmem %s4480_s30, 128 }
 0x6f1   :  { %p6064_p6 = scmp.ne.s32.totalorder %s4480_s30, %s6063_s28  ;;  %p6068_p7 = scmp.lt.s32.totalorder %s4480_s30, %s4480_s30 }
 0x6f2   :  { %p6069_p8 = scmp.lt.s32.totalorder %s6063_s28, %s6063_s28 }
 0x6f4   :  { %p6070_p9 = por %p6069_p8, %p6068_p7 }
 0x6f6   :  { %4462 = dma.vmem_to_hbm [thread:$0]  %s4460_s17, 128, %s6841_s8, [#allocation33]  }
 0x6f7   :  { %p6071_p10 = pnand %p6070_p9, %p6064_p6 }
 0x6f9   :  { %6074 = shalt.err (!%p6071_p10)
}
 0x6fa   :  { %4482 = dma.vmem_to_hbm [thread:$0]  %s4480_s30, 128, %s6428_s4, [#allocation36]  }
 0x6fb   :  { %s6251_s27 = smov [#allocation31]   ;;  %s6252_s7 = smov [#allocation34]  }
 0x6fc   :  { %s4449_s0 = sshll.u32 %s6251_s27, 4  ;;  %s4469_s10 = sshll.u32 %s6252_s7, 4  ;;  %s4450_s0 = int_to_ptr.vmem [resolvable:$true] %s4449_s0  ;;  %s4470_s10 = int_to_ptr.vmem [resolvable:$true] %s4469_s10 }
 0x6fd   :  { %s6083_s19 = scalar_lea.vmem %s4450_s0, 128  ;;  %p6088_p12 = scmp.lt.s32.totalorder %s4450_s0, %s4450_s0 }
 0x6fe   :  { %p6084_p11 = scmp.ne.s32.totalorder %s4450_s0, %s6083_s19  ;;  %p6089_p13 = scmp.lt.s32.totalorder %s6083_s19, %s6083_s19 }
 0x700   :  { %p6090_p0 = por %p6089_p13, %p6088_p12 }
 0x702   :  { %p6091_p1 = pnand %p6090_p0, %p6084_p11 }
 0x704   :  { %6094 = shalt.err (!%p6091_p1)
}
 0x705   :  { %s6842_s25 = sld [smem:[#allocation69_spill]]  ;;  %s6103_s3 = scalar_lea.vmem %s4470_s10, 128 }
 0x706   :  { %p6104_p2 = scmp.ne.s32.totalorder %s4470_s10, %s6103_s3  ;;  %p6108_p3 = scmp.lt.s32.totalorder %s4470_s10, %s4470_s10 }
 0x707   :  { %p6109_p4 = scmp.lt.s32.totalorder %s6103_s3, %s6103_s3 }
 0x709   :  { %p6110_p5 = por %p6109_p4, %p6108_p3 }
 0x70b   :  { %4452 = dma.vmem_to_hbm [thread:$0]  %s4450_s0, 128, %s6842_s25, [#allocation6]  }
 0x70c   :  { %p6111_p6 = pnand %p6110_p5, %p6104_p2 }
 0x70e   :  { %6114 = shalt.err (!%p6111_p6)
}
 0x70f   :  { %4472 = dma.vmem_to_hbm [thread:$0]  %s4470_s10, 128, %s6423_s24, [#allocation33]  }
 0x710   :  { %s6253_s4 = smov [#allocation37]  }
 0x711   :  { %s4489_s1 = sshll.u32 %s6253_s4, 4  ;;  %s4490_s1 = int_to_ptr.vmem [resolvable:$true] %s4489_s1 }
 0x712   :  { %s6123_s2 = scalar_lea.vmem %s4490_s1, 128  ;;  %p6128_p8 = scmp.lt.s32.totalorder %s4490_s1, %s4490_s1 }
 0x713   :  { %p6124_p7 = scmp.ne.s32.totalorder %s4490_s1, %s6123_s2  ;;  %p6129_p9 = scmp.lt.s32.totalorder %s6123_s2, %s6123_s2 }
 0x715   :  { %p6130_p10 = por %p6129_p9, %p6128_p8 }
 0x717   :  { %p6131_p11 = pnand %p6130_p10, %p6124_p7 }
 0x719   :  { %6134 = shalt.err (!%p6131_p11)
}
 0x71a   :  { %4492 = dma.vmem_to_hbm [thread:$0]  %s4490_s1, 128, %s6433_s12, [#allocation36]  }
 0x71b   :  { %s6254_s11 = smov [#allocation38]  }
 0x71c   :  { %s4499_s6 = sshll.u32 %s6254_s11, 4  ;;  %s4500_s6 = int_to_ptr.vmem [resolvable:$true] %s4499_s6 }
 0x71d   :  { %s6143_s24 = scalar_lea.vmem %s4500_s6, 128  ;;  %p6148_p13 = scmp.lt.s32.totalorder %s4500_s6, %s4500_s6 }
 0x71e   :  { %p6144_p12 = scmp.ne.s32.totalorder %s4500_s6, %s6143_s24  ;;  %p6149_p0 = scmp.lt.s32.totalorder %s6143_s24, %s6143_s24 }
 0x720   :  { %p6150_p1 = por %p6149_p0, %p6148_p13 }
 0x722   :  { %p6151_p2 = pnand %p6150_p1, %p6144_p12 }
 0x777   :  { %v4438_v23 = vpop.xlane.xlu1 %4437 }
 0x778   :  { %v4439_v33 = vmax.f32 %v4438_v23, 1e-24 }
 0x77a   :  { %5701 = vrsqrt.f32 %v4439_v33 }
 0x787   :  { %v5702_v14 = vpop.eup %5701 }
 0x788   :  { %v4441_v53 = vmul.f32 %v5702_v14, %v6795_v9 }
 0x78a   :  { %4442 = vst [vmem:[#allocation38] sm:$0xff] %v4441_v53 }
 0x78b   :  { %6154 = shalt.err (!%p6151_p2)
}
 0x78c   :  { %4502 = dma.vmem_to_hbm [thread:$0]  %s4500_s6, 128, %s6438_s20, [#allocation39]  }
 0x78d   :  { %6181 = dma.done.wait [#allocation6], 128  }
 0x78e   :  { %6182 = vsyncadd [#allocation6], 4294967168 }
 0x78f   :  { %6183 = dma.done.wait [#allocation33], 256  }
 0x790   :  { %6184 = vsyncadd [#allocation33], 4294967040 }
 0x791   :  { %6185 = dma.done.wait [#allocation36], 256  }
 0x792   :  { %6186 = vsyncadd [#allocation36], 4294967040 }
 0x793   :  { %6187 = dma.done.wait [#allocation39], 128  }
 0x794   :  { %6188 = vsyncadd [#allocation39], 4294967168 }
 0x795   :  { %4521 = vsyncpa [#allocation5], 1 }
 0x796   :  { %4522 = vsyncpa [#allocation8], 1 }
 0x797   :  { %4523 = vsyncpa [#allocation11], 1 }
 0x798   :  { %4524 = vsyncpa [#allocation14], 1 }
 0x799   :  { %4525 = vsyncpa [#allocation17], 1 }
 0x79a   :  { %4526 = vsyncpa [#allocation20], 1 }
 0x79b   :  { %4527 = vsyncpa [#allocation23], 1 }
 0x79c   :  { %4528 = vsyncpa [#allocation26], 1 }
 0x79d   :  { %4529 = vsyncpa [#allocation29], 1 }
 0x79e   :  { %4530 = vsyncpa [#allocation6], 1 }
 0x79f   :  { %4531 = vsyncpa [#allocation33], 1 }
 0x7a0   :  { %4532 = vsyncpa [#allocation36], 1 }
 0x7a1   :  { %4533 = vsyncpa [#allocation39], 1 }

</bundles_post_ra>
